<compile_context>
chip_gen: v6e
topology: v6e:2x2x1
jax: 0.10.0
libtpu: 0.0.40
codegen_flags: <defaults>
</compile_context>

<pallas_src>
import jax
import jax.numpy as jnp
from jax import lax
from jax.experimental import pallas as pl
from jax.experimental.pallas import tpu as pltpu

# ----------------------------- model config ---------------------------------
VOCAB = 21
VOCAB_PAD = 32       # pad one-hot / embedding table to an aligned size
EMBED = 32
HIDDEN = 32          # small hidden size for the example (module default is 128)
NUM_LAYERS = 2
BILSTM = True
N_CLS = 2
B = 2                # batch
T = 8                # sequence length

_VMEM = pl.BlockSpec(memory_space=pltpu.MemorySpace.VMEM)


# --------------------------- fused Pallas kernel ------------------------------
def fused_lstm_kernel(tok_ref, emb_ref,
                      w0i_ref, w0h_ref, b0_ref,
                      w1i_ref, w1h_ref, b1_ref,
                      attw_ref, f1w_ref, f1b_ref, f2w_ref, f2b_ref,
                      out_ref, feat1_ref, feat2_ref):
    """Full forward pass.

    tok_ref:  (T*B, 1) int32, row index = t*B + b (time-major)
    emb_ref:  (VOCAB_PAD, EMBED) f32
    w{L}i:    (D_in, 8H) bf16   [Wih_fwd | Wih_bwd], gate order i,f,g,o per direction
    w{L}h:    (2H, 8H)  bf16    block-diag(Whh_fwd, Whh_bwd)
    b{L}:     (1, 8H)   f32     [b_fwd | b_bwd]  (b_ih + b_hh combined)
    attw:     (2H, 1)   f32
    f1w/f1b/f2w/f2b: FC head weights (f32)
    out_ref:  (B, N_CLS) f32
    feat1_ref/feat2_ref: (T*B, 2H) f32 VMEM scratch, per-layer biLSTM outputs
    """
    H = HIDDEN
    G4 = 4 * H
    TB = T * B

    # ---- embedding lookup as a one-hot MXU matmul (stays inside the kernel) ----
    tok = tok_ref[...]                                            # (T*B, 1) int32
    vocab_ids = lax.broadcasted_iota(jnp.int32, (TB, VOCAB_PAD), 1)
    onehot = (tok == vocab_ids).astype(jnp.float32)               # (T*B, VOCAB_PAD)
    x0 = jnp.dot(onehot, emb_ref[...],
                 preferred_element_type=jnp.float32)              # (T*B, EMBED)

    # g-gate lane mask (columns [2H,3H) within each 4H gate block), hoisted.
    lane = lax.broadcasted_iota(jnp.int32, (B, 8 * H), 1)
    is_g = ((lane % G4) >= 2 * H) & ((lane % G4) < 3 * H)

    def bilstm_layer(x_val, wih_ref, whh_ref, b_ref, out_feat_ref):
        # Hoisted input projection for BOTH directions at once: (T*B, 8H).
        xp = jnp.dot(x_val.astype(jnp.bfloat16), wih_ref[...],
                     preferred_element_type=jnp.float32) + b_ref[...]
        whh = whh_ref[...]                                        # (2H, 8H) bf16
        h_cat = jnp.zeros((B, 2 * H), jnp.float32)
        c_f = jnp.zeros((B, H), jnp.float32)
        c_b = jnp.zeros((B, H), jnp.float32)

        for s in range(T):                                        # fully unrolled
            # forward direction consumes time s, backward consumes time T-1-s
            pre_f = xp[s * B:(s + 1) * B, 0:G4]                   # (B, 4H)
            pre_b = xp[(T - 1 - s) * B:(T - s) * B, G4:2 * G4]    # (B, 4H)
            gates = jnp.concatenate([pre_f, pre_b], axis=1)       # (B, 8H)
            if s > 0:   # initial hidden state is zero -> skip the first hh matmul
                gates = gates + jnp.dot(h_cat.astype(jnp.bfloat16), whh,
                                        preferred_element_type=jnp.float32)

            # full-width nonlinearities + single select for the g gate
            sig = jax.nn.sigmoid(gates)
            tnh = jnp.tanh(gates)
            act = jnp.where(is_g, tnh, sig)

            i_f, f_f = act[:, 0:H], act[:, H:2 * H]
            g_f, o_f = act[:, 2 * H:3 * H], act[:, 3 * H:G4]
            i_b, f_b = act[:, G4:G4 + H], act[:, G4 + H:G4 + 2 * H]
            g_b, o_b = act[:, G4 + 2 * H:G4 + 3 * H], act[:, G4 + 3 * H:2 * G4]

            if s == 0:  # initial cell state is zero
                c_f_new = i_f * g_f
                c_b_new = i_b * g_b
            else:
                c_f_new = f_f * c_f + i_f * g_f
                c_b_new = f_b * c_b + i_b * g_b
            h_f = o_f * jnp.tanh(c_f_new)
            h_b = o_b * jnp.tanh(c_b_new)
            c_f, c_b = c_f_new, c_b_new
            h_cat = jnp.concatenate([h_f, h_b], axis=1)           # (B, 2H)

            # write features at the correct time index (VMEM scratch only)
            out_feat_ref[s * B:(s + 1) * B, 0:H] = h_f
            out_feat_ref[(T - 1 - s) * B:(T - s) * B, H:2 * H] = h_b

    bilstm_layer(x0, w0i_ref, w0h_ref, b0_ref, feat1_ref)
    # TODO(synk): inter-layer dropout p=0.05 is identity in eval mode.
    bilstm_layer(feat1_ref[...], w1i_ref, w1h_ref, b1_ref, feat2_ref)

    # ---- attention over time, vectorized across the batch (all in VMEM) -------
    feat = feat2_ref[...]                                         # (T*B, 2H)
    sc = jnp.dot(feat, attw_ref[...],
                 preferred_element_type=jnp.float32)              # (T*B, 1)

    # per-row batch-membership mask (row r belongs to batch r % B)
    col_b = lax.broadcasted_iota(jnp.int32, (TB, B), 1)
    row_b = lax.broadcasted_iota(jnp.int32, (TB, B), 0) % B
    sel = row_b == col_b                                          # (T*B, B) one-hot
    sel_f = sel.astype(jnp.float32)

    m_b = jnp.max(jnp.where(sel, sc, -jnp.inf), axis=0, keepdims=True)   # (1, B)
    m_row = jnp.sum(sel_f * m_b, axis=1, keepdims=True)                  # (T*B, 1)
    e_row = jnp.exp(sc - m_row)                                          # (T*B, 1)
    d_b = jnp.sum(sel_f * e_row, axis=0, keepdims=True)                  # (1, B)
    d_row = jnp.sum(sel_f * d_b, axis=1, keepdims=True)                  # (T*B, 1)
    p_row = e_row * pl.reciprocal(d_row, approx=True)                    # softmax over time

    # segment-sum per batch with a single MXU matmul: (B, T*B) @ (T*B, 2H)
    selT_c = lax.broadcasted_iota(jnp.int32, (B, TB), 1)
    selT_r = lax.broadcasted_iota(jnp.int32, (B, TB), 0)
    sel_T = ((selT_c % B) == selT_r).astype(jnp.float32)                 # (B, T*B)
    att = jnp.dot(sel_T, feat * p_row,
                  preferred_element_type=jnp.float32)                    # (B, 2H)

    # ---- MLP head: Linear -> (Dropout identity in eval) -> LeakyReLU -> Linear ----
    h1 = jnp.dot(att, f1w_ref[...], preferred_element_type=jnp.float32) + f1b_ref[...]
    h1 = jnp.where(h1 > 0, h1, 0.01 * h1)                         # LeakyReLU(0.01)
    out_ref[...] = (jnp.dot(h1, f2w_ref[...], preferred_element_type=jnp.float32)
                    + f2b_ref[...])


# ------------------------------ wrapper ---------------------------------------
def lstm_forward(tokens, params):
    """tokens: (B, T) int32 -> logits (B, N_CLS). One fused pallas_call."""
    Bb, Tt = tokens.shape
    H = HIDDEN

    # time-major flat token ids: row = t*B + b
    tok_flat = tokens.T.reshape(Tt * Bb, 1).astype(jnp.int32)

    # pad embedding table to an aligned vocab size (rows >= VOCAB are never selected)
    emb_pad = jnp.zeros((VOCAB_PAD, EMBED), jnp.float32).at[:VOCAB].set(
        params["embedding"])

    def pack_layer(p):
        wih = jnp.concatenate([p["wih_f"], p["wih_b"]], axis=1).astype(jnp.bfloat16)
        whh = jnp.zeros((2 * H, 8 * H), jnp.float32)
        whh = whh.at[:H, :4 * H].set(p["whh_f"]).at[H:, 4 * H:].set(p["whh_b"])
        bias = jnp.concatenate([p["b_f"], p["b_b"]], axis=1)
        return wih, whh.astype(jnp.bfloat16), bias

    w0i, w0h, b0 = pack_layer(params["lstm"][0])
    w1i, w1h, b1 = pack_layer(params["lstm"][1])

    return pl.pallas_call(
        fused_lstm_kernel,
        out_shape=jax.ShapeDtypeStruct((Bb, N_CLS), jnp.float32),
        in_specs=[_VMEM] * 13,
        out_specs=_VMEM,
        scratch_shapes=[pltpu.VMEM((Tt * Bb, 2 * H), jnp.float32),
                        pltpu.VMEM((Tt * Bb, 2 * H), jnp.float32)],
        # TODO(synk): at production sizes (H=128, long T, large B) this should become a
        # batch-tiled grid with dimension_semantics=("parallel",) to use both v7x cores.
    )(tok_flat, emb_pad, w0i, w0h, b0, w1i, w1h, b1,
      params["att_w"], params["fc1_w"], params["fc1_b"],
      params["fc2_w"], params["fc2_b"])


# --------------------------- parameter init ----------------------------------
def init_params(key):
    keys = jax.random.split(key, 32)
    ki = iter(keys)

    def unif(k, shape, a):
        return jax.random.uniform(k, shape, jnp.float32, minval=-a, maxval=a)

    params = {}
    params["embedding"] = jax.random.normal(next(ki), (VOCAB, EMBED), jnp.float32)

    klstm = 1.0 / jnp.sqrt(HIDDEN).item()
    lstm_params = []
    in_dim = EMBED
    for _ in range(NUM_LAYERS):
        p = {
            "wih_f": unif(next(ki), (in_dim, 4 * HIDDEN), klstm),
            "whh_f": unif(next(ki), (HIDDEN, 4 * HIDDEN), klstm),
            "b_f":   unif(next(ki), (1, 4 * HIDDEN), klstm),
            "wih_b": unif(next(ki), (in_dim, 4 * HIDDEN), klstm),
            "whh_b": unif(next(ki), (HIDDEN, 4 * HIDDEN), klstm),
            "b_b":   unif(next(ki), (1, 4 * HIDDEN), klstm),
        }
        lstm_params.append(p)
        in_dim = 2 * HIDDEN if BILSTM else HIDDEN
    params["lstm"] = lstm_params

    feat = 2 * HIDDEN if BILSTM else HIDDEN
    params["att_w"] = unif(next(ki), (feat, 1), 0.1)

    params["fc1_w"] = unif(next(ki), (feat, HIDDEN), 1.0 / jnp.sqrt(feat).item())
    params["fc1_b"] = unif(next(ki), (1, HIDDEN), 1.0 / jnp.sqrt(feat).item())
    params["fc2_w"] = unif(next(ki), (HIDDEN, N_CLS), klstm)
    params["fc2_b"] = unif(next(ki), (1, N_CLS), klstm)
    return params


# --------------------------------- main ---------------------------------------
if __name__ == "__main__":
    key = jax.random.PRNGKey(0)
    kp, kx = jax.random.split(key)
    params = init_params(kp)
    tokens = jax.random.randint(kx, (B, T), 0, VOCAB, dtype=jnp.int32)

    logits = jax.jit(lstm_forward)(tokens, params)
    jax.block_until_ready(logits)
    assert logits.shape == (B, N_CLS) and logits.dtype == jnp.float32
    print("KERNEL_OK")
</pallas_src>

<mosaic_0001>
module attributes {stable_mosaic.version = 11 : i64} {
  func.func @fused_lstm_kernel(%arg0: memref<16x1xi32, #tpu.memory_space<vmem>>, %arg1: memref<32x32xf32, #tpu.memory_space<vmem>>, %arg2: memref<32x256xbf16, #tpu.memory_space<vmem>>, %arg3: memref<64x256xbf16, #tpu.memory_space<vmem>>, %arg4: memref<1x256xf32, #tpu.memory_space<vmem>>, %arg5: memref<64x256xbf16, #tpu.memory_space<vmem>>, %arg6: memref<64x256xbf16, #tpu.memory_space<vmem>>, %arg7: memref<1x256xf32, #tpu.memory_space<vmem>>, %arg8: memref<64x1xf32, #tpu.memory_space<vmem>>, %arg9: memref<64x32xf32, #tpu.memory_space<vmem>>, %arg10: memref<1x32xf32, #tpu.memory_space<vmem>>, %arg11: memref<32x2xf32, #tpu.memory_space<vmem>>, %arg12: memref<1x2xf32, #tpu.memory_space<vmem>>, %arg13: memref<2x2xf32, #tpu.memory_space<vmem>>, %arg14: memref<16x64xf32, #tpu.memory_space<vmem>>, %arg15: memref<16x64xf32, #tpu.memory_space<vmem>>) attributes {dimension_semantics = [], scalar_prefetch = 0 : i64, scratch_operands = 2 : i64, tpu.core_type = #tpu.core_type<tc>} {
    %c0 = arith.constant 0 : index
    %c0_0 = arith.constant 0 : index
    %0 = vector.load %arg0[%c0, %c0_0] : memref<16x1xi32, #tpu.memory_space<vmem>>, vector<16x1xi32>
    %1 = tpu.iota {dimensions = array<i32: 1>} : vector<16x32xi32>
    %2 = vector.broadcast %0 : vector<16x1xi32> to vector<16x32xi32>
    %3 = arith.cmpi eq, %2, %1 : vector<16x32xi32>
    %4 = arith.extui %3 : vector<16x32xi1> to vector<16x32xi32>
    %5 = arith.sitofp %4 : vector<16x32xi32> to vector<16x32xf32>
    %c0_1 = arith.constant 0 : index
    %c0_2 = arith.constant 0 : index
    %6 = vector.load %arg1[%c0_1, %c0_2] : memref<32x32xf32, #tpu.memory_space<vmem>>, vector<32x32xf32>
    %cst = arith.constant dense<0.000000e+00> : vector<16x32xf32>
    %7 = tpu.matmul %5, %6, %cst {dimension_numbers = #tpu.dot_dimension_numbers<[1], [0], [0], [1], [0, 0, 1, 1], [], []>} : vector<16x32xf32>, vector<32x32xf32>, vector<16x32xf32> -> vector<16x32xf32>
    %8 = tpu.iota {dimensions = array<i32: 1>} : vector<2x256xi32>
    %c128_i32 = arith.constant 128 : i32
    %c0_i32 = arith.constant 0 : i32
    %9 = arith.cmpi eq, %c128_i32, %c0_i32 : i32
    %c1_i32 = arith.constant 1 : i32
    %10 = arith.select %9, %c1_i32, %c128_i32 : i32
    %11 = vector.broadcast %10 : i32 to vector<2x256xi32>
    %12 = arith.remsi %8, %11 : vector<2x256xi32>
    %c0_i32_3 = arith.constant 0 : i32
    %13 = vector.broadcast %c0_i32_3 : i32 to vector<2x256xi32>
    %14 = arith.cmpi ne, %12, %13 : vector<2x256xi32>
    %c0_i32_4 = arith.constant 0 : i32
    %15 = vector.broadcast %c0_i32_4 : i32 to vector<2x256xi32>
    %16 = arith.cmpi slt, %12, %15 : vector<2x256xi32>
    %c0_i32_5 = arith.constant 0 : i32
    %17 = arith.cmpi slt, %10, %c0_i32_5 : i32
    %18 = vector.broadcast %17 : i1 to vector<2x256xi1>
    %19 = vector.broadcast %18 : vector<2x256xi1> to vector<2x256xi1>
    %20 = arith.xori %16, %19 : vector<2x256xi1>
    %21 = arith.andi %20, %14 : vector<2x256xi1>
    %22 = vector.broadcast %10 : i32 to vector<2x256xi32>
    %23 = arith.addi %12, %22 : vector<2x256xi32>
    %24 = arith.select %21, %23, %12 : vector<2x256xi1>, vector<2x256xi32>
    %c64_i32 = arith.constant 64 : i32
    %25 = vector.broadcast %c64_i32 : i32 to vector<2x256xi32>
    %26 = arith.cmpi sge, %24, %25 : vector<2x256xi32>
    %c128_i32_6 = arith.constant 128 : i32
    %c0_i32_7 = arith.constant 0 : i32
    %27 = arith.cmpi eq, %c128_i32_6, %c0_i32_7 : i32
    %c1_i32_8 = arith.constant 1 : i32
    %28 = arith.select %27, %c1_i32_8, %c128_i32_6 : i32
    %29 = vector.broadcast %28 : i32 to vector<2x256xi32>
    %30 = arith.remsi %8, %29 : vector<2x256xi32>
    %c0_i32_9 = arith.constant 0 : i32
    %31 = vector.broadcast %c0_i32_9 : i32 to vector<2x256xi32>
    %32 = arith.cmpi ne, %30, %31 : vector<2x256xi32>
    %c0_i32_10 = arith.constant 0 : i32
    %33 = vector.broadcast %c0_i32_10 : i32 to vector<2x256xi32>
    %34 = arith.cmpi slt, %30, %33 : vector<2x256xi32>
    %c0_i32_11 = arith.constant 0 : i32
    %35 = arith.cmpi slt, %28, %c0_i32_11 : i32
    %36 = vector.broadcast %35 : i1 to vector<2x256xi1>
    %37 = vector.broadcast %36 : vector<2x256xi1> to vector<2x256xi1>
    %38 = arith.xori %34, %37 : vector<2x256xi1>
    %39 = arith.andi %38, %32 : vector<2x256xi1>
    %40 = vector.broadcast %28 : i32 to vector<2x256xi32>
    %41 = arith.addi %30, %40 : vector<2x256xi32>
    %42 = arith.select %39, %41, %30 : vector<2x256xi1>, vector<2x256xi32>
    %c96_i32 = arith.constant 96 : i32
    %43 = vector.broadcast %c96_i32 : i32 to vector<2x256xi32>
    %44 = arith.cmpi slt, %42, %43 : vector<2x256xi32>
    %45 = arith.andi %26, %44 : vector<2x256xi1>
    %46 = arith.truncf %7 : vector<16x32xf32> to vector<16x32xbf16>
    %c0_12 = arith.constant 0 : index
    %c0_13 = arith.constant 0 : index
    %47 = vector.load %arg2[%c0_12, %c0_13] : memref<32x256xbf16, #tpu.memory_space<vmem>>, vector<32x256xbf16>
    %cst_14 = arith.constant dense<0.000000e+00> : vector<16x256xf32>
    %48 = tpu.matmul %46, %47, %cst_14 {dimension_numbers = #tpu.dot_dimension_numbers<[1], [0], [0], [1], [0, 0, 1, 1], [], []>} : vector<16x32xbf16>, vector<32x256xbf16>, vector<16x256xf32> -> vector<16x256xf32>
    %c0_15 = arith.constant 0 : index
    %c0_16 = arith.constant 0 : index
    %49 = vector.load %arg4[%c0_15, %c0_16] : memref<1x256xf32, #tpu.memory_space<vmem>>, vector<1x256xf32>
    %50 = vector.broadcast %49 : vector<1x256xf32> to vector<16x256xf32>
    %51 = arith.addf %48, %50 : vector<16x256xf32>
    %c0_17 = arith.constant 0 : index
    %c0_18 = arith.constant 0 : index
    %52 = vector.load %arg3[%c0_17, %c0_18] : memref<64x256xbf16, #tpu.memory_space<vmem>>, vector<64x256xbf16>
    %53 = vector.extract_strided_slice %51 {offsets = [0, 0], sizes = [2, 128], strides = [1, 1]} : vector<16x256xf32> to vector<2x128xf32>
    %54 = vector.extract_strided_slice %51 {offsets = [14, 128], sizes = [2, 128], strides = [1, 1]} : vector<16x256xf32> to vector<2x128xf32>
    %55 = tpu.concatenate %53, %54 in 1 : vector<2x128xf32>, vector<2x128xf32> -> vector<2x256xf32>
    %56 = arith.negf %55 : vector<2x256xf32>
    %57 = math.exp %56 : vector<2x256xf32>
    %cst_19 = arith.constant 1.000000e+00 : f32
    %58 = vector.broadcast %cst_19 : f32 to vector<2x256xf32>
    %59 = arith.addf %58, %57 : vector<2x256xf32>
    %60 = arith.divf %58, %59 : vector<2x256xf32>
    %61 = math.tanh %55 : vector<2x256xf32>
    %62 = arith.select %45, %61, %60 : vector<2x256xi1>, vector<2x256xf32>
    %63 = vector.extract_strided_slice %62 {offsets = [0, 0], sizes = [2, 32], strides = [1, 1]} : vector<2x256xf32> to vector<2x32xf32>
    %64 = vector.extract_strided_slice %62 {offsets = [0, 64], sizes = [2, 32], strides = [1, 1]} : vector<2x256xf32> to vector<2x32xf32>
    %65 = vector.extract_strided_slice %62 {offsets = [0, 96], sizes = [2, 32], strides = [1, 1]} : vector<2x256xf32> to vector<2x32xf32>
    %66 = vector.extract_strided_slice %62 {offsets = [0, 128], sizes = [2, 32], strides = [1, 1]} : vector<2x256xf32> to vector<2x32xf32>
    %67 = vector.extract_strided_slice %62 {offsets = [0, 192], sizes = [2, 32], strides = [1, 1]} : vector<2x256xf32> to vector<2x32xf32>
    %68 = vector.extract_strided_slice %62 {offsets = [0, 224], sizes = [2, 32], strides = [1, 1]} : vector<2x256xf32> to vector<2x32xf32>
    %69 = arith.mulf %63, %64 : vector<2x32xf32>
    %70 = arith.mulf %66, %67 : vector<2x32xf32>
    %71 = math.tanh %69 : vector<2x32xf32>
    %72 = arith.mulf %65, %71 : vector<2x32xf32>
    %73 = math.tanh %70 : vector<2x32xf32>
    %74 = arith.mulf %68, %73 : vector<2x32xf32>
    %75 = tpu.concatenate %72, %74 in 1 : vector<2x32xf32>, vector<2x32xf32> -> vector<2x64xf32>
    %c0_20 = arith.constant 0 : index
    %c0_21 = arith.constant 0 : index
    %76 = vector.load %arg14[%c0_20, %c0_21] : memref<16x64xf32, #tpu.memory_space<vmem>>, vector<2x32xf32>
    tpu.vector_store %arg14[%c0_20, %c0_21], %72 {strides = array<i32>} : memref<16x64xf32, #tpu.memory_space<vmem>>, vector<2x32xf32>,
    %c14 = arith.constant 14 : index
    %c32 = arith.constant 32 : index
    %77 = vector.load %arg14[%c14, %c32] : memref<16x64xf32, #tpu.memory_space<vmem>>, vector<2x32xf32>
    tpu.vector_store %arg14[%c14, %c32], %74 {strides = array<i32>} : memref<16x64xf32, #tpu.memory_space<vmem>>, vector<2x32xf32>,
    %78 = vector.extract_strided_slice %51 {offsets = [2, 0], sizes = [2, 128], strides = [1, 1]} : vector<16x256xf32> to vector<2x128xf32>
    %79 = vector.extract_strided_slice %51 {offsets = [12, 128], sizes = [2, 128], strides = [1, 1]} : vector<16x256xf32> to vector<2x128xf32>
    %80 = tpu.concatenate %78, %79 in 1 : vector<2x128xf32>, vector<2x128xf32> -> vector<2x256xf32>
    %81 = arith.truncf %75 : vector<2x64xf32> to vector<2x64xbf16>
    %cst_22 = arith.constant dense<0.000000e+00> : vector<2x256xf32>
    %82 = tpu.matmul %81, %52, %cst_22 {dimension_numbers = #tpu.dot_dimension_numbers<[1], [0], [0], [1], [0, 0, 1, 1], [], []>} : vector<2x64xbf16>, vector<64x256xbf16>, vector<2x256xf32> -> vector<2x256xf32>
    %83 = arith.addf %80, %82 : vector<2x256xf32>
    %84 = arith.negf %83 : vector<2x256xf32>
    %85 = math.exp %84 : vector<2x256xf32>
    %cst_23 = arith.constant 1.000000e+00 : f32
    %86 = vector.broadcast %cst_23 : f32 to vector<2x256xf32>
    %87 = arith.addf %86, %85 : vector<2x256xf32>
    %88 = arith.divf %86, %87 : vector<2x256xf32>
    %89 = math.tanh %83 : vector<2x256xf32>
    %90 = arith.select %45, %89, %88 : vector<2x256xi1>, vector<2x256xf32>
    %91 = vector.extract_strided_slice %90 {offsets = [0, 0], sizes = [2, 32], strides = [1, 1]} : vector<2x256xf32> to vector<2x32xf32>
    %92 = vector.extract_strided_slice %90 {offsets = [0, 32], sizes = [2, 32], strides = [1, 1]} : vector<2x256xf32> to vector<2x32xf32>
    %93 = vector.extract_strided_slice %90 {offsets = [0, 64], sizes = [2, 32], strides = [1, 1]} : vector<2x256xf32> to vector<2x32xf32>
    %94 = vector.extract_strided_slice %90 {offsets = [0, 96], sizes = [2, 32], strides = [1, 1]} : vector<2x256xf32> to vector<2x32xf32>
    %95 = vector.extract_strided_slice %90 {offsets = [0, 128], sizes = [2, 32], strides = [1, 1]} : vector<2x256xf32> to vector<2x32xf32>
    %96 = vector.extract_strided_slice %90 {offsets = [0, 160], sizes = [2, 32], strides = [1, 1]} : vector<2x256xf32> to vector<2x32xf32>
    %97 = vector.extract_strided_slice %90 {offsets = [0, 192], sizes = [2, 32], strides = [1, 1]} : vector<2x256xf32> to vector<2x32xf32>
    %98 = vector.extract_strided_slice %90 {offsets = [0, 224], sizes = [2, 32], strides = [1, 1]} : vector<2x256xf32> to vector<2x32xf32>
    %99 = arith.mulf %92, %69 : vector<2x32xf32>
    %100 = arith.mulf %91, %93 : vector<2x32xf32>
    %101 = arith.addf %99, %100 : vector<2x32xf32>
    %102 = arith.mulf %96, %70 : vector<2x32xf32>
    %103 = arith.mulf %95, %97 : vector<2x32xf32>
    %104 = arith.addf %102, %103 : vector<2x32xf32>
    %105 = math.tanh %101 : vector<2x32xf32>
    %106 = arith.mulf %94, %105 : vector<2x32xf32>
    %107 = math.tanh %104 : vector<2x32xf32>
    %108 = arith.mulf %98, %107 : vector<2x32xf32>
    %109 = tpu.concatenate %106, %108 in 1 : vector<2x32xf32>, vector<2x32xf32> -> vector<2x64xf32>
    %c2 = arith.constant 2 : index
    %c0_24 = arith.constant 0 : index
    %110 = vector.load %arg14[%c2, %c0_24] : memref<16x64xf32, #tpu.memory_space<vmem>>, vector<2x32xf32>
    tpu.vector_store %arg14[%c2, %c0_24], %106 {strides = array<i32>} : memref<16x64xf32, #tpu.memory_space<vmem>>, vector<2x32xf32>,
    %c12 = arith.constant 12 : index
    %c32_25 = arith.constant 32 : index
    %111 = vector.load %arg14[%c12, %c32_25] : memref<16x64xf32, #tpu.memory_space<vmem>>, vector<2x32xf32>
    tpu.vector_store %arg14[%c12, %c32_25], %108 {strides = array<i32>} : memref<16x64xf32, #tpu.memory_space<vmem>>, vector<2x32xf32>,
    %112 = vector.extract_strided_slice %51 {offsets = [4, 0], sizes = [2, 128], strides = [1, 1]} : vector<16x256xf32> to vector<2x128xf32>
    %113 = vector.extract_strided_slice %51 {offsets = [10, 128], sizes = [2, 128], strides = [1, 1]} : vector<16x256xf32> to vector<2x128xf32>
    %114 = tpu.concatenate %112, %113 in 1 : vector<2x128xf32>, vector<2x128xf32> -> vector<2x256xf32>
    %115 = arith.truncf %109 : vector<2x64xf32> to vector<2x64xbf16>
    %cst_26 = arith.constant dense<0.000000e+00> : vector<2x256xf32>
    %116 = tpu.matmul %115, %52, %cst_26 {dimension_numbers = #tpu.dot_dimension_numbers<[1], [0], [0], [1], [0, 0, 1, 1], [], []>} : vector<2x64xbf16>, vector<64x256xbf16>, vector<2x256xf32> -> vector<2x256xf32>
    %117 = arith.addf %114, %116 : vector<2x256xf32>
    %118 = arith.negf %117 : vector<2x256xf32>
    %119 = math.exp %118 : vector<2x256xf32>
    %cst_27 = arith.constant 1.000000e+00 : f32
    %120 = vector.broadcast %cst_27 : f32 to vector<2x256xf32>
    %121 = arith.addf %120, %119 : vector<2x256xf32>
    %122 = arith.divf %120, %121 : vector<2x256xf32>
    %123 = math.tanh %117 : vector<2x256xf32>
    %124 = arith.select %45, %123, %122 : vector<2x256xi1>, vector<2x256xf32>
    %125 = vector.extract_strided_slice %124 {offsets = [0, 0], sizes = [2, 32], strides = [1, 1]} : vector<2x256xf32> to vector<2x32xf32>
    %126 = vector.extract_strided_slice %124 {offsets = [0, 32], sizes = [2, 32], strides = [1, 1]} : vector<2x256xf32> to vector<2x32xf32>
    %127 = vector.extract_strided_slice %124 {offsets = [0, 64], sizes = [2, 32], strides = [1, 1]} : vector<2x256xf32> to vector<2x32xf32>
    %128 = vector.extract_strided_slice %124 {offsets = [0, 96], sizes = [2, 32], strides = [1, 1]} : vector<2x256xf32> to vector<2x32xf32>
    %129 = vector.extract_strided_slice %124 {offsets = [0, 128], sizes = [2, 32], strides = [1, 1]} : vector<2x256xf32> to vector<2x32xf32>
    %130 = vector.extract_strided_slice %124 {offsets = [0, 160], sizes = [2, 32], strides = [1, 1]} : vector<2x256xf32> to vector<2x32xf32>
    %131 = vector.extract_strided_slice %124 {offsets = [0, 192], sizes = [2, 32], strides = [1, 1]} : vector<2x256xf32> to vector<2x32xf32>
    %132 = vector.extract_strided_slice %124 {offsets = [0, 224], sizes = [2, 32], strides = [1, 1]} : vector<2x256xf32> to vector<2x32xf32>
    %133 = arith.mulf %126, %101 : vector<2x32xf32>
    %134 = arith.mulf %125, %127 : vector<2x32xf32>
    %135 = arith.addf %133, %134 : vector<2x32xf32>
    %136 = arith.mulf %130, %104 : vector<2x32xf32>
    %137 = arith.mulf %129, %131 : vector<2x32xf32>
    %138 = arith.addf %136, %137 : vector<2x32xf32>
    %139 = math.tanh %135 : vector<2x32xf32>
    %140 = arith.mulf %128, %139 : vector<2x32xf32>
    %141 = math.tanh %138 : vector<2x32xf32>
    %142 = arith.mulf %132, %141 : vector<2x32xf32>
    %143 = tpu.concatenate %140, %142 in 1 : vector<2x32xf32>, vector<2x32xf32> -> vector<2x64xf32>
    %c4 = arith.constant 4 : index
    %c0_28 = arith.constant 0 : index
    %144 = vector.load %arg14[%c4, %c0_28] : memref<16x64xf32, #tpu.memory_space<vmem>>, vector<2x32xf32>
    tpu.vector_store %arg14[%c4, %c0_28], %140 {strides = array<i32>} : memref<16x64xf32, #tpu.memory_space<vmem>>, vector<2x32xf32>,
    %c10 = arith.constant 10 : index
    %c32_29 = arith.constant 32 : index
    %145 = vector.load %arg14[%c10, %c32_29] : memref<16x64xf32, #tpu.memory_space<vmem>>, vector<2x32xf32>
    tpu.vector_store %arg14[%c10, %c32_29], %142 {strides = array<i32>} : memref<16x64xf32, #tpu.memory_space<vmem>>, vector<2x32xf32>,
    %146 = vector.extract_strided_slice %51 {offsets = [6, 0], sizes = [2, 128], strides = [1, 1]} : vector<16x256xf32> to vector<2x128xf32>
    %147 = vector.extract_strided_slice %51 {offsets = [8, 128], sizes = [2, 128], strides = [1, 1]} : vector<16x256xf32> to vector<2x128xf32>
    %148 = tpu.concatenate %146, %147 in 1 : vector<2x128xf32>, vector<2x128xf32> -> vector<2x256xf32>
    %149 = arith.truncf %143 : vector<2x64xf32> to vector<2x64xbf16>
    %cst_30 = arith.constant dense<0.000000e+00> : vector<2x256xf32>
    %150 = tpu.matmul %149, %52, %cst_30 {dimension_numbers = #tpu.dot_dimension_numbers<[1], [0], [0], [1], [0, 0, 1, 1], [], []>} : vector<2x64xbf16>, vector<64x256xbf16>, vector<2x256xf32> -> vector<2x256xf32>
    %151 = arith.addf %148, %150 : vector<2x256xf32>
    %152 = arith.negf %151 : vector<2x256xf32>
    %153 = math.exp %152 : vector<2x256xf32>
    %cst_31 = arith.constant 1.000000e+00 : f32
    %154 = vector.broadcast %cst_31 : f32 to vector<2x256xf32>
    %155 = arith.addf %154, %153 : vector<2x256xf32>
    %156 = arith.divf %154, %155 : vector<2x256xf32>
    %157 = math.tanh %151 : vector<2x256xf32>
    %158 = arith.select %45, %157, %156 : vector<2x256xi1>, vector<2x256xf32>
    %159 = vector.extract_strided_slice %158 {offsets = [0, 0], sizes = [2, 32], strides = [1, 1]} : vector<2x256xf32> to vector<2x32xf32>
    %160 = vector.extract_strided_slice %158 {offsets = [0, 32], sizes = [2, 32], strides = [1, 1]} : vector<2x256xf32> to vector<2x32xf32>
    %161 = vector.extract_strided_slice %158 {offsets = [0, 64], sizes = [2, 32], strides = [1, 1]} : vector<2x256xf32> to vector<2x32xf32>
    %162 = vector.extract_strided_slice %158 {offsets = [0, 96], sizes = [2, 32], strides = [1, 1]} : vector<2x256xf32> to vector<2x32xf32>
    %163 = vector.extract_strided_slice %158 {offsets = [0, 128], sizes = [2, 32], strides = [1, 1]} : vector<2x256xf32> to vector<2x32xf32>
    %164 = vector.extract_strided_slice %158 {offsets = [0, 160], sizes = [2, 32], strides = [1, 1]} : vector<2x256xf32> to vector<2x32xf32>
    %165 = vector.extract_strided_slice %158 {offsets = [0, 192], sizes = [2, 32], strides = [1, 1]} : vector<2x256xf32> to vector<2x32xf32>
    %166 = vector.extract_strided_slice %158 {offsets = [0, 224], sizes = [2, 32], strides = [1, 1]} : vector<2x256xf32> to vector<2x32xf32>
    %167 = arith.mulf %160, %135 : vector<2x32xf32>
    %168 = arith.mulf %159, %161 : vector<2x32xf32>
    %169 = arith.addf %167, %168 : vector<2x32xf32>
    %170 = arith.mulf %164, %138 : vector<2x32xf32>
    %171 = arith.mulf %163, %165 : vector<2x32xf32>
    %172 = arith.addf %170, %171 : vector<2x32xf32>
    %173 = math.tanh %169 : vector<2x32xf32>
    %174 = arith.mulf %162, %173 : vector<2x32xf32>
    %175 = math.tanh %172 : vector<2x32xf32>
    %176 = arith.mulf %166, %175 : vector<2x32xf32>
    %177 = tpu.concatenate %174, %176 in 1 : vector<2x32xf32>, vector<2x32xf32> -> vector<2x64xf32>
    %c6 = arith.constant 6 : index
    %c0_32 = arith.constant 0 : index
    %178 = vector.load %arg14[%c6, %c0_32] : memref<16x64xf32, #tpu.memory_space<vmem>>, vector<2x32xf32>
    tpu.vector_store %arg14[%c6, %c0_32], %174 {strides = array<i32>} : memref<16x64xf32, #tpu.memory_space<vmem>>, vector<2x32xf32>,
    %c8 = arith.constant 8 : index
    %c32_33 = arith.constant 32 : index
    %179 = vector.load %arg14[%c8, %c32_33] : memref<16x64xf32, #tpu.memory_space<vmem>>, vector<2x32xf32>
    tpu.vector_store %arg14[%c8, %c32_33], %176 {strides = array<i32>} : memref<16x64xf32, #tpu.memory_space<vmem>>, vector<2x32xf32>,
    %180 = vector.extract_strided_slice %51 {offsets = [8, 0], sizes = [2, 128], strides = [1, 1]} : vector<16x256xf32> to vector<2x128xf32>
    %181 = vector.extract_strided_slice %51 {offsets = [6, 128], sizes = [2, 128], strides = [1, 1]} : vector<16x256xf32> to vector<2x128xf32>
    %182 = tpu.concatenate %180, %181 in 1 : vector<2x128xf32>, vector<2x128xf32> -> vector<2x256xf32>
    %183 = arith.truncf %177 : vector<2x64xf32> to vector<2x64xbf16>
    %cst_34 = arith.constant dense<0.000000e+00> : vector<2x256xf32>
    %184 = tpu.matmul %183, %52, %cst_34 {dimension_numbers = #tpu.dot_dimension_numbers<[1], [0], [0], [1], [0, 0, 1, 1], [], []>} : vector<2x64xbf16>, vector<64x256xbf16>, vector<2x256xf32> -> vector<2x256xf32>
    %185 = arith.addf %182, %184 : vector<2x256xf32>
    %186 = arith.negf %185 : vector<2x256xf32>
    %187 = math.exp %186 : vector<2x256xf32>
    %cst_35 = arith.constant 1.000000e+00 : f32
    %188 = vector.broadcast %cst_35 : f32 to vector<2x256xf32>
    %189 = arith.addf %188, %187 : vector<2x256xf32>
    %190 = arith.divf %188, %189 : vector<2x256xf32>
    %191 = math.tanh %185 : vector<2x256xf32>
    %192 = arith.select %45, %191, %190 : vector<2x256xi1>, vector<2x256xf32>
    %193 = vector.extract_strided_slice %192 {offsets = [0, 0], sizes = [2, 32], strides = [1, 1]} : vector<2x256xf32> to vector<2x32xf32>
    %194 = vector.extract_strided_slice %192 {offsets = [0, 32], sizes = [2, 32], strides = [1, 1]} : vector<2x256xf32> to vector<2x32xf32>
    %195 = vector.extract_strided_slice %192 {offsets = [0, 64], sizes = [2, 32], strides = [1, 1]} : vector<2x256xf32> to vector<2x32xf32>
    %196 = vector.extract_strided_slice %192 {offsets = [0, 96], sizes = [2, 32], strides = [1, 1]} : vector<2x256xf32> to vector<2x32xf32>
    %197 = vector.extract_strided_slice %192 {offsets = [0, 128], sizes = [2, 32], strides = [1, 1]} : vector<2x256xf32> to vector<2x32xf32>
    %198 = vector.extract_strided_slice %192 {offsets = [0, 160], sizes = [2, 32], strides = [1, 1]} : vector<2x256xf32> to vector<2x32xf32>
    %199 = vector.extract_strided_slice %192 {offsets = [0, 192], sizes = [2, 32], strides = [1, 1]} : vector<2x256xf32> to vector<2x32xf32>
    %200 = vector.extract_strided_slice %192 {offsets = [0, 224], sizes = [2, 32], strides = [1, 1]} : vector<2x256xf32> to vector<2x32xf32>
    %201 = arith.mulf %194, %169 : vector<2x32xf32>
    %202 = arith.mulf %193, %195 : vector<2x32xf32>
    %203 = arith.addf %201, %202 : vector<2x32xf32>
    %204 = arith.mulf %198, %172 : vector<2x32xf32>
    %205 = arith.mulf %197, %199 : vector<2x32xf32>
    %206 = arith.addf %204, %205 : vector<2x32xf32>
    %207 = math.tanh %203 : vector<2x32xf32>
    %208 = arith.mulf %196, %207 : vector<2x32xf32>
    %209 = math.tanh %206 : vector<2x32xf32>
    %210 = arith.mulf %200, %209 : vector<2x32xf32>
    %211 = tpu.concatenate %208, %210 in 1 : vector<2x32xf32>, vector<2x32xf32> -> vector<2x64xf32>
    %c8_36 = arith.constant 8 : index
    %c0_37 = arith.constant 0 : index
    %212 = vector.load %arg14[%c8_36, %c0_37] : memref<16x64xf32, #tpu.memory_space<vmem>>, vector<2x32xf32>
    tpu.vector_store %arg14[%c8_36, %c0_37], %208 {strides = array<i32>} : memref<16x64xf32, #tpu.memory_space<vmem>>, vector<2x32xf32>,
    %c6_38 = arith.constant 6 : index
    %c32_39 = arith.constant 32 : index
    %213 = vector.load %arg14[%c6_38, %c32_39] : memref<16x64xf32, #tpu.memory_space<vmem>>, vector<2x32xf32>
    tpu.vector_store %arg14[%c6_38, %c32_39], %210 {strides = array<i32>} : memref<16x64xf32, #tpu.memory_space<vmem>>, vector<2x32xf32>,
    %214 = vector.extract_strided_slice %51 {offsets = [10, 0], sizes = [2, 128], strides = [1, 1]} : vector<16x256xf32> to vector<2x128xf32>
    %215 = vector.extract_strided_slice %51 {offsets = [4, 128], sizes = [2, 128], strides = [1, 1]} : vector<16x256xf32> to vector<2x128xf32>
    %216 = tpu.concatenate %214, %215 in 1 : vector<2x128xf32>, vector<2x128xf32> -> vector<2x256xf32>
    %217 = arith.truncf %211 : vector<2x64xf32> to vector<2x64xbf16>
    %cst_40 = arith.constant dense<0.000000e+00> : vector<2x256xf32>
    %218 = tpu.matmul %217, %52, %cst_40 {dimension_numbers = #tpu.dot_dimension_numbers<[1], [0], [0], [1], [0, 0, 1, 1], [], []>} : vector<2x64xbf16>, vector<64x256xbf16>, vector<2x256xf32> -> vector<2x256xf32>
    %219 = arith.addf %216, %218 : vector<2x256xf32>
    %220 = arith.negf %219 : vector<2x256xf32>
    %221 = math.exp %220 : vector<2x256xf32>
    %cst_41 = arith.constant 1.000000e+00 : f32
    %222 = vector.broadcast %cst_41 : f32 to vector<2x256xf32>
    %223 = arith.addf %222, %221 : vector<2x256xf32>
    %224 = arith.divf %222, %223 : vector<2x256xf32>
    %225 = math.tanh %219 : vector<2x256xf32>
    %226 = arith.select %45, %225, %224 : vector<2x256xi1>, vector<2x256xf32>
    %227 = vector.extract_strided_slice %226 {offsets = [0, 0], sizes = [2, 32], strides = [1, 1]} : vector<2x256xf32> to vector<2x32xf32>
    %228 = vector.extract_strided_slice %226 {offsets = [0, 32], sizes = [2, 32], strides = [1, 1]} : vector<2x256xf32> to vector<2x32xf32>
    %229 = vector.extract_strided_slice %226 {offsets = [0, 64], sizes = [2, 32], strides = [1, 1]} : vector<2x256xf32> to vector<2x32xf32>
    %230 = vector.extract_strided_slice %226 {offsets = [0, 96], sizes = [2, 32], strides = [1, 1]} : vector<2x256xf32> to vector<2x32xf32>
    %231 = vector.extract_strided_slice %226 {offsets = [0, 128], sizes = [2, 32], strides = [1, 1]} : vector<2x256xf32> to vector<2x32xf32>
    %232 = vector.extract_strided_slice %226 {offsets = [0, 160], sizes = [2, 32], strides = [1, 1]} : vector<2x256xf32> to vector<2x32xf32>
    %233 = vector.extract_strided_slice %226 {offsets = [0, 192], sizes = [2, 32], strides = [1, 1]} : vector<2x256xf32> to vector<2x32xf32>
    %234 = vector.extract_strided_slice %226 {offsets = [0, 224], sizes = [2, 32], strides = [1, 1]} : vector<2x256xf32> to vector<2x32xf32>
    %235 = arith.mulf %228, %203 : vector<2x32xf32>
    %236 = arith.mulf %227, %229 : vector<2x32xf32>
    %237 = arith.addf %235, %236 : vector<2x32xf32>
    %238 = arith.mulf %232, %206 : vector<2x32xf32>
    %239 = arith.mulf %231, %233 : vector<2x32xf32>
    %240 = arith.addf %238, %239 : vector<2x32xf32>
    %241 = math.tanh %237 : vector<2x32xf32>
    %242 = arith.mulf %230, %241 : vector<2x32xf32>
    %243 = math.tanh %240 : vector<2x32xf32>
    %244 = arith.mulf %234, %243 : vector<2x32xf32>
    %245 = tpu.concatenate %242, %244 in 1 : vector<2x32xf32>, vector<2x32xf32> -> vector<2x64xf32>
    %c10_42 = arith.constant 10 : index
    %c0_43 = arith.constant 0 : index
    %246 = vector.load %arg14[%c10_42, %c0_43] : memref<16x64xf32, #tpu.memory_space<vmem>>, vector<2x32xf32>
    tpu.vector_store %arg14[%c10_42, %c0_43], %242 {strides = array<i32>} : memref<16x64xf32, #tpu.memory_space<vmem>>, vector<2x32xf32>,
    %c4_44 = arith.constant 4 : index
    %c32_45 = arith.constant 32 : index
    %247 = vector.load %arg14[%c4_44, %c32_45] : memref<16x64xf32, #tpu.memory_space<vmem>>, vector<2x32xf32>
    tpu.vector_store %arg14[%c4_44, %c32_45], %244 {strides = array<i32>} : memref<16x64xf32, #tpu.memory_space<vmem>>, vector<2x32xf32>,
    %248 = vector.extract_strided_slice %51 {offsets = [12, 0], sizes = [2, 128], strides = [1, 1]} : vector<16x256xf32> to vector<2x128xf32>
    %249 = vector.extract_strided_slice %51 {offsets = [2, 128], sizes = [2, 128], strides = [1, 1]} : vector<16x256xf32> to vector<2x128xf32>
    %250 = tpu.concatenate %248, %249 in 1 : vector<2x128xf32>, vector<2x128xf32> -> vector<2x256xf32>
    %251 = arith.truncf %245 : vector<2x64xf32> to vector<2x64xbf16>
    %cst_46 = arith.constant dense<0.000000e+00> : vector<2x256xf32>
    %252 = tpu.matmul %251, %52, %cst_46 {dimension_numbers = #tpu.dot_dimension_numbers<[1], [0], [0], [1], [0, 0, 1, 1], [], []>} : vector<2x64xbf16>, vector<64x256xbf16>, vector<2x256xf32> -> vector<2x256xf32>
    %253 = arith.addf %250, %252 : vector<2x256xf32>
    %254 = arith.negf %253 : vector<2x256xf32>
    %255 = math.exp %254 : vector<2x256xf32>
    %cst_47 = arith.constant 1.000000e+00 : f32
    %256 = vector.broadcast %cst_47 : f32 to vector<2x256xf32>
    %257 = arith.addf %256, %255 : vector<2x256xf32>
    %258 = arith.divf %256, %257 : vector<2x256xf32>
    %259 = math.tanh %253 : vector<2x256xf32>
    %260 = arith.select %45, %259, %258 : vector<2x256xi1>, vector<2x256xf32>
    %261 = vector.extract_strided_slice %260 {offsets = [0, 0], sizes = [2, 32], strides = [1, 1]} : vector<2x256xf32> to vector<2x32xf32>
    %262 = vector.extract_strided_slice %260 {offsets = [0, 32], sizes = [2, 32], strides = [1, 1]} : vector<2x256xf32> to vector<2x32xf32>
    %263 = vector.extract_strided_slice %260 {offsets = [0, 64], sizes = [2, 32], strides = [1, 1]} : vector<2x256xf32> to vector<2x32xf32>
    %264 = vector.extract_strided_slice %260 {offsets = [0, 96], sizes = [2, 32], strides = [1, 1]} : vector<2x256xf32> to vector<2x32xf32>
    %265 = vector.extract_strided_slice %260 {offsets = [0, 128], sizes = [2, 32], strides = [1, 1]} : vector<2x256xf32> to vector<2x32xf32>
    %266 = vector.extract_strided_slice %260 {offsets = [0, 160], sizes = [2, 32], strides = [1, 1]} : vector<2x256xf32> to vector<2x32xf32>
    %267 = vector.extract_strided_slice %260 {offsets = [0, 192], sizes = [2, 32], strides = [1, 1]} : vector<2x256xf32> to vector<2x32xf32>
    %268 = vector.extract_strided_slice %260 {offsets = [0, 224], sizes = [2, 32], strides = [1, 1]} : vector<2x256xf32> to vector<2x32xf32>
    %269 = arith.mulf %262, %237 : vector<2x32xf32>
    %270 = arith.mulf %261, %263 : vector<2x32xf32>
    %271 = arith.addf %269, %270 : vector<2x32xf32>
    %272 = arith.mulf %266, %240 : vector<2x32xf32>
    %273 = arith.mulf %265, %267 : vector<2x32xf32>
    %274 = arith.addf %272, %273 : vector<2x32xf32>
    %275 = math.tanh %271 : vector<2x32xf32>
    %276 = arith.mulf %264, %275 : vector<2x32xf32>
    %277 = math.tanh %274 : vector<2x32xf32>
    %278 = arith.mulf %268, %277 : vector<2x32xf32>
    %279 = tpu.concatenate %276, %278 in 1 : vector<2x32xf32>, vector<2x32xf32> -> vector<2x64xf32>
    %c12_48 = arith.constant 12 : index
    %c0_49 = arith.constant 0 : index
    %280 = vector.load %arg14[%c12_48, %c0_49] : memref<16x64xf32, #tpu.memory_space<vmem>>, vector<2x32xf32>
    tpu.vector_store %arg14[%c12_48, %c0_49], %276 {strides = array<i32>} : memref<16x64xf32, #tpu.memory_space<vmem>>, vector<2x32xf32>,
    %c2_50 = arith.constant 2 : index
    %c32_51 = arith.constant 32 : index
    %281 = vector.load %arg14[%c2_50, %c32_51] : memref<16x64xf32, #tpu.memory_space<vmem>>, vector<2x32xf32>
    tpu.vector_store %arg14[%c2_50, %c32_51], %278 {strides = array<i32>} : memref<16x64xf32, #tpu.memory_space<vmem>>, vector<2x32xf32>,
    %282 = vector.extract_strided_slice %51 {offsets = [14, 0], sizes = [2, 128], strides = [1, 1]} : vector<16x256xf32> to vector<2x128xf32>
    %283 = vector.extract_strided_slice %51 {offsets = [0, 128], sizes = [2, 128], strides = [1, 1]} : vector<16x256xf32> to vector<2x128xf32>
    %284 = tpu.concatenate %282, %283 in 1 : vector<2x128xf32>, vector<2x128xf32> -> vector<2x256xf32>
    %285 = arith.truncf %279 : vector<2x64xf32> to vector<2x64xbf16>
    %cst_52 = arith.constant dense<0.000000e+00> : vector<2x256xf32>
    %286 = tpu.matmul %285, %52, %cst_52 {dimension_numbers = #tpu.dot_dimension_numbers<[1], [0], [0], [1], [0, 0, 1, 1], [], []>} : vector<2x64xbf16>, vector<64x256xbf16>, vector<2x256xf32> -> vector<2x256xf32>
    %287 = arith.addf %284, %286 : vector<2x256xf32>
    %288 = arith.negf %287 : vector<2x256xf32>
    %289 = math.exp %288 : vector<2x256xf32>
    %cst_53 = arith.constant 1.000000e+00 : f32
    %290 = vector.broadcast %cst_53 : f32 to vector<2x256xf32>
    %291 = arith.addf %290, %289 : vector<2x256xf32>
    %292 = arith.divf %290, %291 : vector<2x256xf32>
    %293 = math.tanh %287 : vector<2x256xf32>
    %294 = arith.select %45, %293, %292 : vector<2x256xi1>, vector<2x256xf32>
    %295 = vector.extract_strided_slice %294 {offsets = [0, 0], sizes = [2, 32], strides = [1, 1]} : vector<2x256xf32> to vector<2x32xf32>
    %296 = vector.extract_strided_slice %294 {offsets = [0, 32], sizes = [2, 32], strides = [1, 1]} : vector<2x256xf32> to vector<2x32xf32>
    %297 = vector.extract_strided_slice %294 {offsets = [0, 64], sizes = [2, 32], strides = [1, 1]} : vector<2x256xf32> to vector<2x32xf32>
    %298 = vector.extract_strided_slice %294 {offsets = [0, 96], sizes = [2, 32], strides = [1, 1]} : vector<2x256xf32> to vector<2x32xf32>
    %299 = vector.extract_strided_slice %294 {offsets = [0, 128], sizes = [2, 32], strides = [1, 1]} : vector<2x256xf32> to vector<2x32xf32>
    %300 = vector.extract_strided_slice %294 {offsets = [0, 160], sizes = [2, 32], strides = [1, 1]} : vector<2x256xf32> to vector<2x32xf32>
    %301 = vector.extract_strided_slice %294 {offsets = [0, 192], sizes = [2, 32], strides = [1, 1]} : vector<2x256xf32> to vector<2x32xf32>
    %302 = vector.extract_strided_slice %294 {offsets = [0, 224], sizes = [2, 32], strides = [1, 1]} : vector<2x256xf32> to vector<2x32xf32>
    %303 = arith.mulf %296, %271 : vector<2x32xf32>
    %304 = arith.mulf %295, %297 : vector<2x32xf32>
    %305 = arith.addf %303, %304 : vector<2x32xf32>
    %306 = arith.mulf %300, %274 : vector<2x32xf32>
    %307 = arith.mulf %299, %301 : vector<2x32xf32>
    %308 = arith.addf %306, %307 : vector<2x32xf32>
    %309 = math.tanh %305 : vector<2x32xf32>
    %310 = arith.mulf %298, %309 : vector<2x32xf32>
    %311 = math.tanh %308 : vector<2x32xf32>
    %312 = arith.mulf %302, %311 : vector<2x32xf32>
    %c14_54 = arith.constant 14 : index
    %c0_55 = arith.constant 0 : index
    %313 = vector.load %arg14[%c14_54, %c0_55] : memref<16x64xf32, #tpu.memory_space<vmem>>, vector<2x32xf32>
    tpu.vector_store %arg14[%c14_54, %c0_55], %310 {strides = array<i32>} : memref<16x64xf32, #tpu.memory_space<vmem>>, vector<2x32xf32>,
    %c0_56 = arith.constant 0 : index
    %c32_57 = arith.constant 32 : index
    %314 = vector.load %arg14[%c0_56, %c32_57] : memref<16x64xf32, #tpu.memory_space<vmem>>, vector<2x32xf32>
    tpu.vector_store %arg14[%c0_56, %c32_57], %312 {strides = array<i32>} : memref<16x64xf32, #tpu.memory_space<vmem>>, vector<2x32xf32>,
    %c0_58 = arith.constant 0 : index
    %c0_59 = arith.constant 0 : index
    %315 = vector.load %arg14[%c0_58, %c0_59] : memref<16x64xf32, #tpu.memory_space<vmem>>, vector<16x64xf32>
    %316 = arith.truncf %315 : vector<16x64xf32> to vector<16x64xbf16>
    %c0_60 = arith.constant 0 : index
    %c0_61 = arith.constant 0 : index
    %317 = vector.load %arg5[%c0_60, %c0_61] : memref<64x256xbf16, #tpu.memory_space<vmem>>, vector<64x256xbf16>
    %cst_62 = arith.constant dense<0.000000e+00> : vector<16x256xf32>
    %318 = tpu.matmul %316, %317, %cst_62 {dimension_numbers = #tpu.dot_dimension_numbers<[1], [0], [0], [1], [0, 0, 1, 1], [], []>} : vector<16x64xbf16>, vector<64x256xbf16>, vector<16x256xf32> -> vector<16x256xf32>
    %c0_63 = arith.constant 0 : index
    %c0_64 = arith.constant 0 : index
    %319 = vector.load %arg7[%c0_63, %c0_64] : memref<1x256xf32, #tpu.memory_space<vmem>>, vector<1x256xf32>
    %320 = vector.broadcast %319 : vector<1x256xf32> to vector<16x256xf32>
    %321 = arith.addf %318, %320 : vector<16x256xf32>
    %c0_65 = arith.constant 0 : index
    %c0_66 = arith.constant 0 : index
    %322 = vector.load %arg6[%c0_65, %c0_66] : memref<64x256xbf16, #tpu.memory_space<vmem>>, vector<64x256xbf16>
    %323 = vector.extract_strided_slice %321 {offsets = [0, 0], sizes = [2, 128], strides = [1, 1]} : vector<16x256xf32> to vector<2x128xf32>
    %324 = vector.extract_strided_slice %321 {offsets = [14, 128], sizes = [2, 128], strides = [1, 1]} : vector<16x256xf32> to vector<2x128xf32>
    %325 = tpu.concatenate %323, %324 in 1 : vector<2x128xf32>, vector<2x128xf32> -> vector<2x256xf32>
    %326 = arith.negf %325 : vector<2x256xf32>
    %327 = math.exp %326 : vector<2x256xf32>
    %cst_67 = arith.constant 1.000000e+00 : f32
    %328 = vector.broadcast %cst_67 : f32 to vector<2x256xf32>
    %329 = arith.addf %328, %327 : vector<2x256xf32>
    %330 = arith.divf %328, %329 : vector<2x256xf32>
    %331 = math.tanh %325 : vector<2x256xf32>
    %332 = arith.select %45, %331, %330 : vector<2x256xi1>, vector<2x256xf32>
    %333 = vector.extract_strided_slice %332 {offsets = [0, 0], sizes = [2, 32], strides = [1, 1]} : vector<2x256xf32> to vector<2x32xf32>
    %334 = vector.extract_strided_slice %332 {offsets = [0, 64], sizes = [2, 32], strides = [1, 1]} : vector<2x256xf32> to vector<2x32xf32>
    %335 = vector.extract_strided_slice %332 {offsets = [0, 96], sizes = [2, 32], strides = [1, 1]} : vector<2x256xf32> to vector<2x32xf32>
    %336 = vector.extract_strided_slice %332 {offsets = [0, 128], sizes = [2, 32], strides = [1, 1]} : vector<2x256xf32> to vector<2x32xf32>
    %337 = vector.extract_strided_slice %332 {offsets = [0, 192], sizes = [2, 32], strides = [1, 1]} : vector<2x256xf32> to vector<2x32xf32>
    %338 = vector.extract_strided_slice %332 {offsets = [0, 224], sizes = [2, 32], strides = [1, 1]} : vector<2x256xf32> to vector<2x32xf32>
    %339 = arith.mulf %333, %334 : vector<2x32xf32>
    %340 = arith.mulf %336, %337 : vector<2x32xf32>
    %341 = math.tanh %339 : vector<2x32xf32>
    %342 = arith.mulf %335, %341 : vector<2x32xf32>
    %343 = math.tanh %340 : vector<2x32xf32>
    %344 = arith.mulf %338, %343 : vector<2x32xf32>
    %345 = tpu.concatenate %342, %344 in 1 : vector<2x32xf32>, vector<2x32xf32> -> vector<2x64xf32>
    %c0_68 = arith.constant 0 : index
    %c0_69 = arith.constant 0 : index
    %346 = vector.load %arg15[%c0_68, %c0_69] : memref<16x64xf32, #tpu.memory_space<vmem>>, vector<2x32xf32>
    tpu.vector_store %arg15[%c0_68, %c0_69], %342 {strides = array<i32>} : memref<16x64xf32, #tpu.memory_space<vmem>>, vector<2x32xf32>,
    %c14_70 = arith.constant 14 : index
    %c32_71 = arith.constant 32 : index
    %347 = vector.load %arg15[%c14_70, %c32_71] : memref<16x64xf32, #tpu.memory_space<vmem>>, vector<2x32xf32>
    tpu.vector_store %arg15[%c14_70, %c32_71], %344 {strides = array<i32>} : memref<16x64xf32, #tpu.memory_space<vmem>>, vector<2x32xf32>,
    %348 = vector.extract_strided_slice %321 {offsets = [2, 0], sizes = [2, 128], strides = [1, 1]} : vector<16x256xf32> to vector<2x128xf32>
    %349 = vector.extract_strided_slice %321 {offsets = [12, 128], sizes = [2, 128], strides = [1, 1]} : vector<16x256xf32> to vector<2x128xf32>
    %350 = tpu.concatenate %348, %349 in 1 : vector<2x128xf32>, vector<2x128xf32> -> vector<2x256xf32>
    %351 = arith.truncf %345 : vector<2x64xf32> to vector<2x64xbf16>
    %cst_72 = arith.constant dense<0.000000e+00> : vector<2x256xf32>
    %352 = tpu.matmul %351, %322, %cst_72 {dimension_numbers = #tpu.dot_dimension_numbers<[1], [0], [0], [1], [0, 0, 1, 1], [], []>} : vector<2x64xbf16>, vector<64x256xbf16>, vector<2x256xf32> -> vector<2x256xf32>
    %353 = arith.addf %350, %352 : vector<2x256xf32>
    %354 = arith.negf %353 : vector<2x256xf32>
    %355 = math.exp %354 : vector<2x256xf32>
    %cst_73 = arith.constant 1.000000e+00 : f32
    %356 = vector.broadcast %cst_73 : f32 to vector<2x256xf32>
    %357 = arith.addf %356, %355 : vector<2x256xf32>
    %358 = arith.divf %356, %357 : vector<2x256xf32>
    %359 = math.tanh %353 : vector<2x256xf32>
    %360 = arith.select %45, %359, %358 : vector<2x256xi1>, vector<2x256xf32>
    %361 = vector.extract_strided_slice %360 {offsets = [0, 0], sizes = [2, 32], strides = [1, 1]} : vector<2x256xf32> to vector<2x32xf32>
    %362 = vector.extract_strided_slice %360 {offsets = [0, 32], sizes = [2, 32], strides = [1, 1]} : vector<2x256xf32> to vector<2x32xf32>
    %363 = vector.extract_strided_slice %360 {offsets = [0, 64], sizes = [2, 32], strides = [1, 1]} : vector<2x256xf32> to vector<2x32xf32>
    %364 = vector.extract_strided_slice %360 {offsets = [0, 96], sizes = [2, 32], strides = [1, 1]} : vector<2x256xf32> to vector<2x32xf32>
    %365 = vector.extract_strided_slice %360 {offsets = [0, 128], sizes = [2, 32], strides = [1, 1]} : vector<2x256xf32> to vector<2x32xf32>
    %366 = vector.extract_strided_slice %360 {offsets = [0, 160], sizes = [2, 32], strides = [1, 1]} : vector<2x256xf32> to vector<2x32xf32>
    %367 = vector.extract_strided_slice %360 {offsets = [0, 192], sizes = [2, 32], strides = [1, 1]} : vector<2x256xf32> to vector<2x32xf32>
    %368 = vector.extract_strided_slice %360 {offsets = [0, 224], sizes = [2, 32], strides = [1, 1]} : vector<2x256xf32> to vector<2x32xf32>
    %369 = arith.mulf %362, %339 : vector<2x32xf32>
    %370 = arith.mulf %361, %363 : vector<2x32xf32>
    %371 = arith.addf %369, %370 : vector<2x32xf32>
    %372 = arith.mulf %366, %340 : vector<2x32xf32>
    %373 = arith.mulf %365, %367 : vector<2x32xf32>
    %374 = arith.addf %372, %373 : vector<2x32xf32>
    %375 = math.tanh %371 : vector<2x32xf32>
    %376 = arith.mulf %364, %375 : vector<2x32xf32>
    %377 = math.tanh %374 : vector<2x32xf32>
    %378 = arith.mulf %368, %377 : vector<2x32xf32>
    %379 = tpu.concatenate %376, %378 in 1 : vector<2x32xf32>, vector<2x32xf32> -> vector<2x64xf32>
    %c2_74 = arith.constant 2 : index
    %c0_75 = arith.constant 0 : index
    %380 = vector.load %arg15[%c2_74, %c0_75] : memref<16x64xf32, #tpu.memory_space<vmem>>, vector<2x32xf32>
    tpu.vector_store %arg15[%c2_74, %c0_75], %376 {strides = array<i32>} : memref<16x64xf32, #tpu.memory_space<vmem>>, vector<2x32xf32>,
    %c12_76 = arith.constant 12 : index
    %c32_77 = arith.constant 32 : index
    %381 = vector.load %arg15[%c12_76, %c32_77] : memref<16x64xf32, #tpu.memory_space<vmem>>, vector<2x32xf32>
    tpu.vector_store %arg15[%c12_76, %c32_77], %378 {strides = array<i32>} : memref<16x64xf32, #tpu.memory_space<vmem>>, vector<2x32xf32>,
    %382 = vector.extract_strided_slice %321 {offsets = [4, 0], sizes = [2, 128], strides = [1, 1]} : vector<16x256xf32> to vector<2x128xf32>
    %383 = vector.extract_strided_slice %321 {offsets = [10, 128], sizes = [2, 128], strides = [1, 1]} : vector<16x256xf32> to vector<2x128xf32>
    %384 = tpu.concatenate %382, %383 in 1 : vector<2x128xf32>, vector<2x128xf32> -> vector<2x256xf32>
    %385 = arith.truncf %379 : vector<2x64xf32> to vector<2x64xbf16>
    %cst_78 = arith.constant dense<0.000000e+00> : vector<2x256xf32>
    %386 = tpu.matmul %385, %322, %cst_78 {dimension_numbers = #tpu.dot_dimension_numbers<[1], [0], [0], [1], [0, 0, 1, 1], [], []>} : vector<2x64xbf16>, vector<64x256xbf16>, vector<2x256xf32> -> vector<2x256xf32>
    %387 = arith.addf %384, %386 : vector<2x256xf32>
    %388 = arith.negf %387 : vector<2x256xf32>
    %389 = math.exp %388 : vector<2x256xf32>
    %cst_79 = arith.constant 1.000000e+00 : f32
    %390 = vector.broadcast %cst_79 : f32 to vector<2x256xf32>
    %391 = arith.addf %390, %389 : vector<2x256xf32>
    %392 = arith.divf %390, %391 : vector<2x256xf32>
    %393 = math.tanh %387 : vector<2x256xf32>
    %394 = arith.select %45, %393, %392 : vector<2x256xi1>, vector<2x256xf32>
    %395 = vector.extract_strided_slice %394 {offsets = [0, 0], sizes = [2, 32], strides = [1, 1]} : vector<2x256xf32> to vector<2x32xf32>
    %396 = vector.extract_strided_slice %394 {offsets = [0, 32], sizes = [2, 32], strides = [1, 1]} : vector<2x256xf32> to vector<2x32xf32>
    %397 = vector.extract_strided_slice %394 {offsets = [0, 64], sizes = [2, 32], strides = [1, 1]} : vector<2x256xf32> to vector<2x32xf32>
    %398 = vector.extract_strided_slice %394 {offsets = [0, 96], sizes = [2, 32], strides = [1, 1]} : vector<2x256xf32> to vector<2x32xf32>
    %399 = vector.extract_strided_slice %394 {offsets = [0, 128], sizes = [2, 32], strides = [1, 1]} : vector<2x256xf32> to vector<2x32xf32>
    %400 = vector.extract_strided_slice %394 {offsets = [0, 160], sizes = [2, 32], strides = [1, 1]} : vector<2x256xf32> to vector<2x32xf32>
    %401 = vector.extract_strided_slice %394 {offsets = [0, 192], sizes = [2, 32], strides = [1, 1]} : vector<2x256xf32> to vector<2x32xf32>
    %402 = vector.extract_strided_slice %394 {offsets = [0, 224], sizes = [2, 32], strides = [1, 1]} : vector<2x256xf32> to vector<2x32xf32>
    %403 = arith.mulf %396, %371 : vector<2x32xf32>
    %404 = arith.mulf %395, %397 : vector<2x32xf32>
    %405 = arith.addf %403, %404 : vector<2x32xf32>
    %406 = arith.mulf %400, %374 : vector<2x32xf32>
    %407 = arith.mulf %399, %401 : vector<2x32xf32>
    %408 = arith.addf %406, %407 : vector<2x32xf32>
    %409 = math.tanh %405 : vector<2x32xf32>
    %410 = arith.mulf %398, %409 : vector<2x32xf32>
    %411 = math.tanh %408 : vector<2x32xf32>
    %412 = arith.mulf %402, %411 : vector<2x32xf32>
    %413 = tpu.concatenate %410, %412 in 1 : vector<2x32xf32>, vector<2x32xf32> -> vector<2x64xf32>
    %c4_80 = arith.constant 4 : index
    %c0_81 = arith.constant 0 : index
    %414 = vector.load %arg15[%c4_80, %c0_81] : memref<16x64xf32, #tpu.memory_space<vmem>>, vector<2x32xf32>
    tpu.vector_store %arg15[%c4_80, %c0_81], %410 {strides = array<i32>} : memref<16x64xf32, #tpu.memory_space<vmem>>, vector<2x32xf32>,
    %c10_82 = arith.constant 10 : index
    %c32_83 = arith.constant 32 : index
    %415 = vector.load %arg15[%c10_82, %c32_83] : memref<16x64xf32, #tpu.memory_space<vmem>>, vector<2x32xf32>
    tpu.vector_store %arg15[%c10_82, %c32_83], %412 {strides = array<i32>} : memref<16x64xf32, #tpu.memory_space<vmem>>, vector<2x32xf32>,
    %416 = vector.extract_strided_slice %321 {offsets = [6, 0], sizes = [2, 128], strides = [1, 1]} : vector<16x256xf32> to vector<2x128xf32>
    %417 = vector.extract_strided_slice %321 {offsets = [8, 128], sizes = [2, 128], strides = [1, 1]} : vector<16x256xf32> to vector<2x128xf32>
    %418 = tpu.concatenate %416, %417 in 1 : vector<2x128xf32>, vector<2x128xf32> -> vector<2x256xf32>
    %419 = arith.truncf %413 : vector<2x64xf32> to vector<2x64xbf16>
    %cst_84 = arith.constant dense<0.000000e+00> : vector<2x256xf32>
    %420 = tpu.matmul %419, %322, %cst_84 {dimension_numbers = #tpu.dot_dimension_numbers<[1], [0], [0], [1], [0, 0, 1, 1], [], []>} : vector<2x64xbf16>, vector<64x256xbf16>, vector<2x256xf32> -> vector<2x256xf32>
    %421 = arith.addf %418, %420 : vector<2x256xf32>
    %422 = arith.negf %421 : vector<2x256xf32>
    %423 = math.exp %422 : vector<2x256xf32>
    %cst_85 = arith.constant 1.000000e+00 : f32
    %424 = vector.broadcast %cst_85 : f32 to vector<2x256xf32>
    %425 = arith.addf %424, %423 : vector<2x256xf32>
    %426 = arith.divf %424, %425 : vector<2x256xf32>
    %427 = math.tanh %421 : vector<2x256xf32>
    %428 = arith.select %45, %427, %426 : vector<2x256xi1>, vector<2x256xf32>
    %429 = vector.extract_strided_slice %428 {offsets = [0, 0], sizes = [2, 32], strides = [1, 1]} : vector<2x256xf32> to vector<2x32xf32>
    %430 = vector.extract_strided_slice %428 {offsets = [0, 32], sizes = [2, 32], strides = [1, 1]} : vector<2x256xf32> to vector<2x32xf32>
    %431 = vector.extract_strided_slice %428 {offsets = [0, 64], sizes = [2, 32], strides = [1, 1]} : vector<2x256xf32> to vector<2x32xf32>
    %432 = vector.extract_strided_slice %428 {offsets = [0, 96], sizes = [2, 32], strides = [1, 1]} : vector<2x256xf32> to vector<2x32xf32>
    %433 = vector.extract_strided_slice %428 {offsets = [0, 128], sizes = [2, 32], strides = [1, 1]} : vector<2x256xf32> to vector<2x32xf32>
    %434 = vector.extract_strided_slice %428 {offsets = [0, 160], sizes = [2, 32], strides = [1, 1]} : vector<2x256xf32> to vector<2x32xf32>
    %435 = vector.extract_strided_slice %428 {offsets = [0, 192], sizes = [2, 32], strides = [1, 1]} : vector<2x256xf32> to vector<2x32xf32>
    %436 = vector.extract_strided_slice %428 {offsets = [0, 224], sizes = [2, 32], strides = [1, 1]} : vector<2x256xf32> to vector<2x32xf32>
    %437 = arith.mulf %430, %405 : vector<2x32xf32>
    %438 = arith.mulf %429, %431 : vector<2x32xf32>
    %439 = arith.addf %437, %438 : vector<2x32xf32>
    %440 = arith.mulf %434, %408 : vector<2x32xf32>
    %441 = arith.mulf %433, %435 : vector<2x32xf32>
    %442 = arith.addf %440, %441 : vector<2x32xf32>
    %443 = math.tanh %439 : vector<2x32xf32>
    %444 = arith.mulf %432, %443 : vector<2x32xf32>
    %445 = math.tanh %442 : vector<2x32xf32>
    %446 = arith.mulf %436, %445 : vector<2x32xf32>
    %447 = tpu.concatenate %444, %446 in 1 : vector<2x32xf32>, vector<2x32xf32> -> vector<2x64xf32>
    %c6_86 = arith.constant 6 : index
    %c0_87 = arith.constant 0 : index
    %448 = vector.load %arg15[%c6_86, %c0_87] : memref<16x64xf32, #tpu.memory_space<vmem>>, vector<2x32xf32>
    tpu.vector_store %arg15[%c6_86, %c0_87], %444 {strides = array<i32>} : memref<16x64xf32, #tpu.memory_space<vmem>>, vector<2x32xf32>,
    %c8_88 = arith.constant 8 : index
    %c32_89 = arith.constant 32 : index
    %449 = vector.load %arg15[%c8_88, %c32_89] : memref<16x64xf32, #tpu.memory_space<vmem>>, vector<2x32xf32>
    tpu.vector_store %arg15[%c8_88, %c32_89], %446 {strides = array<i32>} : memref<16x64xf32, #tpu.memory_space<vmem>>, vector<2x32xf32>,
    %450 = vector.extract_strided_slice %321 {offsets = [8, 0], sizes = [2, 128], strides = [1, 1]} : vector<16x256xf32> to vector<2x128xf32>
    %451 = vector.extract_strided_slice %321 {offsets = [6, 128], sizes = [2, 128], strides = [1, 1]} : vector<16x256xf32> to vector<2x128xf32>
    %452 = tpu.concatenate %450, %451 in 1 : vector<2x128xf32>, vector<2x128xf32> -> vector<2x256xf32>
    %453 = arith.truncf %447 : vector<2x64xf32> to vector<2x64xbf16>
    %cst_90 = arith.constant dense<0.000000e+00> : vector<2x256xf32>
    %454 = tpu.matmul %453, %322, %cst_90 {dimension_numbers = #tpu.dot_dimension_numbers<[1], [0], [0], [1], [0, 0, 1, 1], [], []>} : vector<2x64xbf16>, vector<64x256xbf16>, vector<2x256xf32> -> vector<2x256xf32>
    %455 = arith.addf %452, %454 : vector<2x256xf32>
    %456 = arith.negf %455 : vector<2x256xf32>
    %457 = math.exp %456 : vector<2x256xf32>
    %cst_91 = arith.constant 1.000000e+00 : f32
    %458 = vector.broadcast %cst_91 : f32 to vector<2x256xf32>
    %459 = arith.addf %458, %457 : vector<2x256xf32>
    %460 = arith.divf %458, %459 : vector<2x256xf32>
    %461 = math.tanh %455 : vector<2x256xf32>
    %462 = arith.select %45, %461, %460 : vector<2x256xi1>, vector<2x256xf32>
    %463 = vector.extract_strided_slice %462 {offsets = [0, 0], sizes = [2, 32], strides = [1, 1]} : vector<2x256xf32> to vector<2x32xf32>
    %464 = vector.extract_strided_slice %462 {offsets = [0, 32], sizes = [2, 32], strides = [1, 1]} : vector<2x256xf32> to vector<2x32xf32>
    %465 = vector.extract_strided_slice %462 {offsets = [0, 64], sizes = [2, 32], strides = [1, 1]} : vector<2x256xf32> to vector<2x32xf32>
    %466 = vector.extract_strided_slice %462 {offsets = [0, 96], sizes = [2, 32], strides = [1, 1]} : vector<2x256xf32> to vector<2x32xf32>
    %467 = vector.extract_strided_slice %462 {offsets = [0, 128], sizes = [2, 32], strides = [1, 1]} : vector<2x256xf32> to vector<2x32xf32>
    %468 = vector.extract_strided_slice %462 {offsets = [0, 160], sizes = [2, 32], strides = [1, 1]} : vector<2x256xf32> to vector<2x32xf32>
    %469 = vector.extract_strided_slice %462 {offsets = [0, 192], sizes = [2, 32], strides = [1, 1]} : vector<2x256xf32> to vector<2x32xf32>
    %470 = vector.extract_strided_slice %462 {offsets = [0, 224], sizes = [2, 32], strides = [1, 1]} : vector<2x256xf32> to vector<2x32xf32>
    %471 = arith.mulf %464, %439 : vector<2x32xf32>
    %472 = arith.mulf %463, %465 : vector<2x32xf32>
    %473 = arith.addf %471, %472 : vector<2x32xf32>
    %474 = arith.mulf %468, %442 : vector<2x32xf32>
    %475 = arith.mulf %467, %469 : vector<2x32xf32>
    %476 = arith.addf %474, %475 : vector<2x32xf32>
    %477 = math.tanh %473 : vector<2x32xf32>
    %478 = arith.mulf %466, %477 : vector<2x32xf32>
    %479 = math.tanh %476 : vector<2x32xf32>
    %480 = arith.mulf %470, %479 : vector<2x32xf32>
    %481 = tpu.concatenate %478, %480 in 1 : vector<2x32xf32>, vector<2x32xf32> -> vector<2x64xf32>
    %c8_92 = arith.constant 8 : index
    %c0_93 = arith.constant 0 : index
    %482 = vector.load %arg15[%c8_92, %c0_93] : memref<16x64xf32, #tpu.memory_space<vmem>>, vector<2x32xf32>
    tpu.vector_store %arg15[%c8_92, %c0_93], %478 {strides = array<i32>} : memref<16x64xf32, #tpu.memory_space<vmem>>, vector<2x32xf32>,
    %c6_94 = arith.constant 6 : index
    %c32_95 = arith.constant 32 : index
    %483 = vector.load %arg15[%c6_94, %c32_95] : memref<16x64xf32, #tpu.memory_space<vmem>>, vector<2x32xf32>
    tpu.vector_store %arg15[%c6_94, %c32_95], %480 {strides = array<i32>} : memref<16x64xf32, #tpu.memory_space<vmem>>, vector<2x32xf32>,
    %484 = vector.extract_strided_slice %321 {offsets = [10, 0], sizes = [2, 128], strides = [1, 1]} : vector<16x256xf32> to vector<2x128xf32>
    %485 = vector.extract_strided_slice %321 {offsets = [4, 128], sizes = [2, 128], strides = [1, 1]} : vector<16x256xf32> to vector<2x128xf32>
    %486 = tpu.concatenate %484, %485 in 1 : vector<2x128xf32>, vector<2x128xf32> -> vector<2x256xf32>
    %487 = arith.truncf %481 : vector<2x64xf32> to vector<2x64xbf16>
    %cst_96 = arith.constant dense<0.000000e+00> : vector<2x256xf32>
    %488 = tpu.matmul %487, %322, %cst_96 {dimension_numbers = #tpu.dot_dimension_numbers<[1], [0], [0], [1], [0, 0, 1, 1], [], []>} : vector<2x64xbf16>, vector<64x256xbf16>, vector<2x256xf32> -> vector<2x256xf32>
    %489 = arith.addf %486, %488 : vector<2x256xf32>
    %490 = arith.negf %489 : vector<2x256xf32>
    %491 = math.exp %490 : vector<2x256xf32>
    %cst_97 = arith.constant 1.000000e+00 : f32
    %492 = vector.broadcast %cst_97 : f32 to vector<2x256xf32>
    %493 = arith.addf %492, %491 : vector<2x256xf32>
    %494 = arith.divf %492, %493 : vector<2x256xf32>
    %495 = math.tanh %489 : vector<2x256xf32>
    %496 = arith.select %45, %495, %494 : vector<2x256xi1>, vector<2x256xf32>
    %497 = vector.extract_strided_slice %496 {offsets = [0, 0], sizes = [2, 32], strides = [1, 1]} : vector<2x256xf32> to vector<2x32xf32>
    %498 = vector.extract_strided_slice %496 {offsets = [0, 32], sizes = [2, 32], strides = [1, 1]} : vector<2x256xf32> to vector<2x32xf32>
    %499 = vector.extract_strided_slice %496 {offsets = [0, 64], sizes = [2, 32], strides = [1, 1]} : vector<2x256xf32> to vector<2x32xf32>
    %500 = vector.extract_strided_slice %496 {offsets = [0, 96], sizes = [2, 32], strides = [1, 1]} : vector<2x256xf32> to vector<2x32xf32>
    %501 = vector.extract_strided_slice %496 {offsets = [0, 128], sizes = [2, 32], strides = [1, 1]} : vector<2x256xf32> to vector<2x32xf32>
    %502 = vector.extract_strided_slice %496 {offsets = [0, 160], sizes = [2, 32], strides = [1, 1]} : vector<2x256xf32> to vector<2x32xf32>
    %503 = vector.extract_strided_slice %496 {offsets = [0, 192], sizes = [2, 32], strides = [1, 1]} : vector<2x256xf32> to vector<2x32xf32>
    %504 = vector.extract_strided_slice %496 {offsets = [0, 224], sizes = [2, 32], strides = [1, 1]} : vector<2x256xf32> to vector<2x32xf32>
    %505 = arith.mulf %498, %473 : vector<2x32xf32>
    %506 = arith.mulf %497, %499 : vector<2x32xf32>
    %507 = arith.addf %505, %506 : vector<2x32xf32>
    %508 = arith.mulf %502, %476 : vector<2x32xf32>
    %509 = arith.mulf %501, %503 : vector<2x32xf32>
    %510 = arith.addf %508, %509 : vector<2x32xf32>
    %511 = math.tanh %507 : vector<2x32xf32>
    %512 = arith.mulf %500, %511 : vector<2x32xf32>
    %513 = math.tanh %510 : vector<2x32xf32>
    %514 = arith.mulf %504, %513 : vector<2x32xf32>
    %515 = tpu.concatenate %512, %514 in 1 : vector<2x32xf32>, vector<2x32xf32> -> vector<2x64xf32>
    %c10_98 = arith.constant 10 : index
    %c0_99 = arith.constant 0 : index
    %516 = vector.load %arg15[%c10_98, %c0_99] : memref<16x64xf32, #tpu.memory_space<vmem>>, vector<2x32xf32>
    tpu.vector_store %arg15[%c10_98, %c0_99], %512 {strides = array<i32>} : memref<16x64xf32, #tpu.memory_space<vmem>>, vector<2x32xf32>,
    %c4_100 = arith.constant 4 : index
    %c32_101 = arith.constant 32 : index
    %517 = vector.load %arg15[%c4_100, %c32_101] : memref<16x64xf32, #tpu.memory_space<vmem>>, vector<2x32xf32>
    tpu.vector_store %arg15[%c4_100, %c32_101], %514 {strides = array<i32>} : memref<16x64xf32, #tpu.memory_space<vmem>>, vector<2x32xf32>,
    %518 = vector.extract_strided_slice %321 {offsets = [12, 0], sizes = [2, 128], strides = [1, 1]} : vector<16x256xf32> to vector<2x128xf32>
    %519 = vector.extract_strided_slice %321 {offsets = [2, 128], sizes = [2, 128], strides = [1, 1]} : vector<16x256xf32> to vector<2x128xf32>
    %520 = tpu.concatenate %518, %519 in 1 : vector<2x128xf32>, vector<2x128xf32> -> vector<2x256xf32>
    %521 = arith.truncf %515 : vector<2x64xf32> to vector<2x64xbf16>
    %cst_102 = arith.constant dense<0.000000e+00> : vector<2x256xf32>
    %522 = tpu.matmul %521, %322, %cst_102 {dimension_numbers = #tpu.dot_dimension_numbers<[1], [0], [0], [1], [0, 0, 1, 1], [], []>} : vector<2x64xbf16>, vector<64x256xbf16>, vector<2x256xf32> -> vector<2x256xf32>
    %523 = arith.addf %520, %522 : vector<2x256xf32>
    %524 = arith.negf %523 : vector<2x256xf32>
    %525 = math.exp %524 : vector<2x256xf32>
    %cst_103 = arith.constant 1.000000e+00 : f32
    %526 = vector.broadcast %cst_103 : f32 to vector<2x256xf32>
    %527 = arith.addf %526, %525 : vector<2x256xf32>
    %528 = arith.divf %526, %527 : vector<2x256xf32>
    %529 = math.tanh %523 : vector<2x256xf32>
    %530 = arith.select %45, %529, %528 : vector<2x256xi1>, vector<2x256xf32>
    %531 = vector.extract_strided_slice %530 {offsets = [0, 0], sizes = [2, 32], strides = [1, 1]} : vector<2x256xf32> to vector<2x32xf32>
    %532 = vector.extract_strided_slice %530 {offsets = [0, 32], sizes = [2, 32], strides = [1, 1]} : vector<2x256xf32> to vector<2x32xf32>
    %533 = vector.extract_strided_slice %530 {offsets = [0, 64], sizes = [2, 32], strides = [1, 1]} : vector<2x256xf32> to vector<2x32xf32>
    %534 = vector.extract_strided_slice %530 {offsets = [0, 96], sizes = [2, 32], strides = [1, 1]} : vector<2x256xf32> to vector<2x32xf32>
    %535 = vector.extract_strided_slice %530 {offsets = [0, 128], sizes = [2, 32], strides = [1, 1]} : vector<2x256xf32> to vector<2x32xf32>
    %536 = vector.extract_strided_slice %530 {offsets = [0, 160], sizes = [2, 32], strides = [1, 1]} : vector<2x256xf32> to vector<2x32xf32>
    %537 = vector.extract_strided_slice %530 {offsets = [0, 192], sizes = [2, 32], strides = [1, 1]} : vector<2x256xf32> to vector<2x32xf32>
    %538 = vector.extract_strided_slice %530 {offsets = [0, 224], sizes = [2, 32], strides = [1, 1]} : vector<2x256xf32> to vector<2x32xf32>
    %539 = arith.mulf %532, %507 : vector<2x32xf32>
    %540 = arith.mulf %531, %533 : vector<2x32xf32>
    %541 = arith.addf %539, %540 : vector<2x32xf32>
    %542 = arith.mulf %536, %510 : vector<2x32xf32>
    %543 = arith.mulf %535, %537 : vector<2x32xf32>
    %544 = arith.addf %542, %543 : vector<2x32xf32>
    %545 = math.tanh %541 : vector<2x32xf32>
    %546 = arith.mulf %534, %545 : vector<2x32xf32>
    %547 = math.tanh %544 : vector<2x32xf32>
    %548 = arith.mulf %538, %547 : vector<2x32xf32>
    %549 = tpu.concatenate %546, %548 in 1 : vector<2x32xf32>, vector<2x32xf32> -> vector<2x64xf32>
    %c12_104 = arith.constant 12 : index
    %c0_105 = arith.constant 0 : index
    %550 = vector.load %arg15[%c12_104, %c0_105] : memref<16x64xf32, #tpu.memory_space<vmem>>, vector<2x32xf32>
    tpu.vector_store %arg15[%c12_104, %c0_105], %546 {strides = array<i32>} : memref<16x64xf32, #tpu.memory_space<vmem>>, vector<2x32xf32>,
    %c2_106 = arith.constant 2 : index
    %c32_107 = arith.constant 32 : index
    %551 = vector.load %arg15[%c2_106, %c32_107] : memref<16x64xf32, #tpu.memory_space<vmem>>, vector<2x32xf32>
    tpu.vector_store %arg15[%c2_106, %c32_107], %548 {strides = array<i32>} : memref<16x64xf32, #tpu.memory_space<vmem>>, vector<2x32xf32>,
    %552 = vector.extract_strided_slice %321 {offsets = [14, 0], sizes = [2, 128], strides = [1, 1]} : vector<16x256xf32> to vector<2x128xf32>
    %553 = vector.extract_strided_slice %321 {offsets = [0, 128], sizes = [2, 128], strides = [1, 1]} : vector<16x256xf32> to vector<2x128xf32>
    %554 = tpu.concatenate %552, %553 in 1 : vector<2x128xf32>, vector<2x128xf32> -> vector<2x256xf32>
    %555 = arith.truncf %549 : vector<2x64xf32> to vector<2x64xbf16>
    %cst_108 = arith.constant dense<0.000000e+00> : vector<2x256xf32>
    %556 = tpu.matmul %555, %322, %cst_108 {dimension_numbers = #tpu.dot_dimension_numbers<[1], [0], [0], [1], [0, 0, 1, 1], [], []>} : vector<2x64xbf16>, vector<64x256xbf16>, vector<2x256xf32> -> vector<2x256xf32>
    %557 = arith.addf %554, %556 : vector<2x256xf32>
    %558 = arith.negf %557 : vector<2x256xf32>
    %559 = math.exp %558 : vector<2x256xf32>
    %cst_109 = arith.constant 1.000000e+00 : f32
    %560 = vector.broadcast %cst_109 : f32 to vector<2x256xf32>
    %561 = arith.addf %560, %559 : vector<2x256xf32>
    %562 = arith.divf %560, %561 : vector<2x256xf32>
    %563 = math.tanh %557 : vector<2x256xf32>
    %564 = arith.select %45, %563, %562 : vector<2x256xi1>, vector<2x256xf32>
    %565 = vector.extract_strided_slice %564 {offsets = [0, 0], sizes = [2, 32], strides = [1, 1]} : vector<2x256xf32> to vector<2x32xf32>
    %566 = vector.extract_strided_slice %564 {offsets = [0, 32], sizes = [2, 32], strides = [1, 1]} : vector<2x256xf32> to vector<2x32xf32>
    %567 = vector.extract_strided_slice %564 {offsets = [0, 64], sizes = [2, 32], strides = [1, 1]} : vector<2x256xf32> to vector<2x32xf32>
    %568 = vector.extract_strided_slice %564 {offsets = [0, 96], sizes = [2, 32], strides = [1, 1]} : vector<2x256xf32> to vector<2x32xf32>
    %569 = vector.extract_strided_slice %564 {offsets = [0, 128], sizes = [2, 32], strides = [1, 1]} : vector<2x256xf32> to vector<2x32xf32>
    %570 = vector.extract_strided_slice %564 {offsets = [0, 160], sizes = [2, 32], strides = [1, 1]} : vector<2x256xf32> to vector<2x32xf32>
    %571 = vector.extract_strided_slice %564 {offsets = [0, 192], sizes = [2, 32], strides = [1, 1]} : vector<2x256xf32> to vector<2x32xf32>
    %572 = vector.extract_strided_slice %564 {offsets = [0, 224], sizes = [2, 32], strides = [1, 1]} : vector<2x256xf32> to vector<2x32xf32>
    %573 = arith.mulf %566, %541 : vector<2x32xf32>
    %574 = arith.mulf %565, %567 : vector<2x32xf32>
    %575 = arith.addf %573, %574 : vector<2x32xf32>
    %576 = arith.mulf %570, %544 : vector<2x32xf32>
    %577 = arith.mulf %569, %571 : vector<2x32xf32>
    %578 = arith.addf %576, %577 : vector<2x32xf32>
    %579 = math.tanh %575 : vector<2x32xf32>
    %580 = arith.mulf %568, %579 : vector<2x32xf32>
    %581 = math.tanh %578 : vector<2x32xf32>
    %582 = arith.mulf %572, %581 : vector<2x32xf32>
    %c14_110 = arith.constant 14 : index
    %c0_111 = arith.constant 0 : index
    %583 = vector.load %arg15[%c14_110, %c0_111] : memref<16x64xf32, #tpu.memory_space<vmem>>, vector<2x32xf32>
    tpu.vector_store %arg15[%c14_110, %c0_111], %580 {strides = array<i32>} : memref<16x64xf32, #tpu.memory_space<vmem>>, vector<2x32xf32>,
    %c0_112 = arith.constant 0 : index
    %c32_113 = arith.constant 32 : index
    %584 = vector.load %arg15[%c0_112, %c32_113] : memref<16x64xf32, #tpu.memory_space<vmem>>, vector<2x32xf32>
    tpu.vector_store %arg15[%c0_112, %c32_113], %582 {strides = array<i32>} : memref<16x64xf32, #tpu.memory_space<vmem>>, vector<2x32xf32>,
    %c0_114 = arith.constant 0 : index
    %c0_115 = arith.constant 0 : index
    %585 = vector.load %arg15[%c0_114, %c0_115] : memref<16x64xf32, #tpu.memory_space<vmem>>, vector<16x64xf32>
    %c0_116 = arith.constant 0 : index
    %c0_117 = arith.constant 0 : index
    %586 = vector.load %arg8[%c0_116, %c0_117] : memref<64x1xf32, #tpu.memory_space<vmem>>, vector<64x1xf32>
    %cst_118 = arith.constant dense<0.000000e+00> : vector<16x1xf32>
    %587 = tpu.matmul %585, %586, %cst_118 {dimension_numbers = #tpu.dot_dimension_numbers<[1], [0], [0], [1], [0, 0, 1, 1], [], []>} : vector<16x64xf32>, vector<64x1xf32>, vector<16x1xf32> -> vector<16x1xf32>
    %588 = tpu.iota {dimensions = array<i32: 1>} : vector<16x2xi32>
    %589 = tpu.iota {dimensions = array<i32: 0>} : vector<16x2xi32>
    %c2_i32 = arith.constant 2 : i32
    %c0_i32_119 = arith.constant 0 : i32
    %590 = arith.cmpi eq, %c2_i32, %c0_i32_119 : i32
    %c1_i32_120 = arith.constant 1 : i32
    %591 = arith.select %590, %c1_i32_120, %c2_i32 : i32
    %592 = vector.broadcast %591 : i32 to vector<16x2xi32>
    %593 = arith.remsi %589, %592 : vector<16x2xi32>
    %c0_i32_121 = arith.constant 0 : i32
    %594 = vector.broadcast %c0_i32_121 : i32 to vector<16x2xi32>
    %595 = arith.cmpi ne, %593, %594 : vector<16x2xi32>
    %c0_i32_122 = arith.constant 0 : i32
    %596 = vector.broadcast %c0_i32_122 : i32 to vector<16x2xi32>
    %597 = arith.cmpi slt, %593, %596 : vector<16x2xi32>
    %c0_i32_123 = arith.constant 0 : i32
    %598 = arith.cmpi slt, %591, %c0_i32_123 : i32
    %599 = vector.broadcast %598 : i1 to vector<16x2xi1>
    %600 = vector.broadcast %599 : vector<16x2xi1> to vector<16x2xi1>
    %601 = arith.xori %597, %600 : vector<16x2xi1>
    %602 = arith.andi %601, %595 : vector<16x2xi1>
    %603 = vector.broadcast %591 : i32 to vector<16x2xi32>
    %604 = arith.addi %593, %603 : vector<16x2xi32>
    %605 = arith.select %602, %604, %593 : vector<16x2xi1>, vector<16x2xi32>
    %606 = arith.cmpi eq, %605, %588 : vector<16x2xi32>
    %607 = arith.extui %606 : vector<16x2xi1> to vector<16x2xi32>
    %608 = arith.sitofp %607 : vector<16x2xi32> to vector<16x2xf32>
    %cst_124 = arith.constant 0xFF800000 : f32
    %609 = vector.shape_cast %587 : vector<16x1xf32> to vector<16x1xf32>
    %610 = vector.broadcast %609 : vector<16x1xf32> to vector<16x2xf32>
    %611 = vector.broadcast %cst_124 : f32 to vector<16x2xf32>
    %612 = arith.select %606, %610, %611 : vector<16x2xi1>, vector<16x2xf32>
    %cst_125 = arith.constant dense<0xFF800000> : vector<2xf32>
    %613 = vector.multi_reduction <maximumf>, %612, %cst_125 [0] : vector<16x2xf32> to vector<2xf32>
    %614 = vector.shape_cast %613 : vector<2xf32> to vector<1x2xf32>
    %615 = vector.broadcast %614 : vector<1x2xf32> to vector<16x2xf32>
    %616 = arith.mulf %608, %615 : vector<16x2xf32>
    %cst_126 = arith.constant dense<0.000000e+00> : vector<16xf32>
    %617 = vector.multi_reduction <add>, %616, %cst_126 [1] : vector<16x2xf32> to vector<16xf32>
    %618 = vector.shape_cast %617 : vector<16xf32> to vector<16x1xf32>
    %619 = arith.subf %587, %618 : vector<16x1xf32>
    %620 = math.exp %619 : vector<16x1xf32>
    %621 = vector.broadcast %620 : vector<16x1xf32> to vector<16x2xf32>
    %622 = arith.mulf %608, %621 : vector<16x2xf32>
    %cst_127 = arith.constant dense<0.000000e+00> : vector<2xf32>
    %623 = vector.multi_reduction <add>, %622, %cst_127 [0] : vector<16x2xf32> to vector<2xf32>
    %624 = vector.shape_cast %623 : vector<2xf32> to vector<1x2xf32>
    %625 = vector.broadcast %624 : vector<1x2xf32> to vector<16x2xf32>
    %626 = arith.mulf %608, %625 : vector<16x2xf32>
    %cst_128 = arith.constant dense<0.000000e+00> : vector<16xf32>
    %627 = vector.multi_reduction <add>, %626, %cst_128 [1] : vector<16x2xf32> to vector<16xf32>
    %628 = vector.shape_cast %627 : vector<16xf32> to vector<16x1xf32>
    %629 = tpu.reciprocal %628 {approx = true} : vector<16x1xf32> -> vector<16x1xf32>
    %630 = arith.mulf %620, %629 : vector<16x1xf32>
    %631 = tpu.iota {dimensions = array<i32: 1>} : vector<2x16xi32>
    %632 = tpu.iota {dimensions = array<i32: 0>} : vector<2x16xi32>
    %c2_i32_129 = arith.constant 2 : i32
    %c0_i32_130 = arith.constant 0 : i32
    %633 = arith.cmpi eq, %c2_i32_129, %c0_i32_130 : i32
    %c1_i32_131 = arith.constant 1 : i32
    %634 = arith.select %633, %c1_i32_131, %c2_i32_129 : i32
    %635 = vector.broadcast %634 : i32 to vector<2x16xi32>
    %636 = arith.remsi %631, %635 : vector<2x16xi32>
    %c0_i32_132 = arith.constant 0 : i32
    %637 = vector.broadcast %c0_i32_132 : i32 to vector<2x16xi32>
    %638 = arith.cmpi ne, %636, %637 : vector<2x16xi32>
    %c0_i32_133 = arith.constant 0 : i32
    %639 = vector.broadcast %c0_i32_133 : i32 to vector<2x16xi32>
    %640 = arith.cmpi slt, %636, %639 : vector<2x16xi32>
    %c0_i32_134 = arith.constant 0 : i32
    %641 = arith.cmpi slt, %634, %c0_i32_134 : i32
    %642 = vector.broadcast %641 : i1 to vector<2x16xi1>
    %643 = vector.broadcast %642 : vector<2x16xi1> to vector<2x16xi1>
    %644 = arith.xori %640, %643 : vector<2x16xi1>
    %645 = arith.andi %644, %638 : vector<2x16xi1>
    %646 = vector.broadcast %634 : i32 to vector<2x16xi32>
    %647 = arith.addi %636, %646 : vector<2x16xi32>
    %648 = arith.select %645, %647, %636 : vector<2x16xi1>, vector<2x16xi32>
    %649 = arith.cmpi eq, %648, %632 : vector<2x16xi32>
    %650 = arith.extui %649 : vector<2x16xi1> to vector<2x16xi32>
    %651 = arith.sitofp %650 : vector<2x16xi32> to vector<2x16xf32>
    %652 = vector.broadcast %630 : vector<16x1xf32> to vector<16x64xf32>
    %653 = arith.mulf %585, %652 : vector<16x64xf32>
    %cst_135 = arith.constant dense<0.000000e+00> : vector<2x64xf32>
    %654 = tpu.matmul %651, %653, %cst_135 {dimension_numbers = #tpu.dot_dimension_numbers<[1], [0], [0], [1], [0, 0, 1, 1], [], []>} : vector<2x16xf32>, vector<16x64xf32>, vector<2x64xf32> -> vector<2x64xf32>
    %c0_136 = arith.constant 0 : index
    %c0_137 = arith.constant 0 : index
    %655 = vector.load %arg9[%c0_136, %c0_137] : memref<64x32xf32, #tpu.memory_space<vmem>>, vector<64x32xf32>
    %cst_138 = arith.constant dense<0.000000e+00> : vector<2x32xf32>
    %656 = tpu.matmul %654, %655, %cst_138 {dimension_numbers = #tpu.dot_dimension_numbers<[1], [0], [0], [1], [0, 0, 1, 1], [], []>} : vector<2x64xf32>, vector<64x32xf32>, vector<2x32xf32> -> vector<2x32xf32>
    %c0_139 = arith.constant 0 : index
    %c0_140 = arith.constant 0 : index
    %657 = vector.load %arg10[%c0_139, %c0_140] : memref<1x32xf32, #tpu.memory_space<vmem>>, vector<1x32xf32>
    %658 = vector.broadcast %657 : vector<1x32xf32> to vector<2x32xf32>
    %659 = arith.addf %656, %658 : vector<2x32xf32>
    %cst_141 = arith.constant 0.000000e+00 : f32
    %660 = vector.broadcast %cst_141 : f32 to vector<2x32xf32>
    %661 = arith.cmpf ogt, %659, %660 : vector<2x32xf32>
    %cst_142 = arith.constant 0.00999999977 : f32
    %662 = vector.broadcast %cst_142 : f32 to vector<2x32xf32>
    %663 = arith.mulf %662, %659 : vector<2x32xf32>
    %664 = arith.select %661, %659, %663 : vector<2x32xi1>, vector<2x32xf32>
    %c0_143 = arith.constant 0 : index
    %c0_144 = arith.constant 0 : index
    %665 = vector.load %arg11[%c0_143, %c0_144] : memref<32x2xf32, #tpu.memory_space<vmem>>, vector<32x2xf32>
    %cst_145 = arith.constant dense<0.000000e+00> : vector<2x2xf32>
    %666 = tpu.matmul %664, %665, %cst_145 {dimension_numbers = #tpu.dot_dimension_numbers<[1], [0], [0], [1], [0, 0, 1, 1], [], []>} : vector<2x32xf32>, vector<32x2xf32>, vector<2x2xf32> -> vector<2x2xf32>
    %c0_146 = arith.constant 0 : index
    %c0_147 = arith.constant 0 : index
    %667 = vector.load %arg12[%c0_146, %c0_147] : memref<1x2xf32, #tpu.memory_space<vmem>>, vector<1x2xf32>
    %668 = vector.broadcast %667 : vector<1x2xf32> to vector<2x2xf32>
    %669 = arith.addf %666, %668 : vector<2x2xf32>
    %c0_148 = arith.constant 0 : index
    %c0_149 = arith.constant 0 : index
    %670 = vector.load %arg13[%c0_148, %c0_149] : memref<2x2xf32, #tpu.memory_space<vmem>>, vector<2x2xf32>
    tpu.vector_store %arg13[%c0_148, %c0_149], %669 {strides = array<i32>} : memref<2x2xf32, #tpu.memory_space<vmem>>, vector<2x2xf32>,
    return
  }
}

</mosaic_0001>

<bundles_post_ra>
// kernel: lstm_forward.1
= control target key start
LH: loop header
LB: loop body
LE: loop exit
PB: predicated region body
PF: predicated region fallthrough
CT: control target
= control target key end

     0   :  { %v3296_v2 = vmov 0   ;;  %s4214_s0 = inlined_call_operand.vmem [shape: s32[16,1], index: 0, kind: input, shape index: {}]   ;;  %s4215_s1 = inlined_call_operand.vmem [shape: f32[32,32], index: 1, kind: input, shape index: {}]   ;;  %s4216_s2 = inlined_call_operand.vmem [shape: bf16[32,256], index: 2, kind: input, shape index: {}]   ;;  %s4217_s3 = inlined_call_operand.vmem [shape: bf16[64,256], index: 3, kind: input, shape index: {}]   ;;  %s4218_s4 = inlined_call_operand.vmem [shape: f32[1,256], index: 4, kind: input, shape index: {}]   ;;  %s4219_s5 = inlined_call_operand.vmem [shape: bf16[64,256], index: 5, kind: input, shape index: {}]   ;;  %s4220_s6 = inlined_call_operand.vmem [shape: bf16[64,256], index: 6, kind: input, shape index: {}]   ;;  %s4221_s7 = inlined_call_operand.vmem [shape: f32[1,256], index: 7, kind: input, shape index: {}]   ;;  %s4222_s8 = inlined_call_operand.vmem [shape: f32[64,1], index: 8, kind: input, shape index: {}]   ;;  %s4223_s9 = inlined_call_operand.vmem [shape: f32[64,32], index: 9, kind: input, shape index: {}]   ;;  %s4224_s10 = inlined_call_operand.vmem [shape: f32[1,32], index: 10, kind: input, shape index: {}]   ;;  %s4225_s11 = inlined_call_operand.vmem [shape: f32[32,2], index: 11, kind: input, shape index: {}]   ;;  %s4226_s12 = inlined_call_operand.vmem [shape: f32[1,2], index: 12, kind: input, shape index: {}]   ;;  %s4227_s13 = inlined_call_operand.hbm [shape: f32[2,2], index: 13, kind: output, shape index: {}]  }
   0x1   :  { %v46_v0 = vld [vmem:[%s4214_s0] sm:$0xff]  ;;  %v65_v1 = vld [vmem:[%s4215_s1 + $0x18] sm:$0xff]  ;;  %2970 = vset.pattern.permute.xlu0 %v3296_v2  ;;  %v47_v3 = vld [vmem:[%s4214_s0 + $0x8] sm:$0xff]  ;;  %251 = vmatprep.mubr.bf16.mxu1 %v3296_v2 }
   0x2   :  { %2896 = vmatprep.subr.mxu0 %v65_v1  ;;  %v64_v4 = vld [vmem:[%s4215_s1 + $0x10] sm:$0xff]  ;;  %v63_v5 = vld [vmem:[%s4215_s1 + $0x8] sm:$0xff]  ;;  %51 = vperm.xlu0 %2970, %v46_v0   ;;  %v62_v6 = vld [vmem:[%s4215_s1] sm:$0xff] }
   0x3   :  { %2897 = vmatpush3.msra.mxu0 %v65_v1  ;;  %v2972_v7 = vld [vmem:[%s4216_s2 + $0x14] ss:$8 sps:$4 sm:$0xff]   ;;  %2971 = vset.pattern.permute.xlu1 %v3296_v2  ;;  %v2974_v8 = vld [vmem:[%s4216_s2 + $0x10] ss:$8 sps:$4 sm:$0xff]  }
   0x4   :  { %2898 = vmatprep.subr.mxu0 %v64_v4  ;;  %231 = vmatprep.subr.bf16.mxu1 %v2972_v7 }
   0x5   :  { %2899 = vmatpush3.msra.mxu0 %v64_v4  ;;  %232 = vmatpush1.bf16.msra.mxu1 %v2974_v8 }
   0x6   :  { %2900 = vmatprep.subr.mxu0 %v63_v5  ;;  %54 = vperm.xlu0 %2970, %v47_v3  }
   0x7   :  { %2901 = vmatpush3.msra.mxu0 %v63_v5 }
   0x8   :  { %2902 = vmatprep.subr.mxu0 %v62_v6 }
   0x9   :  { %2903 = vmatpush3.msra.mxu0 %v62_v6 }
   0xa   :  { %18 = vsyncpa [#allocation5], 0  ;;  %v48_v9 = vlaneseq  ;;  %vm66_vm0 = vcmask 261120   ;;  %v3297_v12 = vmov 0.0   ;;  %v2975_v16 = vld [vmem:[%s4216_s2 + $0x4] ss:$8 sps:$4 sm:$0xff]  }
   0xb   :  { %v2977_v17 = vld [vmem:[%s4216_s2] ss:$8 sps:$4 sm:$0xff]   ;;  %233 = vmatprep.subr.bf16.mxu1 %v2975_v16  ;;  %s3298_s2 = smov 64   ;;  %v3469_v56 = vld [vmem:[%s4217_s3 + $0x34] ss:$8 sps:$4 sm:$0xff]   ;;  %s3299_s16 = smov 96  }
   0xc   :  { %v3400_v10 = vand.u32 127, %v48_v9  ;;  %234 = vmatpush1.bf16.msra.mxu1 %v2977_v17  ;;  %v3417_v21 = vshrl.u32 %v48_v9, 7  ;;  %v184_v23 = vld [vmem:[%s4218_s4] sm:$0x3]  ;;  %v3474_v57 = vld [vmem:[%s4217_s3 + $0x30] ss:$8 sps:$4 sm:$0xff]   ;;  %379 = vmatprep.subr.bf16.mxu0 %v3469_v56 }
   0xd   :  { %v3479_v58 = vld [vmem:[%s4217_s3 + $0x24] ss:$8 sps:$4 sm:$0xff]   ;;  %507 = vmatprep.subr.bf16.mxu1 %v3469_v56  ;;  %v3501_v0 = vld [vmem:[%s4217_s3 + $0x14] ss:$8 sps:$4 sm:$0xff]   ;;  %v3506_v1 = vld [vmem:[%s4217_s3 + $0x10] ss:$8 sps:$4 sm:$0xff]  }
   0xe   :  { %v188_v22 = vsub.s32 0, %v3417_v21  ;;  %v192_v24 = vsub.s32 1, %v3417_v21  ;;  %v148_v42 = vadd.s32 128, %v3400_v10  ;;  %vm173_vm3 = vcmp.ge.s32.totalorder %v3400_v10, 64  ;;  %v266_v61 = vld [vmem:[%s4217_s3 + $0x20] sm:$0xff]  ;;  %v267_v62 = vld [vmem:[%s4217_s3 + $0x28] sm:$0xff] }
   0xf   :  { %vm175_vm4 = vcmp.lt.s32.totalorder %v3400_v10, 96  ;;  %v3495_v63 = vcombine.low %v266_v61, %v267_v62  ;;  %v3512_v3 = vld [vmem:[%s4217_s3 + $0x4] ss:$8 sps:$4 sm:$0xff]   ;;  %vm320_vm9 = vcmask 254976   ;;  %vm322_vm10 = vcmask 517376  }
  0x10   :  { %v189_v25 = vrot.slane %v184_v23, %v188_v22  ;;  %v193_v26 = vrot.slane %v184_v23, %v192_v24  ;;  %vm3446_vm5 = vmand %vm173_vm3, %vm175_vm4  ;;  %v160_v45 = vand.u32 127, %v148_v42  ;;  %v262_v4 = vld [vmem:[%s4217_s3] sm:$0xff]  ;;  %v263_v5 = vld [vmem:[%s4217_s3 + $0x8] sm:$0xff]  ;;  %s3300_s3 = smov 32   ;;  %vm367_vm11 = vcmask 523264  }
  0x11   :  { %v3526_v6 = vcombine.low %v262_v4, %v263_v5  ;;  %vm489_vm12 = vcmask 257026   ;;  %vm491_vm13 = vcmask 519426   ;;  %vm613_vm14 = vcmask 259076  }
  0x12   :  { %vm174_vm6 = vcmp.ge.s32.totalorder %v160_v45, 64  ;;  %vm176_vm7 = vcmp.lt.s32.totalorder %v160_v45, 96  ;;  %vm615_vm15 = vcmask 521476  }
  0x13   :  { %vm3453_vm8 = vmand %vm174_vm6, %vm176_vm7  ;;  %vm3301_vm6 = vmmov 0  }
  0x7d   :  { %v52_v11 = vpop.permute.xlu0 %51 }
  0x7e   :  { %vm56_vm1 = vcmp.eq.s32.totalorder %v52_v11, %v3400_v10 }
  0x7f   :  { %v2773_v13 = vsel %vm56_vm1, 1.0, %v3297_v12  ;;  %vm737_vm1 = vcmask 261126  }
  0x80   :  { %2904 = vmatprep.mubr.msk.f32.mxu0 %vm66_vm0, %v2773_v13 }
  0x81   :  { %v55_v14 = vpop.permute.xlu0 %54 }
  0x82   :  { %vm57_vm2 = vcmp.eq.s32.totalorder %v55_v14, %v3400_v10 }
  0x83   :  { %v2774_v15 = vsel %vm57_vm2, 1.0, %v3297_v12  ;;  %vm739_vm2 = vcmask 523526  }
  0x84   :  { %2905 = vmatmul.mubr.msk.f32.vlgmr.msra.gmra.mxu0 %vm66_vm0, %v2774_v15 }
  0x85   :  { %403 = vmatprep.mubr.bf16.mxu0 %v3296_v2  ;;  %380 = vmatpush1.bf16.msra.mxu0 %v3474_v57 }
  0x86   :  { %381 = vmatprep.subr.bf16.mxu0 %v3479_v58 }
  0x89   :  { %382 = vmatpush1.bf16.msra.mxu0 %v3495_v63 }
  0x8a   :  { %383 = vmatprep.subr.bf16.mxu0 %v3501_v0 }
  0x8d   :  { %384 = vmatpush1.bf16.msra.mxu0 %v3506_v1 }
  0x8e   :  { %385 = vmatprep.subr.bf16.mxu0 %v3512_v3 }
  0x91   :  { %386 = vmatpush1.bf16.msra.mxu0 %v3526_v6 }
  0x92   :  { %631 = vmatprep.subr.bf16.mxu0 %v3469_v56 }
 0x144   :  { %v2906_v18 = vpop.f32.mrf.mxu0 }
 0x146   :  { %v139_v19 = vpop.f32.mrf.mxu0 }
 0x147   :  { %v179_v20 = vpack.c.bf16 %v2906_v18, %v139_v19 }
 0x149   :  { %2781 = vmatmul.mubr.msk.bf16.vlgmr.msra.gmra.mxu1 %vm66_vm0, %v179_v20 }
 0x14a   :  { %531 = vmatprep.mubr.bf16.mxu1 %v3296_v2  ;;  %508 = vmatpush1.bf16.msra.mxu1 %v3474_v57 }
 0x14b   :  { %509 = vmatprep.subr.bf16.mxu1 %v3479_v58 }
 0x14e   :  { %510 = vmatpush1.bf16.msra.mxu1 %v3495_v63 }
 0x14f   :  { %511 = vmatprep.subr.bf16.mxu1 %v3501_v0 }
 0x152   :  { %512 = vmatpush1.bf16.msra.mxu1 %v3506_v1 }
 0x153   :  { %513 = vmatprep.subr.bf16.mxu1 %v3512_v3 }
 0x156   :  { %514 = vmatpush1.bf16.msra.mxu1 %v3526_v6 }
 0x157   :  { %758 = vmatprep.subr.bf16.mxu1 %v3469_v56 }
 0x209   :  { %v253_v27 = vpop.f32.mrf.mxu1 }
 0x20a   :  { %v3428_v28 = vadd.f32 %v253_v27, %v189_v25 }
 0x20b   :  { %v255_v29 = vpop.f32.mrf.mxu1 }
 0x20c   :  { %v2782_v30 = vmul.f32 -1.442695, %v3428_v28  ;;  %v3431_v31 = vadd.f32 %v255_v29, %v193_v26 }
 0x20d   :  { %v257_v32 = vpop.f32.mrf.mxu1 }
 0x20e   :  { %3010 = vpow2.f32 %v2782_v30  ;;  %v3433_v33 = vadd.f32 %v257_v32, %v189_v25 }
 0x20f   :  { %v259_v34 = vpop.f32.mrf.mxu1 }
 0x210   :  { %v3435_v35 = vadd.f32 %v259_v34, %v193_v26 }
 0x212   :  { %v3438_v36 = vrot.slane %v3435_v35, 6  ;;  %v324_v20 = vrot.slane %v3435_v35, 2 }
 0x214   :  { %v2783_v37 = vmul.f32 -1.442695, %v3438_v36 }
 0x216   :  { %3012 = vpow2.f32 %v2783_v37 }
 0x217   :  { %3014 = vtanh.f32 %v3428_v28 }
 0x21b   :  { %v3011_v38 = vpop.eup %3010 }
 0x21c   :  { %v279_v39 = vadd.f32 1.0, %v3011_v38 }
 0x21e   :  { %3016 = vrcp.f32 %v279_v39 }
 0x21f   :  { %3018 = vtanh.f32 %v3438_v36 }
 0x223   :  { %v3013_v40 = vpop.eup %3012 }
 0x224   :  { %v280_v41 = vadd.f32 1.0, %v3013_v40  ;;  %v3015_v44 = vpop.eup %3014 }
 0x226   :  { %3020 = vrcp.f32 %v280_v41 }
 0x22b   :  { %v3017_v46 = vpop.eup %3016 }
 0x22c   :  { %v287_v47 = vsel %vm3446_vm5, %v3015_v44, %v3017_v46  ;;  %v3019_v49 = vpop.eup %3018 }
 0x22d   :  { %290 = vrot.lane.b32.xlu1 %v287_v47, %s3298_s2 }
 0x233   :  { %v3021_v50 = vpop.eup %3020 }
 0x234   :  { %v288_v51 = vsel %vm3453_vm8, %v3019_v49, %v3021_v50 }
 0x235   :  { %295 = vrot.lane.b32.xlu1 %v288_v51, %s3298_s2 }
 0x29f   :  { %v291_v52 = vpop.permute.xlu1 %290 }
 0x2a0   :  { %v3460_v53 = vmul.f32 %v291_v52, %v287_v47 }
 0x2a2   :  { %3022 = vtanh.f32 %v3460_v53 }
 0x2a7   :  { %v296_v54 = vpop.permute.xlu1 %295 }
 0x2a8   :  { %v3463_v55 = vmul.f32 %v296_v54, %v288_v51 }
 0x2aa   :  { %3024 = vtanh.f32 %v3463_v55  ;;  %v453_v49 = vrot.slane %v3463_v55, 6 }
 0x2af   :  { %v3023_v59 = vpop.eup %3022 }
 0x2b0   :  { %301 = vrot.lane.b32.xlu0 %v3023_v59, %s3299_s16 }
 0x2b7   :  { %v3025_v60 = vpop.eup %3024 }
 0x2b8   :  { %307 = vrot.lane.b32.xlu1 %v3025_v60, %s3299_s16 }
 0x322   :  { %v302_v7 = vpop.permute.xlu0 %301 }
 0x323   :  { %v304_v8 = vmul.f32 %v302_v7, %v287_v47  ;;  %v437_v47 = vrot.slane %v3460_v53, 6 }
 0x325   :  { %312 = vrot.lane.b32.xlu0 %v304_v8, %s3300_s3 }
 0x32a   :  { %v308_v9 = vpop.permute.xlu1 %307 }
 0x32b   :  { %v310_v11 = vmul.f32 %v308_v9, %v288_v51 }
 0x32d   :  { %316 = vrot.lane.b32.xlu1 %v310_v11, %s3298_s2 }
 0x397   :  { %v313_v13 = vpop.permute.xlu0 %312 }
 0x398   :  { %321 = vst.msk [vmem:[#allocation2] sm:$0x3] %vm320_vm9, %v313_v13 }
 0x39f   :  { %v317_v14 = vpop.permute.xlu1 %316 }
 0x3a0   :  { %v319_v15 = vsel %vm66_vm0, %v313_v13, %v317_v14  ;;  %323 = vst.msk [vmem:[#allocation2 + $0xe] sm:$0x3] %vm322_vm10, %v317_v14 }
 0x3a1   :  { %v326_v16 = vpack.c.bf16 %v319_v15, %v319_v15 }
 0x3a3   :  { %2792 = vmatmul.mubr.msk.bf16.vlgmr.msra.gmra.mxu0 %vm367_vm11, %v326_v16 }
 0x3a4   :  { %632 = vmatpush1.bf16.msra.mxu0 %v3474_v57  ;;  %655 = vmatprep.mubr.bf16.mxu0 %v3296_v2 }
 0x3a5   :  { %633 = vmatprep.subr.bf16.mxu0 %v3479_v58 }
 0x3a8   :  { %634 = vmatpush1.bf16.msra.mxu0 %v3495_v63 }
 0x3a9   :  { %635 = vmatprep.subr.bf16.mxu0 %v3501_v0 }
 0x3ac   :  { %636 = vmatpush1.bf16.msra.mxu0 %v3506_v1 }
 0x3ad   :  { %637 = vmatprep.subr.bf16.mxu0 %v3512_v3 }
 0x3b0   :  { %638 = vmatpush1.bf16.msra.mxu0 %v3526_v6 }
 0x3b1   :  { %874 = vmatprep.subr.bf16.mxu0 %v3469_v56 }
 0x463   :  { %v405_v17 = vpop.f32.mrf.mxu0 }
 0x464   :  { %v414_v18 = vrot.slane %v405_v17, 6 }
 0x465   :  { %v407_v19 = vpop.f32.mrf.mxu0 }
 0x466   :  { %v418_v23 = vadd.f32 %v414_v18, %v3428_v28  ;;  %v415_v25 = vrot.slane %v407_v19, 6 }
 0x467   :  { %v409_v26 = vpop.f32.mrf.mxu0 }
 0x468   :  { %v2793_v27 = vmul.f32 -1.442695, %v418_v23  ;;  %v419_v29 = vadd.f32 %v415_v25, %v324_v20 }
 0x469   :  { %v410_v30 = vpop.f32.mrf.mxu0 }
 0x46a   :  { %3026 = vpow2.f32 %v2793_v27  ;;  %v2794_v32 = vmul.f32 -1.442695, %v419_v29 }
 0x46c   :  { %3028 = vpow2.f32 %v2794_v32 }
 0x46d   :  { %3030 = vtanh.f32 %v418_v23 }
 0x477   :  { %v3027_v34 = vpop.eup %3026 }
 0x478   :  { %v426_v37 = vadd.f32 1.0, %v3027_v34 }
 0x479   :  { %v3029_v38 = vpop.eup %3028 }
 0x47a   :  { %3032 = vrcp.f32 %v426_v37  ;;  %v427_v39 = vadd.f32 1.0, %v3029_v38  ;;  %v3031_v40 = vpop.eup %3030 }
 0x47b   :  { %3034 = vtanh.f32 %v419_v29 }
 0x47c   :  { %3036 = vrcp.f32 %v427_v39 }
 0x487   :  { %v3033_v41 = vpop.eup %3032 }
 0x488   :  { %v3035_v42 = vpop.eup %3034  ;;  %v434_v44 = vsel %vm3446_vm5, %v3031_v40, %v3033_v41 }
 0x489   :  { %v3037_v45 = vpop.eup %3036  ;;  %443 = vrot.lane.b32.xlu0 %v434_v44, %s3298_s2 }
 0x48a   :  { %v435_v46 = vsel %vm3453_vm8, %v3035_v42, %v3037_v45 }
 0x48b   :  { %459 = vrot.lane.b32.xlu1 %v435_v46, %s3298_s2 }
 0x48d   :  { %438 = vrot.lane.b32.xlu0 %v437_v47, %s3300_s3 }
 0x48f   :  { %454 = vrot.lane.b32.xlu1 %v453_v49, %s3300_s3 }
 0x4fb   :  { %v444_v50 = vpop.permute.xlu0 %443 }
 0x4fc   :  { %v446_v51 = vmul.f32 %v444_v50, %v434_v44 }
 0x4fd   :  { %v460_v52 = vpop.permute.xlu1 %459 }
 0x4fe   :  { %v462_v54 = vmul.f32 %v460_v52, %v435_v46  ;;  %448 = vrot.lane.b32.xlu0 %v446_v51, %s3300_s3 }
 0x4ff   :  { %v439_v59 = vpop.permute.xlu0 %438 }
 0x500   :  { %464 = vrot.lane.b32.xlu1 %v462_v54, %s3300_s3  ;;  %v441_v61 = vmul.f32 %v439_v59, %v434_v44 }
 0x501   :  { %v455_v60 = vpop.permute.xlu1 %454 }
 0x502   :  { %v457_v62 = vmul.f32 %v455_v60, %v435_v46 }
 0x570   :  { %v449_v53 = vpop.permute.xlu0 %448 }
 0x571   :  { %v3563_v4 = vadd.f32 %v449_v53, %v441_v61 }
 0x572   :  { %v465_v55 = vpop.permute.xlu1 %464 }
 0x573   :  { %3038 = vtanh.f32 %v3563_v4  ;;  %v3566_v5 = vadd.f32 %v465_v55, %v457_v62  ;;  %v565_v59 = vrot.slane %v3563_v4, 6 }
 0x575   :  { %3040 = vtanh.f32 %v3566_v5  ;;  %v579_v60 = vrot.slane %v3566_v5, 6 }
 0x580   :  { %v3039_v7 = vpop.eup %3038 }
 0x581   :  { %470 = vrot.lane.b32.xlu0 %v3039_v7, %s3298_s2 }
 0x582   :  { %v3041_v8 = vpop.eup %3040 }
 0x583   :  { %476 = vrot.lane.b32.xlu1 %v3041_v8, %s3298_s2 }
 0x5f3   :  { %v471_v9 = vpop.permute.xlu0 %470 }
 0x5f4   :  { %v473_v11 = vmul.f32 %v471_v9, %v434_v44 }
 0x5f5   :  { %v477_v13 = vpop.permute.xlu1 %476 }
 0x5f6   :  { %v479_v14 = vmul.f32 %v477_v13, %v435_v46  ;;  %481 = vrot.lane.b32.xlu0 %v473_v11, %s3300_s3 }
 0x5f8   :  { %485 = vrot.lane.b32.xlu1 %v479_v14, %s3298_s2 }
 0x668   :  { %v482_v15 = vpop.permute.xlu0 %481 }
 0x669   :  { %490 = vst.msk [vmem:[#allocation2] sm:$0xc] %vm489_vm12, %v482_v15 }
 0x66a   :  { %v486_v16 = vpop.permute.xlu1 %485 }
 0x66b   :  { %v488_v17 = vsel %vm66_vm0, %v482_v15, %v486_v16  ;;  %492 = vst.msk [vmem:[#allocation2 + $0xa] sm:$0xc] %vm491_vm13, %v486_v16 }
 0x66c   :  { %v493_v18 = vpack.c.bf16 %v488_v17, %v488_v17 }
 0x66e   :  { %v495_v19 = vrot.slane %v493_v18, 1 }
 0x670   :  { %2795 = vmatmul.mubr.msk.bf16.vlgmr.msra.gmra.mxu1 %vm367_vm11, %v495_v19 }
 0x671   :  { %759 = vmatpush1.bf16.msra.mxu1 %v3474_v57  ;;  %782 = vmatprep.mubr.bf16.mxu1 %v3296_v2 }
 0x672   :  { %760 = vmatprep.subr.bf16.mxu1 %v3479_v58 }
 0x675   :  { %761 = vmatpush1.bf16.msra.mxu1 %v3495_v63 }
 0x676   :  { %762 = vmatprep.subr.bf16.mxu1 %v3501_v0 }
 0x679   :  { %763 = vmatpush1.bf16.msra.mxu1 %v3506_v1 }
 0x67a   :  { %764 = vmatprep.subr.bf16.mxu1 %v3512_v3 }
 0x67d   :  { %765 = vmatpush1.bf16.msra.mxu1 %v3526_v6 }
 0x67e   :  { %996 = vmatprep.subr.bf16.mxu1 %v3469_v56 }
 0x730   :  { %v533_v23 = vpop.f32.mrf.mxu1 }
 0x731   :  { %v542_v25 = vrot.slane %v533_v23, 4 }
 0x732   :  { %v535_v26 = vpop.f32.mrf.mxu1 }
 0x733   :  { %v546_v27 = vadd.f32 %v542_v25, %v3428_v28  ;;  %v543_v29 = vrot.slane %v535_v26, 4 }
 0x734   :  { %v537_v30 = vpop.f32.mrf.mxu1 }
 0x735   :  { %v2796_v32 = vmul.f32 -1.442695, %v546_v27  ;;  %v547_v34 = vadd.f32 %v543_v29, %v3438_v36 }
 0x736   :  { %v538_v37 = vpop.f32.mrf.mxu1 }
 0x737   :  { %3042 = vpow2.f32 %v2796_v32  ;;  %v2797_v38 = vmul.f32 -1.442695, %v547_v34 }
 0x739   :  { %3044 = vpow2.f32 %v2797_v38 }
 0x73a   :  { %3046 = vtanh.f32 %v546_v27 }
 0x744   :  { %v3043_v39 = vpop.eup %3042 }
 0x745   :  { %v554_v40 = vadd.f32 1.0, %v3043_v39 }
 0x746   :  { %v3045_v41 = vpop.eup %3044 }
 0x747   :  { %3048 = vrcp.f32 %v554_v40  ;;  %v555_v42 = vadd.f32 1.0, %v3045_v41  ;;  %v3047_v44 = vpop.eup %3046 }
 0x748   :  { %3050 = vtanh.f32 %v547_v34 }
 0x749   :  { %3052 = vrcp.f32 %v555_v42 }
 0x754   :  { %v3049_v45 = vpop.eup %3048 }
 0x755   :  { %v3051_v46 = vpop.eup %3050  ;;  %v562_v47 = vsel %vm3446_vm5, %v3047_v44, %v3049_v45 }
 0x756   :  { %v3053_v49 = vpop.eup %3052  ;;  %569 = vrot.lane.b32.xlu0 %v562_v47, %s3298_s2  ;;  %v567_v61 = vmul.f32 %v565_v59, %v562_v47 }
 0x757   :  { %v563_v36 = vsel %vm3453_vm8, %v3051_v46, %v3053_v49 }
 0x758   :  { %583 = vrot.lane.b32.xlu1 %v563_v36, %s3298_s2  ;;  %v581_v55 = vmul.f32 %v579_v60, %v563_v36 }
 0x7c8   :  { %v570_v50 = vpop.permute.xlu0 %569 }
 0x7c9   :  { %v572_v51 = vmul.f32 %v570_v50, %v562_v47 }
 0x7ca   :  { %v584_v52 = vpop.permute.xlu1 %583 }
 0x7cb   :  { %v586_v54 = vmul.f32 %v584_v52, %v563_v36  ;;  %574 = vrot.lane.b32.xlu0 %v572_v51, %s3300_s3 }
 0x7cd   :  { %588 = vrot.lane.b32.xlu1 %v586_v54, %s3300_s3 }
 0x83d   :  { %v575_v53 = vpop.permute.xlu0 %574 }
 0x83e   :  { %v3598_v62 = vadd.f32 %v575_v53, %v567_v61 }
 0x83f   :  { %v589_v7 = vpop.permute.xlu1 %588 }
 0x840   :  { %3054 = vtanh.f32 %v3598_v62  ;;  %v3601_v8 = vadd.f32 %v589_v7, %v581_v55  ;;  %v689_v50 = vrot.slane %v3598_v62, 6 }
 0x842   :  { %3056 = vtanh.f32 %v3601_v8  ;;  %v703_v51 = vrot.slane %v3601_v8, 6 }
 0x84d   :  { %v3055_v9 = vpop.eup %3054 }
 0x84e   :  { %594 = vrot.lane.b32.xlu0 %v3055_v9, %s3298_s2 }
 0x84f   :  { %v3057_v11 = vpop.eup %3056 }
 0x850   :  { %600 = vrot.lane.b32.xlu1 %v3057_v11, %s3298_s2 }
 0x8c0   :  { %v595_v4 = vpop.permute.xlu0 %594 }
 0x8c1   :  { %v597_v5 = vmul.f32 %v595_v4, %v562_v47 }
 0x8c2   :  { %v601_v13 = vpop.permute.xlu1 %600 }
 0x8c3   :  { %v603_v14 = vmul.f32 %v601_v13, %v563_v36  ;;  %605 = vrot.lane.b32.xlu0 %v597_v5, %s3300_s3 }
 0x8c5   :  { %609 = vrot.lane.b32.xlu1 %v603_v14, %s3298_s2 }
 0x935   :  { %v606_v15 = vpop.permute.xlu0 %605 }
 0x936   :  { %614 = vst.msk [vmem:[#allocation2] sm:$0x30] %vm613_vm14, %v606_v15 }
 0x937   :  { %v610_v16 = vpop.permute.xlu1 %609 }
 0x938   :  { %v612_v17 = vsel %vm66_vm0, %v606_v15, %v610_v16  ;;  %616 = vst.msk [vmem:[#allocation2 + $0x6] sm:$0x30] %vm615_vm15, %v610_v16 }
 0x939   :  { %v617_v18 = vpack.c.bf16 %v612_v17, %v612_v17 }
 0x93b   :  { %v619_v19 = vrot.slane %v617_v18, 2  ;;  %v742_v18 = vrot.slane %v3431_v31, 6 }
 0x93d   :  { %2798 = vmatmul.mubr.msk.bf16.vlgmr.msra.gmra.mxu0 %vm367_vm11, %v619_v19 }
 0x93e   :  { %875 = vmatpush1.bf16.msra.mxu0 %v3474_v57  ;;  %898 = vmatprep.mubr.bf16.mxu0 %v3296_v2 }
 0x93f   :  { %876 = vmatprep.subr.bf16.mxu0 %v3479_v58 }
 0x942   :  { %877 = vmatpush1.bf16.msra.mxu0 %v3495_v63 }
 0x943   :  { %878 = vmatprep.subr.bf16.mxu0 %v3501_v0 }
 0x946   :  { %879 = vmatpush1.bf16.msra.mxu0 %v3506_v1 }
 0x947   :  { %880 = vmatprep.subr.bf16.mxu0 %v3512_v3 }
 0x94a   :  { %881 = vmatpush1.bf16.msra.mxu0 %v3526_v6 }
 0x94b   :  { %1118 = vmatprep.subr.bf16.mxu0 %v3469_v56 }
 0x9fd   :  { %v657_v23 = vpop.f32.mrf.mxu0 }
 0x9fe   :  { %v666_v25 = vrot.slane %v657_v23, 2 }
 0x9ff   :  { %v659_v26 = vpop.f32.mrf.mxu0 }
 0xa00   :  { %v670_v27 = vadd.f32 %v666_v25, %v3428_v28  ;;  %v667_v29 = vrot.slane %v659_v26, 2 }
 0xa01   :  { %v661_v30 = vpop.f32.mrf.mxu0 }
 0xa02   :  { %v2799_v32 = vmul.f32 -1.442695, %v670_v27  ;;  %v671_v34 = vadd.f32 %v667_v29, %v324_v20 }
 0xa03   :  { %v662_v37 = vpop.f32.mrf.mxu0 }
 0xa04   :  { %3058 = vpow2.f32 %v2799_v32  ;;  %v2800_v38 = vmul.f32 -1.442695, %v671_v34 }
 0xa06   :  { %3060 = vpow2.f32 %v2800_v38 }
 0xa07   :  { %3062 = vtanh.f32 %v670_v27 }
 0xa11   :  { %v3059_v39 = vpop.eup %3058 }
 0xa12   :  { %v678_v40 = vadd.f32 1.0, %v3059_v39 }
 0xa13   :  { %v3061_v41 = vpop.eup %3060 }
 0xa14   :  { %3064 = vrcp.f32 %v678_v40  ;;  %v679_v56 = vadd.f32 1.0, %v3061_v41  ;;  %v3063_v42 = vpop.eup %3062 }
 0xa15   :  { %3066 = vtanh.f32 %v671_v34 }
 0xa16   :  { %3068 = vrcp.f32 %v679_v56 }
 0xa21   :  { %v3065_v28 = vpop.eup %3064 }
 0xa22   :  { %v3067_v44 = vpop.eup %3066  ;;  %v686_v45 = vsel %vm3446_vm5, %v3063_v42, %v3065_v28 }
 0xa23   :  { %v3069_v35 = vpop.eup %3068  ;;  %693 = vrot.lane.b32.xlu0 %v686_v45, %s3298_s2  ;;  %v691_v52 = vmul.f32 %v689_v50, %v686_v45 }
 0xa24   :  { %v687_v20 = vsel %vm3453_vm8, %v3067_v44, %v3069_v35 }
 0xa25   :  { %707 = vrot.lane.b32.xlu1 %v687_v20, %s3298_s2  ;;  %v705_v60 = vmul.f32 %v703_v51, %v687_v20 }
 0xa95   :  { %v694_v46 = vpop.permute.xlu0 %693 }
 0xa96   :  { %v696_v47 = vmul.f32 %v694_v46, %v686_v45 }
 0xa97   :  { %v708_v49 = vpop.permute.xlu1 %707 }
 0xa98   :  { %v710_v36 = vmul.f32 %v708_v49, %v687_v20  ;;  %698 = vrot.lane.b32.xlu0 %v696_v47, %s3300_s3 }
 0xa9a   :  { %712 = vrot.lane.b32.xlu1 %v710_v36, %s3300_s3 }
 0xb0a   :  { %v699_v54 = vpop.permute.xlu0 %698 }
 0xb0b   :  { %v3634_v59 = vadd.f32 %v699_v54, %v691_v52 }
 0xb0c   :  { %v713_v61 = vpop.permute.xlu1 %712 }
 0xb0d   :  { %3070 = vtanh.f32 %v3634_v59  ;;  %v3637_v53 = vadd.f32 %v713_v61, %v705_v60 }
 0xb0f   :  { %3072 = vtanh.f32 %v3637_v53  ;;  %v824_v46 = vrot.slane %v3637_v53, 6 }
 0xb1a   :  { %v3071_v55 = vpop.eup %3070 }
 0xb1b   :  { %718 = vrot.lane.b32.xlu0 %v3071_v55, %s3298_s2 }
 0xb1c   :  { %v3073_v7 = vpop.eup %3072 }
 0xb1d   :  { %724 = vrot.lane.b32.xlu1 %v3073_v7, %s3298_s2 }
 0xb8d   :  { %v719_v62 = vpop.permute.xlu0 %718 }
 0xb8e   :  { %v721_v8 = vmul.f32 %v719_v62, %v686_v45 }
 0xb8f   :  { %v725_v9 = vpop.permute.xlu1 %724 }
 0xb90   :  { %v727_v11 = vmul.f32 %v725_v9, %v687_v20  ;;  %729 = vrot.lane.b32.xlu0 %v721_v8, %s3300_s3  ;;  %v810_v20 = vrot.slane %v3634_v59, 6 }
 0xb92   :  { %733 = vrot.lane.b32.xlu1 %v727_v11, %s3298_s2 }
 0xc02   :  { %v730_v4 = vpop.permute.xlu0 %729 }
 0xc03   :  { %738 = vst.msk [vmem:[#allocation2] sm:$0xc0] %vm737_vm1, %v730_v4 }
 0xc04   :  { %v734_v5 = vpop.permute.xlu1 %733 }
 0xc05   :  { %v736_v13 = vsel %vm66_vm0, %v730_v4, %v734_v5  ;;  %740 = vst.msk [vmem:[#allocation2 + $0x2] sm:$0xc0] %vm739_vm2, %v734_v5 }
 0xc06   :  { %v744_v14 = vpack.c.bf16 %v736_v13, %v736_v13  ;;  %v860_v13 = vrot.slane %v3431_v31, 2 }
 0xc08   :  { %v746_v15 = vrot.slane %v744_v14, 3 }
 0xc0a   :  { %2801 = vmatmul.mubr.msk.bf16.vlgmr.msra.gmra.mxu1 %vm367_vm11, %v746_v15 }
 0xc0b   :  { %997 = vmatpush1.bf16.msra.mxu1 %v3474_v57  ;;  %1020 = vmatprep.mubr.bf16.mxu1 %v3296_v2 }
 0xc0c   :  { %998 = vmatprep.subr.bf16.mxu1 %v3479_v58 }
 0xc0f   :  { %999 = vmatpush1.bf16.msra.mxu1 %v3495_v63 }
 0xc10   :  { %1000 = vmatprep.subr.bf16.mxu1 %v3501_v0 }
 0xc13   :  { %1001 = vmatpush1.bf16.msra.mxu1 %v3506_v1 }
 0xc14   :  { %1002 = vmatprep.subr.bf16.mxu1 %v3512_v3 }
 0xc17   :  { %1003 = vmatpush1.bf16.msra.mxu1 %v3526_v6 }
 0xcca   :  { %v784_v16 = vpop.f32.mrf.mxu1 }
 0xccb   :  { %v791_v17 = vadd.f32 %v784_v16, %v3433_v33 }
 0xccc   :  { %v786_v19 = vpop.f32.mrf.mxu1 }
 0xccd   :  { %v2802_v23 = vmul.f32 -1.442695, %v791_v17  ;;  %v792_v25 = vadd.f32 %v786_v19, %v742_v18 }
 0xcce   :  { %v788_v26 = vpop.f32.mrf.mxu1 }
 0xccf   :  { %3074 = vpow2.f32 %v2802_v23  ;;  %v2803_v27 = vmul.f32 -1.442695, %v792_v25 }
 0xcd0   :  { %v789_v29 = vpop.f32.mrf.mxu1 }
 0xcd1   :  { %3076 = vpow2.f32 %v2803_v27 }
 0xcd2   :  { %3078 = vtanh.f32 %v791_v17 }
 0xcdc   :  { %v3075_v30 = vpop.eup %3074 }
 0xcdd   :  { %v799_v32 = vadd.f32 1.0, %v3075_v30 }
 0xcde   :  { %v3077_v34 = vpop.eup %3076 }
 0xcdf   :  { %3080 = vrcp.f32 %v799_v32  ;;  %v800_v37 = vadd.f32 1.0, %v3077_v34  ;;  %v3079_v38 = vpop.eup %3078 }
 0xce0   :  { %3082 = vtanh.f32 %v792_v25 }
 0xce1   :  { %3084 = vrcp.f32 %v800_v37 }
 0xcec   :  { %v3081_v39 = vpop.eup %3080 }
 0xced   :  { %v3083_v40 = vpop.eup %3082  ;;  %v807_v41 = vsel %vm3446_vm5, %v3079_v38, %v3081_v39 }
 0xcee   :  { %v3085_v56 = vpop.eup %3084  ;;  %814 = vrot.lane.b32.xlu0 %v807_v41, %s3298_s2  ;;  %v812_v47 = vmul.f32 %v810_v20, %v807_v41 }
 0xcef   :  { %v808_v42 = vsel %vm3453_vm8, %v3083_v40, %v3085_v56 }
 0xcf0   :  { %828 = vrot.lane.b32.xlu1 %v808_v42, %s3298_s2  ;;  %v826_v50 = vmul.f32 %v824_v46, %v808_v42 }
 0xd60   :  { %v815_v28 = vpop.permute.xlu0 %814 }
 0xd61   :  { %v817_v44 = vmul.f32 %v815_v28, %v807_v41 }
 0xd62   :  { %v829_v45 = vpop.permute.xlu1 %828 }
 0xd63   :  { %v831_v35 = vmul.f32 %v829_v45, %v808_v42  ;;  %819 = vrot.lane.b32.xlu0 %v817_v44, %s3300_s3 }
 0xd65   :  { %833 = vrot.lane.b32.xlu1 %v831_v35, %s3300_s3 }
 0xdd5   :  { %v820_v49 = vpop.permute.xlu0 %819 }
 0xdd6   :  { %v3670_v36 = vadd.f32 %v820_v49, %v812_v47 }
 0xdd7   :  { %v834_v51 = vpop.permute.xlu1 %833 }
 0xdd8   :  { %3086 = vtanh.f32 %v3670_v36  ;;  %v3673_v52 = vadd.f32 %v834_v51, %v826_v50  ;;  %v932_v38 = vrot.slane %v3670_v36, 6 }
 0xdda   :  { %3088 = vtanh.f32 %v3673_v52  ;;  %v946_v39 = vrot.slane %v3673_v52, 6 }
 0xde5   :  { %v3087_v54 = vpop.eup %3086 }
 0xde6   :  { %839 = vrot.lane.b32.xlu0 %v3087_v54, %s3298_s2 }
 0xde7   :  { %v3089_v60 = vpop.eup %3088 }
 0xde8   :  { %845 = vrot.lane.b32.xlu1 %v3089_v60, %s3298_s2 }
 0xe58   :  { %v840_v59 = vpop.permute.xlu0 %839 }
 0xe59   :  { %v842_v61 = vmul.f32 %v840_v59, %v807_v41 }
 0xe5a   :  { %v846_v53 = vpop.permute.xlu1 %845 }
 0xe5b   :  { %v848_v55 = vmul.f32 %v846_v53, %v808_v42  ;;  %850 = vrot.lane.b32.xlu0 %v842_v61, %s3300_s3 }
 0xe5d   :  { %854 = vrot.lane.b32.xlu1 %v848_v55, %s3298_s2 }
 0xecd   :  { %v851_v7 = vpop.permute.xlu0 %850 }
 0xece   :  { %858 = vst.msk [vmem:[#allocation2 + $0x8] sm:$0x3] %vm320_vm9, %v851_v7 }
 0xecf   :  { %v855_v62 = vpop.permute.xlu1 %854 }
 0xed0   :  { %v857_v8 = vsel %vm66_vm0, %v851_v7, %v855_v62  ;;  %859 = vst.msk [vmem:[#allocation2 + $0x6] sm:$0x3] %vm322_vm10, %v855_v62 }
 0xed1   :  { %v862_v9 = vpack.c.bf16 %v857_v8, %v857_v8 }
 0xed3   :  { %2804 = vmatmul.mubr.msk.bf16.vlgmr.msra.gmra.mxu0 %vm367_vm11, %v862_v9 }
 0xed4   :  { %1119 = vmatpush1.bf16.msra.mxu0 %v3474_v57  ;;  %1142 = vmatprep.mubr.bf16.mxu0 %v3296_v2 }
 0xed5   :  { %1120 = vmatprep.subr.bf16.mxu0 %v3479_v58 }
 0xed8   :  { %1121 = vmatpush1.bf16.msra.mxu0 %v3495_v63 }
 0xed9   :  { %1122 = vmatprep.subr.bf16.mxu0 %v3501_v0 }
 0xedc   :  { %1123 = vmatpush1.bf16.msra.mxu0 %v3506_v1 }
 0xedd   :  { %1124 = vmatprep.subr.bf16.mxu0 %v3512_v3 }
 0xee0   :  { %1125 = vmatpush1.bf16.msra.mxu0 %v3526_v6 }
 0xf93   :  { %v900_v11 = vpop.f32.mrf.mxu0 }
 0xf94   :  { %v909_v4 = vrot.slane %v900_v11, 6 }
 0xf95   :  { %v902_v5 = vpop.f32.mrf.mxu0 }
 0xf96   :  { %v913_v57 = vadd.f32 %v909_v4, %v3433_v33  ;;  %v910_v14 = vrot.slane %v902_v5, 6 }
 0xf97   :  { %v904_v15 = vpop.f32.mrf.mxu0 }
 0xf98   :  { %v2805_v58 = vmul.f32 -1.442695, %v913_v57  ;;  %v914_v63 = vadd.f32 %v910_v14, %v860_v13 }
 0xf99   :  { %v905_v0 = vpop.f32.mrf.mxu0 }
 0xf9a   :  { %3090 = vpow2.f32 %v2805_v58  ;;  %v2806_v1 = vmul.f32 -1.442695, %v914_v63 }
 0xf9c   :  { %3092 = vpow2.f32 %v2806_v1 }
 0xf9d   :  { %3094 = vtanh.f32 %v913_v57 }
 0xfa7   :  { %v3091_v3 = vpop.eup %3090 }
 0xfa8   :  { %v921_v16 = vadd.f32 1.0, %v3091_v3 }
 0xfa9   :  { %v3093_v6 = vpop.eup %3092 }
 0xfaa   :  { %3096 = vrcp.f32 %v921_v16  ;;  %v922_v17 = vadd.f32 1.0, %v3093_v6  ;;  %v3095_v19 = vpop.eup %3094 }
 0xfab   :  { %3098 = vtanh.f32 %v914_v63 }
 0xfac   :  { %3100 = vrcp.f32 %v922_v17 }
 0xfb7   :  { %v3097_v23 = vpop.eup %3096 }
 0xfb8   :  { %v3099_v25 = vpop.eup %3098  ;;  %v929_v26 = vsel %vm3446_vm5, %v3095_v19, %v3097_v23 }
 0xfb9   :  { %v3101_v27 = vpop.eup %3100  ;;  %936 = vrot.lane.b32.xlu0 %v929_v26, %s3298_s2  ;;  %v934_v40 = vmul.f32 %v932_v38, %v929_v26 }
 0xfba   :  { %v930_v29 = vsel %vm3453_vm8, %v3099_v25, %v3101_v27 }
 0xfbb   :  { %950 = vrot.lane.b32.xlu1 %v930_v29, %s3298_s2  ;;  %v948_v42 = vmul.f32 %v946_v39, %v930_v29 }
0x102b   :  { %v937_v30 = vpop.permute.xlu0 %936 }
0x102c   :  { %v939_v32 = vmul.f32 %v937_v30, %v929_v26 }
0x102d   :  { %v951_v34 = vpop.permute.xlu1 %950 }
0x102e   :  { %v953_v37 = vmul.f32 %v951_v34, %v930_v29  ;;  %941 = vrot.lane.b32.xlu0 %v939_v32, %s3300_s3 }
0x1030   :  { %955 = vrot.lane.b32.xlu1 %v953_v37, %s3300_s3 }
0x10a0   :  { %v942_v41 = vpop.permute.xlu0 %941 }
0x10a1   :  { %v944_v56 = vadd.f32 %v942_v41, %v934_v40 }
0x10a2   :  { %v956_v28 = vpop.permute.xlu1 %955 }
0x10a3   :  { %3102 = vtanh.f32 %v944_v56  ;;  %v958_v44 = vadd.f32 %v956_v28, %v948_v42  ;;  %v1054_v19 = vrot.slane %v944_v56, 6 }
0x10a5   :  { %3104 = vtanh.f32 %v958_v44  ;;  %v1068_v23 = vrot.slane %v958_v44, 6 }
0x10b0   :  { %v3103_v45 = vpop.eup %3102 }
0x10b1   :  { %961 = vrot.lane.b32.xlu0 %v3103_v45, %s3298_s2 }
0x10b2   :  { %v3105_v35 = vpop.eup %3104 }
0x10b3   :  { %967 = vrot.lane.b32.xlu1 %v3105_v35, %s3298_s2 }
0x1123   :  { %v962_v20 = vpop.permute.xlu0 %961 }
0x1124   :  { %v964_v46 = vmul.f32 %v962_v20, %v929_v26 }
0x1125   :  { %v968_v47 = vpop.permute.xlu1 %967 }
0x1126   :  { %v970_v49 = vmul.f32 %v968_v47, %v930_v29  ;;  %972 = vrot.lane.b32.xlu0 %v964_v46, %s3300_s3 }
0x1128   :  { %976 = vrot.lane.b32.xlu1 %v970_v49, %s3298_s2 }
0x1198   :  { %v973_v36 = vpop.permute.xlu0 %972 }
0x1199   :  { %980 = vst.msk [vmem:[#allocation2 + $0x8] sm:$0xc] %vm489_vm12, %v973_v36 }
0x119a   :  { %v977_v50 = vpop.permute.xlu1 %976 }
0x119b   :  { %v979_v51 = vsel %vm66_vm0, %v973_v36, %v977_v50  ;;  %981 = vst.msk [vmem:[#allocation2 + $0x2] sm:$0xc] %vm491_vm13, %v977_v50 }
0x119c   :  { %v982_v52 = vpack.c.bf16 %v979_v51, %v979_v51 }
0x119e   :  { %v984_v54 = vrot.slane %v982_v52, 1 }
0x11a0   :  { %2807 = vmatmul.mubr.msk.bf16.vlgmr.msra.gmra.mxu1 %vm367_vm11, %v984_v54 }
0x11a1   :  { %1323 = vmatprep.mubr.bf16.mxu1 %v3296_v2 }
0x1260   :  { %v1022_v60 = vpop.f32.mrf.mxu1 }
0x1261   :  { %v1031_v59 = vrot.slane %v1022_v60, 4 }
0x1262   :  { %v1024_v61 = vpop.f32.mrf.mxu1 }
0x1263   :  { %v1035_v53 = vadd.f32 %v1031_v59, %v3433_v33  ;;  %v1032_v55 = vrot.slane %v1024_v61, 4 }
0x1264   :  { %v1026_v7 = vpop.f32.mrf.mxu1 }
0x1265   :  { %v2808_v62 = vmul.f32 -1.442695, %v1035_v53  ;;  %v1036_v8 = vadd.f32 %v1032_v55, %v742_v18 }
0x1266   :  { %v1027_v9 = vpop.f32.mrf.mxu1 }
0x1267   :  { %3106 = vpow2.f32 %v2808_v62  ;;  %v2809_v11 = vmul.f32 -1.442695, %v1036_v8 }
0x1269   :  { %3108 = vpow2.f32 %v2809_v11 }
0x126a   :  { %3110 = vtanh.f32 %v1035_v53 }
0x1274   :  { %v3107_v4 = vpop.eup %3106 }
0x1275   :  { %v1043_v5 = vadd.f32 1.0, %v3107_v4 }
0x1276   :  { %v3109_v57 = vpop.eup %3108 }
0x1277   :  { %3112 = vrcp.f32 %v1043_v5  ;;  %v1044_v14 = vadd.f32 1.0, %v3109_v57  ;;  %v3111_v15 = vpop.eup %3110 }
0x1278   :  { %3114 = vtanh.f32 %v1036_v8 }
0x1279   :  { %3116 = vrcp.f32 %v1044_v14 }
0x1284   :  { %v3113_v58 = vpop.eup %3112 }
0x1285   :  { %v3115_v63 = vpop.eup %3114  ;;  %v1051_v0 = vsel %vm3446_vm5, %v3111_v15, %v3113_v58 }
0x1286   :  { %v3117_v1 = vpop.eup %3116  ;;  %1058 = vrot.lane.b32.xlu0 %v1051_v0, %s3298_s2  ;;  %v1056_v25 = vmul.f32 %v1054_v19, %v1051_v0  ;;  %v2991_v19 = vld [vmem:[%s4219_s5 + $0x20] ss:$8 sps:$4 sm:$0xff]  }
0x1287   :  { %v1052_v18 = vsel %vm3453_vm8, %v3115_v63, %v3117_v1 }
0x1288   :  { %1072 = vrot.lane.b32.xlu1 %v1052_v18, %s3298_s2  ;;  %v1070_v29 = vmul.f32 %v1068_v23, %v1052_v18  ;;  %v2994_v23 = vld [vmem:[%s4219_s5 + $0x10] ss:$8 sps:$4 sm:$0xff]  }
0x12f8   :  { %v1059_v3 = vpop.permute.xlu0 %1058 }
0x12f9   :  { %v1061_v16 = vmul.f32 %v1059_v3, %v1051_v0  ;;  %v2990_v3 = vld [vmem:[%s4219_s5 + $0x34] ss:$8 sps:$4 sm:$0xff]  }
0x12fa   :  { %v1073_v6 = vpop.permute.xlu1 %1072  ;;  %1299 = vmatprep.subr.bf16.mxu1 %v2990_v3  ;;  %v1335_v3 = vld [vmem:[%s4220_s6 + $0x8] sm:$0xff] }
0x12fb   :  { %v1075_v17 = vmul.f32 %v1073_v6, %v1052_v18  ;;  %1063 = vrot.lane.b32.xlu0 %v1061_v16, %s3300_s3 }
0x12fd   :  { %1077 = vrot.lane.b32.xlu1 %v1075_v17, %s3300_s3  ;;  %v2993_v17 = vld [vmem:[%s4219_s5 + $0x24] ss:$8 sps:$4 sm:$0xff]  }
0x136d   :  { %v1064_v26 = vpop.permute.xlu0 %1063 }
0x136e   :  { %v1066_v27 = vadd.f32 %v1064_v26, %v1056_v25  ;;  %v2996_v25 = vld [vmem:[%s4219_s5 + $0x14] ss:$8 sps:$4 sm:$0xff]   ;;  %v2999_v26 = vld [vmem:[%s4219_s5 + $0x4] ss:$8 sps:$4 sm:$0xff]  }
0x136f   :  { %v1078_v30 = vpop.permute.xlu1 %1077 }
0x1370   :  { %3118 = vtanh.f32 %v1066_v27  ;;  %v1080_v32 = vadd.f32 %v1078_v30, %v1070_v29  ;;  %v1176_v5 = vrot.slane %v1066_v27, 6  ;;  %v2997_v27 = vld [vmem:[%s4219_s5] ss:$8 sps:$4 sm:$0xff]  }
0x1372   :  { %3120 = vtanh.f32 %v1080_v32  ;;  %v1190_v57 = vrot.slane %v1080_v32, 6 }
0x137d   :  { %v3119_v34 = vpop.eup %3118 }
0x137e   :  { %1083 = vrot.lane.b32.xlu0 %v3119_v34, %s3298_s2 }
0x137f   :  { %v3121_v37 = vpop.eup %3120 }
0x1380   :  { %1089 = vrot.lane.b32.xlu1 %v3121_v37, %s3298_s2 }
0x13f0   :  { %v1084_v38 = vpop.permute.xlu0 %1083 }
0x13f1   :  { %v1086_v39 = vmul.f32 %v1084_v38, %v1051_v0 }
0x13f2   :  { %v1090_v40 = vpop.permute.xlu1 %1089 }
0x13f3   :  { %v1092_v41 = vmul.f32 %v1090_v40, %v1052_v18  ;;  %1094 = vrot.lane.b32.xlu0 %v1086_v39, %s3300_s3  ;;  %v2988_v18 = vld [vmem:[%s4219_s5 + $0x30] ss:$8 sps:$4 sm:$0xff]  }
0x13f4   :  { %1300 = vmatpush1.bf16.msra.mxu1 %v2988_v18  ;;  %v1334_v18 = vld [vmem:[%s4220_s6] sm:$0xff] }
0x13f5   :  { %1098 = vrot.lane.b32.xlu1 %v1092_v41, %s3298_s2  ;;  %1301 = vmatprep.subr.bf16.mxu1 %v2993_v17 }
0x13f8   :  { %1302 = vmatpush1.bf16.msra.mxu1 %v2991_v19 }
0x13f9   :  { %1303 = vmatprep.subr.bf16.mxu1 %v2996_v25 }
0x13fc   :  { %1304 = vmatpush1.bf16.msra.mxu1 %v2994_v23 }
0x13fd   :  { %1305 = vmatprep.subr.bf16.mxu1 %v2999_v26 }
0x1400   :  { %1306 = vmatpush1.bf16.msra.mxu1 %v2997_v27 }
0x1465   :  { %v1095_v56 = vpop.permute.xlu0 %1094 }
0x1466   :  { %1102 = vst.msk [vmem:[#allocation2 + $0x8] sm:$0x30] %vm613_vm14, %v1095_v56 }
0x1467   :  { %v1099_v42 = vpop.permute.xlu1 %1098 }
0x1468   :  { %v1101_v28 = vsel %vm66_vm0, %v1095_v56, %v1099_v42  ;;  %1103 = vst.msk [vmem:[#allocation2 - $0x2] sm:$0x30] %vm615_vm15, %v1099_v42  ;;  %v1236_v56 = vld [vmem:[%s4221_s7] sm:$0x3] }
0x1469   :  { %v1104_v44 = vpack.c.bf16 %v1101_v28, %v1101_v28  ;;  %v1241_v42 = vrot.slane %v1236_v56, %v188_v22  ;;  %v1245_v28 = vrot.slane %v1236_v56, %v192_v24 }
0x146b   :  { %v1106_v45 = vrot.slane %v1104_v44, 2 }
0x146d   :  { %2810 = vmatmul.mubr.msk.bf16.vlgmr.msra.gmra.mxu0 %vm367_vm11, %v1106_v45 }
0x146e   :  { %1472 = vmatprep.mubr.bf16.mxu0 %v3296_v2 }
0x152d   :  { %v1144_v35 = vpop.f32.mrf.mxu0 }
0x152e   :  { %v1153_v20 = vrot.slane %v1144_v35, 2 }
0x152f   :  { %v1146_v46 = vpop.f32.mrf.mxu0 }
0x1530   :  { %v1157_v47 = vadd.f32 %v1153_v20, %v3433_v33  ;;  %v1154_v49 = vrot.slane %v1146_v46, 2 }
0x1531   :  { %v1148_v36 = vpop.f32.mrf.mxu0 }
0x1532   :  { %v2811_v50 = vmul.f32 -1.442695, %v1157_v47  ;;  %v1158_v51 = vadd.f32 %v1154_v49, %v860_v13 }
0x1533   :  { %v1149_v52 = vpop.f32.mrf.mxu0 }
0x1534   :  { %3122 = vpow2.f32 %v2811_v50  ;;  %v2812_v54 = vmul.f32 -1.442695, %v1158_v51 }
0x1536   :  { %3124 = vpow2.f32 %v2812_v54 }
0x1537   :  { %3126 = vtanh.f32 %v1157_v47 }
0x1541   :  { %v3123_v60 = vpop.eup %3122 }
0x1542   :  { %v1165_v59 = vadd.f32 1.0, %v3123_v60 }
0x1543   :  { %v3125_v61 = vpop.eup %3124 }
0x1544   :  { %3128 = vrcp.f32 %v1165_v59  ;;  %v1166_v53 = vadd.f32 1.0, %v3125_v61  ;;  %v3127_v55 = vpop.eup %3126 }
0x1545   :  { %3130 = vtanh.f32 %v1158_v51 }
0x1546   :  { %3132 = vrcp.f32 %v1166_v53 }
0x1551   :  { %v3129_v33 = vpop.eup %3128 }
0x1552   :  { %v3131_v7 = vpop.eup %3130  ;;  %v1173_v62 = vsel %vm3446_vm5, %v3127_v55, %v3129_v33 }
0x1553   :  { %v3133_v31 = vpop.eup %3132  ;;  %1180 = vrot.lane.b32.xlu0 %v1173_v62, %s3298_s2  ;;  %v1178_v14 = vmul.f32 %v1176_v5, %v1173_v62 }
0x1554   :  { %v1174_v13 = vsel %vm3453_vm8, %v3131_v7, %v3133_v31 }
0x1555   :  { %1194 = vrot.lane.b32.xlu1 %v1174_v13, %s3298_s2  ;;  %v1192_v63 = vmul.f32 %v1190_v57, %v1174_v13 }
0x15c5   :  { %v1181_v8 = vpop.permute.xlu0 %1180 }
0x15c6   :  { %v1183_v9 = vmul.f32 %v1181_v8, %v1173_v62 }
0x15c7   :  { %v1195_v11 = vpop.permute.xlu1 %1194 }
0x15c8   :  { %v1197_v4 = vmul.f32 %v1195_v11, %v1174_v13  ;;  %1185 = vrot.lane.b32.xlu0 %v1183_v9, %s3300_s3  ;;  %v3815_v9 = vld [vmem:[%s4220_s6 + $0x34] ss:$8 sps:$4 sm:$0xff]   ;;  %v3820_v11 = vld [vmem:[%s4220_s6 + $0x30] ss:$8 sps:$4 sm:$0xff]  }
0x15c9   :  { %1448 = vmatprep.subr.bf16.mxu0 %v3815_v9  ;;  %1574 = vmatprep.subr.bf16.mxu1 %v3815_v9 }
0x15ca   :  { %1199 = vrot.lane.b32.xlu1 %v1197_v4, %s3300_s3  ;;  %v3825_v4 = vld [vmem:[%s4220_s6 + $0x24] ss:$8 sps:$4 sm:$0xff]   ;;  %1449 = vmatpush1.bf16.msra.mxu0 %v3820_v11 }
0x15cb   :  { %1450 = vmatprep.subr.bf16.mxu0 %v3825_v4 }
0x163a   :  { %v1186_v15 = vpop.permute.xlu0 %1185 }
0x163b   :  { %v1188_v58 = vadd.f32 %v1186_v15, %v1178_v14  ;;  %v1338_v14 = vld [vmem:[%s4220_s6 + $0x20] sm:$0xff]  ;;  %v1339_v15 = vld [vmem:[%s4220_s6 + $0x28] sm:$0xff] }
0x163c   :  { %v1200_v0 = vpop.permute.xlu1 %1199 }
0x163d   :  { %3134 = vtanh.f32 %v1188_v58  ;;  %v1202_v1 = vadd.f32 %v1200_v0, %v1192_v63  ;;  %v3841_v58 = vcombine.low %v1338_v14, %v1339_v15  ;;  %v3846_v63 = vld [vmem:[%s4220_s6 + $0x14] ss:$8 sps:$4 sm:$0xff]   ;;  %v3852_v0 = vld [vmem:[%s4220_s6 + $0x10] ss:$8 sps:$4 sm:$0xff]  }
0x163f   :  { %3136 = vtanh.f32 %v1202_v1  ;;  %1451 = vmatpush1.bf16.msra.mxu0 %v3841_v58  ;;  %v3859_v1 = vld [vmem:[%s4220_s6 + $0x4] ss:$8 sps:$4 sm:$0xff]  }
0x1640   :  { %1452 = vmatprep.subr.bf16.mxu0 %v3846_v63 }
0x1643   :  { %1453 = vmatpush1.bf16.msra.mxu0 %v3852_v0 }
0x1644   :  { %1454 = vmatprep.subr.bf16.mxu0 %v3859_v1 }
0x164a   :  { %v3135_v16 = vpop.eup %3134 }
0x164b   :  { %1205 = vrot.lane.b32.xlu0 %v3135_v16, %s3298_s2  ;;  %v3872_v16 = vcombine.low %v1334_v18, %v1335_v3 }
0x164c   :  { %v3137_v6 = vpop.eup %3136 }
0x164d   :  { %1211 = vrot.lane.b32.xlu1 %v3137_v6, %s3298_s2  ;;  %1455 = vmatpush1.bf16.msra.mxu0 %v3872_v16 }
0x164e   :  { %1696 = vmatprep.subr.bf16.mxu0 %v3815_v9 }
0x16bd   :  { %v1206_v29 = vpop.permute.xlu0 %1205 }
0x16be   :  { %v1208_v30 = vmul.f32 %v1206_v29, %v1173_v62 }
0x16bf   :  { %v1212_v32 = vpop.permute.xlu1 %1211 }
0x16c0   :  { %v1214_v34 = vmul.f32 %v1212_v32, %v1174_v13  ;;  %1216 = vrot.lane.b32.xlu0 %v1208_v30, %s3300_s3 }
0x16c2   :  { %1221 = vrot.lane.b32.xlu1 %v1214_v34, %s3298_s2 }
0x1732   :  { %v1217_v37 = vpop.permute.xlu0 %1216 }
0x1733   :  { %1219 = vst.msk [vmem:[#allocation2 + $0x8] sm:$0xc0] %vm737_vm1, %v1217_v37 }
0x1734   :  { %v1222_v38 = vpop.permute.xlu1 %1221 }
0x1735   :  { %1224 = vst.msk [vmem:[#allocation2 - $0x6] sm:$0xc0] %vm739_vm2, %v1222_v38 }
0x173a   :  { %v1226_v40 = vld [vmem:[#allocation2 + $0x8] sm:$0xff] }
0x173c   :  { %v1225_v39 = vld [vmem:[#allocation2] sm:$0xff] }
0x173d   :  { %v1227_v41 = vpack.c.bf16 %v1226_v40, %v1225_v39 }
0x173f   :  { %2821 = vmatmul.mubr.msk.bf16.vlgmr.msra.gmra.mxu1 %vm367_vm11, %v1227_v41 }
0x1740   :  { %1598 = vmatprep.mubr.bf16.mxu1 %v3296_v2  ;;  %1575 = vmatpush1.bf16.msra.mxu1 %v3820_v11 }
0x1741   :  { %1576 = vmatprep.subr.bf16.mxu1 %v3825_v4 }
0x1744   :  { %1577 = vmatpush1.bf16.msra.mxu1 %v3841_v58 }
0x1745   :  { %1578 = vmatprep.subr.bf16.mxu1 %v3846_v63 }
0x1748   :  { %1579 = vmatpush1.bf16.msra.mxu1 %v3852_v0 }
0x1749   :  { %1580 = vmatprep.subr.bf16.mxu1 %v3859_v1 }
0x174c   :  { %1581 = vmatpush1.bf16.msra.mxu1 %v3872_v16 }
0x174d   :  { %1821 = vmatprep.subr.bf16.mxu1 %v3815_v9 }
0x17ff   :  { %v1325_v44 = vpop.f32.mrf.mxu1 }
0x1800   :  { %v3785_v45 = vadd.f32 %v1325_v44, %v1241_v42 }
0x1801   :  { %v1327_v35 = vpop.f32.mrf.mxu1 }
0x1802   :  { %v2822_v20 = vmul.f32 -1.442695, %v3785_v45  ;;  %v3788_v46 = vadd.f32 %v1327_v35, %v1245_v28 }
0x1803   :  { %v1329_v47 = vpop.f32.mrf.mxu1 }
0x1804   :  { %3138 = vpow2.f32 %v2822_v20  ;;  %v3790_v49 = vadd.f32 %v1329_v47, %v1241_v42 }
0x1805   :  { %v1331_v36 = vpop.f32.mrf.mxu1 }
0x1806   :  { %v3792_v50 = vadd.f32 %v1331_v36, %v1245_v28 }
0x1808   :  { %v3795_v22 = vrot.slane %v3792_v50, 6  ;;  %v1394_v37 = vrot.slane %v3792_v50, 2 }
0x180a   :  { %v2823_v24 = vmul.f32 -1.442695, %v3795_v22 }
0x180c   :  { %3140 = vpow2.f32 %v2823_v24 }
0x180d   :  { %3142 = vtanh.f32 %v3785_v45 }
0x1811   :  { %v3139_v51 = vpop.eup %3138 }
0x1812   :  { %v1351_v52 = vadd.f32 1.0, %v3139_v51 }
0x1814   :  { %3144 = vrcp.f32 %v1351_v52 }
0x1815   :  { %3146 = vtanh.f32 %v3795_v22 }
0x1819   :  { %v3141_v54 = vpop.eup %3140 }
0x181a   :  { %v1352_v60 = vadd.f32 1.0, %v3141_v54  ;;  %v3143_v59 = vpop.eup %3142 }
0x181c   :  { %3148 = vrcp.f32 %v1352_v60 }
0x1821   :  { %v3145_v61 = vpop.eup %3144 }
0x1822   :  { %v1359_v53 = vsel %vm3446_vm5, %v3143_v59, %v3145_v61  ;;  %v3147_v55 = vpop.eup %3146 }
0x1823   :  { %1362 = vrot.lane.b32.xlu0 %v1359_v53, %s3298_s2 }
0x1829   :  { %v3149_v33 = vpop.eup %3148 }
0x182a   :  { %v1360_v7 = vsel %vm3453_vm8, %v3147_v55, %v3149_v33 }
0x182b   :  { %1367 = vrot.lane.b32.xlu1 %v1360_v7, %s3298_s2 }
0x1895   :  { %v1363_v62 = vpop.permute.xlu0 %1362 }
0x1896   :  { %v3806_v31 = vmul.f32 %v1363_v62, %v1359_v53 }
0x1898   :  { %3150 = vtanh.f32 %v3806_v31  ;;  %v1506_v59 = vrot.slane %v3806_v31, 6 }
0x189d   :  { %v1368_v13 = vpop.permute.xlu1 %1367 }
0x189e   :  { %v3809_v8 = vmul.f32 %v1368_v13, %v1360_v7 }
0x18a0   :  { %3152 = vtanh.f32 %v3809_v8  ;;  %v1522_v61 = vrot.slane %v3809_v8, 6 }
0x18a5   :  { %v3151_v5 = vpop.eup %3150 }
0x18a6   :  { %1373 = vrot.lane.b32.xlu0 %v3151_v5, %s3299_s16 }
0x18ad   :  { %v3153_v57 = vpop.eup %3152 }
0x18ae   :  { %1379 = vrot.lane.b32.xlu1 %v3153_v57, %s3299_s16 }
0x1918   :  { %v1374_v6 = vpop.permute.xlu0 %1373 }
0x1919   :  { %v1376_v17 = vmul.f32 %v1374_v6, %v1359_v53 }
0x191b   :  { %1384 = vrot.lane.b32.xlu0 %v1376_v17, %s3300_s3 }
0x1920   :  { %v1380_v19 = vpop.permute.xlu1 %1379 }
0x1921   :  { %v1382_v23 = vmul.f32 %v1380_v19, %v1360_v7 }
0x1923   :  { %1388 = vrot.lane.b32.xlu1 %v1382_v23, %s3298_s2 }
0x198d   :  { %v1385_v25 = vpop.permute.xlu0 %1384 }
0x198e   :  { %1392 = vst.msk [vmem:[#allocation3] sm:$0x3] %vm320_vm9, %v1385_v25 }
0x1995   :  { %v1389_v26 = vpop.permute.xlu1 %1388 }
0x1996   :  { %v1391_v27 = vsel %vm66_vm0, %v1385_v25, %v1389_v26  ;;  %1393 = vst.msk [vmem:[#allocation3 + $0xe] sm:$0x3] %vm322_vm10, %v1389_v26 }
0x1997   :  { %v1396_v29 = vpack.c.bf16 %v1391_v27, %v1391_v27 }
0x1999   :  { %2832 = vmatmul.mubr.msk.bf16.vlgmr.msra.gmra.mxu0 %vm367_vm11, %v1396_v29 }
0x199a   :  { %1697 = vmatpush1.bf16.msra.mxu0 %v3820_v11  ;;  %1720 = vmatprep.mubr.bf16.mxu0 %v3296_v2 }
0x199b   :  { %1698 = vmatprep.subr.bf16.mxu0 %v3825_v4 }
0x199e   :  { %1699 = vmatpush1.bf16.msra.mxu0 %v3841_v58 }
0x199f   :  { %1700 = vmatprep.subr.bf16.mxu0 %v3846_v63 }
0x19a2   :  { %1701 = vmatpush1.bf16.msra.mxu0 %v3852_v0 }
0x19a3   :  { %1702 = vmatprep.subr.bf16.mxu0 %v3859_v1 }
0x19a6   :  { %1703 = vmatpush1.bf16.msra.mxu0 %v3872_v16 }
0x19a7   :  { %1937 = vmatprep.subr.bf16.mxu0 %v3815_v9 }
0x1a59   :  { %v1474_v30 = vpop.f32.mrf.mxu0 }
0x1a5a   :  { %v1483_v32 = vrot.slane %v1474_v30, 6 }
0x1a5b   :  { %v1476_v34 = vpop.f32.mrf.mxu0 }
0x1a5c   :  { %v1487_v38 = vadd.f32 %v1483_v32, %v3785_v45  ;;  %v1484_v39 = vrot.slane %v1476_v34, 6 }
0x1a5d   :  { %v1478_v40 = vpop.f32.mrf.mxu0 }
0x1a5e   :  { %v2833_v41 = vmul.f32 -1.442695, %v1487_v38  ;;  %v1488_v56 = vadd.f32 %v1484_v39, %v1394_v37 }
0x1a5f   :  { %v1479_v42 = vpop.f32.mrf.mxu0 }
0x1a60   :  { %3154 = vpow2.f32 %v2833_v41  ;;  %v2834_v28 = vmul.f32 -1.442695, %v1488_v56 }
0x1a62   :  { %3156 = vpow2.f32 %v2834_v28 }
0x1a63   :  { %3158 = vtanh.f32 %v1487_v38 }
0x1a6d   :  { %v3155_v44 = vpop.eup %3154 }
0x1a6e   :  { %v1495_v35 = vadd.f32 1.0, %v3155_v44 }
0x1a6f   :  { %v3157_v20 = vpop.eup %3156 }
0x1a70   :  { %3160 = vrcp.f32 %v1495_v35  ;;  %v1496_v47 = vadd.f32 1.0, %v3157_v20  ;;  %v3159_v36 = vpop.eup %3158 }
0x1a71   :  { %3162 = vtanh.f32 %v1488_v56 }
0x1a72   :  { %3164 = vrcp.f32 %v1496_v47 }
0x1a7d   :  { %v3161_v24 = vpop.eup %3160 }
0x1a7e   :  { %v3163_v51 = vpop.eup %3162  ;;  %v1503_v52 = vsel %vm3446_vm5, %v3159_v36, %v3161_v24 }
0x1a7f   :  { %v3165_v54 = vpop.eup %3164  ;;  %1512 = vrot.lane.b32.xlu0 %v1503_v52, %s3298_s2 }
0x1a80   :  { %v1504_v60 = vsel %vm3453_vm8, %v3163_v51, %v3165_v54 }
0x1a81   :  { %1528 = vrot.lane.b32.xlu1 %v1504_v60, %s3298_s2 }
0x1a83   :  { %1507 = vrot.lane.b32.xlu0 %v1506_v59, %s3300_s3 }
0x1a85   :  { %1523 = vrot.lane.b32.xlu1 %v1522_v61, %s3300_s3 }
0x1af1   :  { %v1513_v53 = vpop.permute.xlu0 %1512 }
0x1af2   :  { %v1515_v55 = vmul.f32 %v1513_v53, %v1503_v52 }
0x1af3   :  { %v1529_v33 = vpop.permute.xlu1 %1528 }
0x1af4   :  { %v1531_v7 = vmul.f32 %v1529_v33, %v1504_v60  ;;  %1517 = vrot.lane.b32.xlu0 %v1515_v55, %s3300_s3 }
0x1af5   :  { %v1508_v62 = vpop.permute.xlu0 %1507 }
0x1af6   :  { %1533 = vrot.lane.b32.xlu1 %v1531_v7, %s3300_s3  ;;  %v1510_v5 = vmul.f32 %v1508_v62, %v1503_v52 }
0x1af7   :  { %v1524_v13 = vpop.permute.xlu1 %1523 }
0x1af8   :  { %v1526_v57 = vmul.f32 %v1524_v13, %v1504_v60 }
0x1b66   :  { %v1518_v31 = vpop.permute.xlu0 %1517 }
0x1b67   :  { %v3909_v14 = vadd.f32 %v1518_v31, %v1510_v5 }
0x1b68   :  { %v1534_v8 = vpop.permute.xlu1 %1533 }
0x1b69   :  { %3166 = vtanh.f32 %v3909_v14  ;;  %v3912_v15 = vadd.f32 %v1534_v8, %v1526_v57  ;;  %v1632_v33 = vrot.slane %v3909_v14, 6 }
0x1b6b   :  { %3168 = vtanh.f32 %v3912_v15  ;;  %v1646_v7 = vrot.slane %v3912_v15, 6 }
0x1b76   :  { %v3167_v18 = vpop.eup %3166 }
0x1b77   :  { %1539 = vrot.lane.b32.xlu0 %v3167_v18, %s3298_s2 }
0x1b78   :  { %v3169_v3 = vpop.eup %3168 }
0x1b79   :  { %1545 = vrot.lane.b32.xlu1 %v3169_v3, %s3298_s2 }
0x1be9   :  { %v1540_v6 = vpop.permute.xlu0 %1539 }
0x1bea   :  { %v1542_v17 = vmul.f32 %v1540_v6, %v1503_v52 }
0x1beb   :  { %v1546_v19 = vpop.permute.xlu1 %1545 }
0x1bec   :  { %v1548_v23 = vmul.f32 %v1546_v19, %v1504_v60  ;;  %1550 = vrot.lane.b32.xlu0 %v1542_v17, %s3300_s3 }
0x1bee   :  { %1554 = vrot.lane.b32.xlu1 %v1548_v23, %s3298_s2 }
0x1c5e   :  { %v1551_v25 = vpop.permute.xlu0 %1550 }
0x1c5f   :  { %1558 = vst.msk [vmem:[#allocation3] sm:$0xc] %vm489_vm12, %v1551_v25 }
0x1c60   :  { %v1555_v26 = vpop.permute.xlu1 %1554 }
0x1c61   :  { %v1557_v27 = vsel %vm66_vm0, %v1551_v25, %v1555_v26  ;;  %1559 = vst.msk [vmem:[#allocation3 + $0xa] sm:$0xc] %vm491_vm13, %v1555_v26 }
0x1c62   :  { %v1560_v29 = vpack.c.bf16 %v1557_v27, %v1557_v27 }
0x1c64   :  { %v1562_v30 = vrot.slane %v1560_v29, 1 }
0x1c66   :  { %2835 = vmatmul.mubr.msk.bf16.vlgmr.msra.gmra.mxu1 %vm367_vm11, %v1562_v30 }
0x1c67   :  { %1822 = vmatpush1.bf16.msra.mxu1 %v3820_v11  ;;  %1845 = vmatprep.mubr.bf16.mxu1 %v3296_v2 }
0x1c68   :  { %1823 = vmatprep.subr.bf16.mxu1 %v3825_v4 }
0x1c6b   :  { %1824 = vmatpush1.bf16.msra.mxu1 %v3841_v58 }
0x1c6c   :  { %1825 = vmatprep.subr.bf16.mxu1 %v3846_v63 }
0x1c6f   :  { %1826 = vmatpush1.bf16.msra.mxu1 %v3852_v0 }
0x1c70   :  { %1827 = vmatprep.subr.bf16.mxu1 %v3859_v1 }
0x1c73   :  { %1828 = vmatpush1.bf16.msra.mxu1 %v3872_v16 }
0x1c74   :  { %2059 = vmatprep.subr.bf16.mxu1 %v3815_v9 }
0x1d26   :  { %v1600_v32 = vpop.f32.mrf.mxu1 }
0x1d27   :  { %v1609_v34 = vrot.slane %v1600_v32, 4 }
0x1d28   :  { %v1602_v38 = vpop.f32.mrf.mxu1 }
0x1d29   :  { %v1613_v39 = vadd.f32 %v1609_v34, %v3785_v45  ;;  %v1610_v40 = vrot.slane %v1602_v38, 4 }
0x1d2a   :  { %v1604_v41 = vpop.f32.mrf.mxu1 }
0x1d2b   :  { %v2836_v56 = vmul.f32 -1.442695, %v1613_v39  ;;  %v1614_v42 = vadd.f32 %v1610_v40, %v3795_v22 }
0x1d2c   :  { %v1605_v28 = vpop.f32.mrf.mxu1 }
0x1d2d   :  { %3170 = vpow2.f32 %v2836_v56  ;;  %v2837_v44 = vmul.f32 -1.442695, %v1614_v42 }
0x1d2f   :  { %3172 = vpow2.f32 %v2837_v44 }
0x1d30   :  { %3174 = vtanh.f32 %v1613_v39 }
0x1d3a   :  { %v3171_v35 = vpop.eup %3170 }
0x1d3b   :  { %v1621_v20 = vadd.f32 1.0, %v3171_v35 }
0x1d3c   :  { %v3173_v47 = vpop.eup %3172 }
0x1d3d   :  { %3176 = vrcp.f32 %v1621_v20  ;;  %v1622_v36 = vadd.f32 1.0, %v3173_v47  ;;  %v3175_v24 = vpop.eup %3174 }
0x1d3e   :  { %3178 = vtanh.f32 %v1614_v42 }
0x1d3f   :  { %3180 = vrcp.f32 %v1622_v36 }
0x1d4a   :  { %v3177_v51 = vpop.eup %3176 }
0x1d4b   :  { %v3179_v52 = vpop.eup %3178  ;;  %v1629_v54 = vsel %vm3446_vm5, %v3175_v24, %v3177_v51 }
0x1d4c   :  { %v3181_v60 = vpop.eup %3180  ;;  %1636 = vrot.lane.b32.xlu0 %v1629_v54, %s3298_s2  ;;  %v1634_v62 = vmul.f32 %v1632_v33, %v1629_v54 }
0x1d4d   :  { %v1630_v22 = vsel %vm3453_vm8, %v3179_v52, %v3181_v60 }
0x1d4e   :  { %1650 = vrot.lane.b32.xlu1 %v1630_v22, %s3298_s2  ;;  %v1648_v31 = vmul.f32 %v1646_v7, %v1630_v22 }
0x1dbe   :  { %v1637_v59 = vpop.permute.xlu0 %1636 }
0x1dbf   :  { %v1639_v61 = vmul.f32 %v1637_v59, %v1629_v54 }
0x1dc0   :  { %v1651_v53 = vpop.permute.xlu1 %1650 }
0x1dc1   :  { %v1653_v55 = vmul.f32 %v1651_v53, %v1630_v22  ;;  %1641 = vrot.lane.b32.xlu0 %v1639_v61, %s3300_s3 }
0x1dc3   :  { %1655 = vrot.lane.b32.xlu1 %v1653_v55, %s3300_s3 }
0x1e33   :  { %v1642_v13 = vpop.permute.xlu0 %1641 }
0x1e34   :  { %v3944_v5 = vadd.f32 %v1642_v13, %v1634_v62 }
0x1e35   :  { %v1656_v57 = vpop.permute.xlu1 %1655 }
0x1e36   :  { %3182 = vtanh.f32 %v3944_v5  ;;  %v3947_v8 = vadd.f32 %v1656_v57, %v1648_v31  ;;  %v1754_v60 = vrot.slane %v3944_v5, 6 }
0x1e38   :  { %3184 = vtanh.f32 %v3947_v8 }
0x1e43   :  { %v3183_v18 = vpop.eup %3182 }
0x1e44   :  { %1661 = vrot.lane.b32.xlu0 %v3183_v18, %s3298_s2 }
0x1e45   :  { %v3185_v3 = vpop.eup %3184 }
0x1e46   :  { %1667 = vrot.lane.b32.xlu1 %v3185_v3, %s3298_s2 }
0x1eb6   :  { %v1662_v14 = vpop.permute.xlu0 %1661 }
0x1eb7   :  { %v1664_v15 = vmul.f32 %v1662_v14, %v1629_v54 }
0x1eb8   :  { %v1668_v6 = vpop.permute.xlu1 %1667 }
0x1eb9   :  { %v1670_v17 = vmul.f32 %v1668_v6, %v1630_v22  ;;  %1672 = vrot.lane.b32.xlu0 %v1664_v15, %s3300_s3  ;;  %v1768_v22 = vrot.slane %v3947_v8, 6 }
0x1ebb   :  { %1676 = vrot.lane.b32.xlu1 %v1670_v17, %s3298_s2 }
0x1f2b   :  { %v1673_v19 = vpop.permute.xlu0 %1672 }
0x1f2c   :  { %1680 = vst.msk [vmem:[#allocation3] sm:$0x30] %vm613_vm14, %v1673_v19 }
0x1f2d   :  { %v1677_v23 = vpop.permute.xlu1 %1676 }
0x1f2e   :  { %v1679_v25 = vsel %vm66_vm0, %v1673_v19, %v1677_v23  ;;  %1681 = vst.msk [vmem:[#allocation3 + $0x6] sm:$0x30] %vm615_vm15, %v1677_v23  ;;  %v1805_v23 = vrot.slane %v3788_v46, 6 }
0x1f2f   :  { %v1682_v26 = vpack.c.bf16 %v1679_v25, %v1679_v25 }
0x1f31   :  { %v1684_v27 = vrot.slane %v1682_v26, 2 }
0x1f33   :  { %2838 = vmatmul.mubr.msk.bf16.vlgmr.msra.gmra.mxu0 %vm367_vm11, %v1684_v27 }
0x1f34   :  { %1938 = vmatpush1.bf16.msra.mxu0 %v3820_v11  ;;  %1961 = vmatprep.mubr.bf16.mxu0 %v3296_v2 }
0x1f35   :  { %1939 = vmatprep.subr.bf16.mxu0 %v3825_v4 }
0x1f38   :  { %1940 = vmatpush1.bf16.msra.mxu0 %v3841_v58 }
0x1f39   :  { %1941 = vmatprep.subr.bf16.mxu0 %v3846_v63 }
0x1f3c   :  { %1942 = vmatpush1.bf16.msra.mxu0 %v3852_v0 }
0x1f3d   :  { %1943 = vmatprep.subr.bf16.mxu0 %v3859_v1 }
0x1f40   :  { %1944 = vmatpush1.bf16.msra.mxu0 %v3872_v16 }
0x1f41   :  { %2181 = vmatprep.subr.bf16.mxu0 %v3815_v9 }
0x1ff3   :  { %v1722_v29 = vpop.f32.mrf.mxu0 }
0x1ff4   :  { %v1731_v30 = vrot.slane %v1722_v29, 2 }
0x1ff5   :  { %v1724_v32 = vpop.f32.mrf.mxu0 }
0x1ff6   :  { %v1735_v34 = vadd.f32 %v1731_v30, %v3785_v45  ;;  %v1732_v38 = vrot.slane %v1724_v32, 2 }
0x1ff7   :  { %v1726_v39 = vpop.f32.mrf.mxu0 }
0x1ff8   :  { %v2839_v40 = vmul.f32 -1.442695, %v1735_v34  ;;  %v1736_v41 = vadd.f32 %v1732_v38, %v1394_v37 }
0x1ff9   :  { %v1727_v56 = vpop.f32.mrf.mxu0 }
0x1ffa   :  { %3186 = vpow2.f32 %v2839_v40  ;;  %v2840_v42 = vmul.f32 -1.442695, %v1736_v41 }
0x1ffc   :  { %3188 = vpow2.f32 %v2840_v42 }
0x1ffd   :  { %3190 = vtanh.f32 %v1735_v34 }
0x2007   :  { %v3187_v28 = vpop.eup %3186 }
0x2008   :  { %v1743_v44 = vadd.f32 1.0, %v3187_v28 }
0x2009   :  { %v3189_v35 = vpop.eup %3188 }
0x200a   :  { %3192 = vrcp.f32 %v1743_v44  ;;  %v1744_v9 = vadd.f32 1.0, %v3189_v35  ;;  %v3191_v20 = vpop.eup %3190 }
0x200b   :  { %3194 = vtanh.f32 %v1736_v41 }
0x200c   :  { %3196 = vrcp.f32 %v1744_v9 }
0x2017   :  { %v3193_v45 = vpop.eup %3192 }
0x2018   :  { %v3195_v47 = vpop.eup %3194  ;;  %v1751_v36 = vsel %vm3446_vm5, %v3191_v20, %v3193_v45 }
0x2019   :  { %v3197_v50 = vpop.eup %3196  ;;  %1758 = vrot.lane.b32.xlu0 %v1751_v36, %s3298_s2  ;;  %v1756_v59 = vmul.f32 %v1754_v60, %v1751_v36 }
0x201a   :  { %v1752_v37 = vsel %vm3453_vm8, %v3195_v47, %v3197_v50 }
0x201b   :  { %1772 = vrot.lane.b32.xlu1 %v1752_v37, %s3298_s2  ;;  %v1770_v55 = vmul.f32 %v1768_v22, %v1752_v37 }
0x208b   :  { %v1759_v24 = vpop.permute.xlu0 %1758 }
0x208c   :  { %v1761_v51 = vmul.f32 %v1759_v24, %v1751_v36 }
0x208d   :  { %v1773_v52 = vpop.permute.xlu1 %1772 }
0x208e   :  { %v1775_v54 = vmul.f32 %v1773_v52, %v1752_v37  ;;  %1763 = vrot.lane.b32.xlu0 %v1761_v51, %s3300_s3 }
0x2090   :  { %1777 = vrot.lane.b32.xlu1 %v1775_v54, %s3300_s3 }
0x2100   :  { %v1764_v61 = vpop.permute.xlu0 %1763 }
0x2101   :  { %v3980_v53 = vadd.f32 %v1764_v61, %v1756_v59 }
0x2102   :  { %v1778_v33 = vpop.permute.xlu1 %1777 }
0x2103   :  { %3198 = vtanh.f32 %v3980_v53  ;;  %v3983_v7 = vadd.f32 %v1778_v33, %v1770_v55 }
0x2105   :  { %3200 = vtanh.f32 %v3983_v7  ;;  %v1887_v50 = vrot.slane %v3983_v7, 6 }
0x2110   :  { %v3199_v62 = vpop.eup %3198 }
0x2111   :  { %1783 = vrot.lane.b32.xlu0 %v3199_v62, %s3298_s2 }
0x2112   :  { %v3201_v13 = vpop.eup %3200 }
0x2113   :  { %1789 = vrot.lane.b32.xlu1 %v3201_v13, %s3298_s2 }
0x2183   :  { %v1784_v5 = vpop.permute.xlu0 %1783 }
0x2184   :  { %v1786_v31 = vmul.f32 %v1784_v5, %v1751_v36  ;;  %v1873_v36 = vrot.slane %v3980_v53, 6 }
0x2185   :  { %v1790_v57 = vpop.permute.xlu1 %1789 }
0x2186   :  { %v1792_v8 = vmul.f32 %v1790_v57, %v1752_v37  ;;  %1794 = vrot.lane.b32.xlu0 %v1786_v31, %s3300_s3 }
0x2188   :  { %1798 = vrot.lane.b32.xlu1 %v1792_v8, %s3298_s2 }
0x21f8   :  { %v1795_v18 = vpop.permute.xlu0 %1794 }
0x21f9   :  { %1802 = vst.msk [vmem:[#allocation3] sm:$0xc0] %vm737_vm1, %v1795_v18 }
0x21fa   :  { %v1799_v3 = vpop.permute.xlu1 %1798 }
0x21fb   :  { %v1801_v14 = vsel %vm66_vm0, %v1795_v18, %v1799_v3  ;;  %1803 = vst.msk [vmem:[#allocation3 + $0x2] sm:$0xc0] %vm739_vm2, %v1799_v3 }
0x21fc   :  { %v1807_v15 = vpack.c.bf16 %v1801_v14, %v1801_v14 }
0x21fe   :  { %v1809_v6 = vrot.slane %v1807_v15, 3 }
0x2200   :  { %2841 = vmatmul.mubr.msk.bf16.vlgmr.msra.gmra.mxu1 %vm367_vm11, %v1809_v6 }
0x2201   :  { %2060 = vmatpush1.bf16.msra.mxu1 %v3820_v11  ;;  %2083 = vmatprep.mubr.bf16.mxu1 %v3296_v2 }
0x2202   :  { %2061 = vmatprep.subr.bf16.mxu1 %v3825_v4 }
0x2205   :  { %2062 = vmatpush1.bf16.msra.mxu1 %v3841_v58 }
0x2206   :  { %2063 = vmatprep.subr.bf16.mxu1 %v3846_v63 }
0x2209   :  { %2064 = vmatpush1.bf16.msra.mxu1 %v3852_v0 }
0x220a   :  { %2065 = vmatprep.subr.bf16.mxu1 %v3859_v1 }
0x220d   :  { %2066 = vmatpush1.bf16.msra.mxu1 %v3872_v16 }
0x22c0   :  { %v1847_v17 = vpop.f32.mrf.mxu1 }
0x22c1   :  { %v1854_v19 = vadd.f32 %v1847_v17, %v3790_v49 }
0x22c2   :  { %v1849_v25 = vpop.f32.mrf.mxu1 }
0x22c3   :  { %v2842_v26 = vmul.f32 -1.442695, %v1854_v19  ;;  %v1855_v27 = vadd.f32 %v1849_v25, %v1805_v23 }
0x22c4   :  { %v1851_v29 = vpop.f32.mrf.mxu1 }
0x22c5   :  { %3202 = vpow2.f32 %v2842_v26  ;;  %v2843_v30 = vmul.f32 -1.442695, %v1855_v27 }
0x22c6   :  { %v1852_v32 = vpop.f32.mrf.mxu1 }
0x22c7   :  { %3204 = vpow2.f32 %v2843_v30 }
0x22c8   :  { %3206 = vtanh.f32 %v1854_v19 }
0x22d2   :  { %v3203_v34 = vpop.eup %3202 }
0x22d3   :  { %v1862_v38 = vadd.f32 1.0, %v3203_v34 }
0x22d4   :  { %v3205_v39 = vpop.eup %3204 }
0x22d5   :  { %3208 = vrcp.f32 %v1862_v38  ;;  %v1863_v40 = vadd.f32 1.0, %v3205_v39  ;;  %v3207_v41 = vpop.eup %3206 }
0x22d6   :  { %3210 = vtanh.f32 %v1855_v27 }
0x22d7   :  { %3212 = vrcp.f32 %v1863_v40 }
0x22e2   :  { %v3209_v56 = vpop.eup %3208 }
0x22e3   :  { %v3211_v42 = vpop.eup %3210  ;;  %v1870_v28 = vsel %vm3446_vm5, %v3207_v41, %v3209_v56 }
0x22e4   :  { %v3213_v44 = vpop.eup %3212  ;;  %1877 = vrot.lane.b32.xlu0 %v1870_v28, %s3298_s2  ;;  %v1875_v37 = vmul.f32 %v1873_v36, %v1870_v28 }
0x22e5   :  { %v1871_v35 = vsel %vm3453_vm8, %v3211_v42, %v3213_v44 }
0x22e6   :  { %1891 = vrot.lane.b32.xlu1 %v1871_v35, %s3298_s2  ;;  %v1889_v52 = vmul.f32 %v1887_v50, %v1871_v35 }
0x2356   :  { %v1878_v9 = vpop.permute.xlu0 %1877 }
0x2357   :  { %v1880_v20 = vmul.f32 %v1878_v9, %v1870_v28 }
0x2358   :  { %v1892_v45 = vpop.permute.xlu1 %1891 }
0x2359   :  { %v1894_v47 = vmul.f32 %v1892_v45, %v1871_v35  ;;  %1882 = vrot.lane.b32.xlu0 %v1880_v20, %s3300_s3 }
0x235b   :  { %1896 = vrot.lane.b32.xlu1 %v1894_v47, %s3300_s3 }
0x23cb   :  { %v1883_v24 = vpop.permute.xlu0 %1882 }
0x23cc   :  { %v4016_v51 = vadd.f32 %v1883_v24, %v1875_v37 }
0x23cd   :  { %v1897_v54 = vpop.permute.xlu1 %1896 }
0x23ce   :  { %3214 = vtanh.f32 %v4016_v51  ;;  %v4019_v60 = vadd.f32 %v1897_v54, %v1889_v52  ;;  %v1995_v38 = vrot.slane %v4016_v51, 6 }
0x23d0   :  { %3216 = vtanh.f32 %v4019_v60  ;;  %v2009_v39 = vrot.slane %v4019_v60, 6 }
0x23db   :  { %v3215_v22 = vpop.eup %3214 }
0x23dc   :  { %1902 = vrot.lane.b32.xlu0 %v3215_v22, %s3298_s2 }
0x23dd   :  { %v3217_v59 = vpop.eup %3216 }
0x23de   :  { %1908 = vrot.lane.b32.xlu1 %v3217_v59, %s3298_s2 }
0x244e   :  { %v1903_v61 = vpop.permute.xlu0 %1902 }
0x244f   :  { %v1905_v53 = vmul.f32 %v1903_v61, %v1870_v28 }
0x2450   :  { %v1909_v55 = vpop.permute.xlu1 %1908 }
0x2451   :  { %v1911_v33 = vmul.f32 %v1909_v55, %v1871_v35  ;;  %1913 = vrot.lane.b32.xlu0 %v1905_v53, %s3300_s3 }
0x2453   :  { %1917 = vrot.lane.b32.xlu1 %v1911_v33, %s3298_s2 }
0x24c3   :  { %v1914_v7 = vpop.permute.xlu0 %1913 }
0x24c4   :  { %1921 = vst.msk [vmem:[#allocation3 + $0x8] sm:$0x3] %vm320_vm9, %v1914_v7 }
0x24c5   :  { %v1918_v62 = vpop.permute.xlu1 %1917 }
0x24c6   :  { %v1920_v13 = vsel %vm66_vm0, %v1914_v7, %v1918_v62  ;;  %1922 = vst.msk [vmem:[#allocation3 + $0x6] sm:$0x3] %vm322_vm10, %v1918_v62  ;;  %vm2757_vm10 = vcmask 9216  }
0x24c7   :  { %v1925_v5 = vpack.c.bf16 %v1920_v13, %v1920_v13 }
0x24c9   :  { %2844 = vmatmul.mubr.msk.bf16.vlgmr.msra.gmra.mxu0 %vm367_vm11, %v1925_v5 }
0x24ca   :  { %2182 = vmatpush1.bf16.msra.mxu0 %v3820_v11  ;;  %2205 = vmatprep.mubr.bf16.mxu0 %v3296_v2  ;;  %v1923_v11 = vrot.slane %v3788_v46, 2 }
0x24cb   :  { %2183 = vmatprep.subr.bf16.mxu0 %v3825_v4 }
0x24ce   :  { %2184 = vmatpush1.bf16.msra.mxu0 %v3841_v58 }
0x24cf   :  { %2185 = vmatprep.subr.bf16.mxu0 %v3846_v63 }
0x24d2   :  { %2186 = vmatpush1.bf16.msra.mxu0 %v3852_v0 }
0x24d3   :  { %2187 = vmatprep.subr.bf16.mxu0 %v3859_v1 }
0x24d6   :  { %2188 = vmatpush1.bf16.msra.mxu0 %v3872_v16 }
0x24d7   :  { %2933 = vmatprep.subr.mxu0 %v3297_v12 }
0x2589   :  { %v1963_v31 = vpop.f32.mrf.mxu0 }
0x258a   :  { %v1972_v57 = vrot.slane %v1963_v31, 6 }
0x258b   :  { %v1965_v8 = vpop.f32.mrf.mxu0 }
0x258c   :  { %v1976_v2 = vadd.f32 %v1972_v57, %v3790_v49  ;;  %v1973_v4 = vrot.slane %v1965_v8, 6 }
0x258d   :  { %v1967_v18 = vpop.f32.mrf.mxu0 }
0x258e   :  { %v2845_v58 = vmul.f32 -1.442695, %v1976_v2  ;;  %v1977_v63 = vadd.f32 %v1973_v4, %v1923_v11 }
0x258f   :  { %v1968_v0 = vpop.f32.mrf.mxu0 }
0x2590   :  { %3218 = vpow2.f32 %v2845_v58  ;;  %v2846_v1 = vmul.f32 -1.442695, %v1977_v63 }
0x2592   :  { %3220 = vpow2.f32 %v2846_v1 }
0x2593   :  { %3222 = vtanh.f32 %v1976_v2 }
0x259d   :  { %v3219_v16 = vpop.eup %3218 }
0x259e   :  { %v1984_v3 = vadd.f32 1.0, %v3219_v16 }
0x259f   :  { %v3221_v14 = vpop.eup %3220 }
0x25a0   :  { %3224 = vrcp.f32 %v1984_v3  ;;  %v1985_v15 = vadd.f32 1.0, %v3221_v14  ;;  %v3223_v6 = vpop.eup %3222 }
0x25a1   :  { %3226 = vtanh.f32 %v1977_v63 }
0x25a2   :  { %3228 = vrcp.f32 %v1985_v15 }
0x25ad   :  { %v3225_v17 = vpop.eup %3224 }
0x25ae   :  { %v3227_v19 = vpop.eup %3226  ;;  %v1992_v25 = vsel %vm3446_vm5, %v3223_v6, %v3225_v17 }
0x25af   :  { %v3229_v26 = vpop.eup %3228  ;;  %1999 = vrot.lane.b32.xlu0 %v1992_v25, %s3298_s2  ;;  %v1997_v40 = vmul.f32 %v1995_v38, %v1992_v25 }
0x25b0   :  { %v1993_v27 = vsel %vm3453_vm8, %v3227_v19, %v3229_v26 }
0x25b1   :  { %2013 = vrot.lane.b32.xlu1 %v1993_v27, %s3298_s2  ;;  %v2011_v42 = vmul.f32 %v2009_v39, %v1993_v27 }
0x2621   :  { %v2000_v29 = vpop.permute.xlu0 %1999 }
0x2622   :  { %v2002_v30 = vmul.f32 %v2000_v29, %v1992_v25 }
0x2623   :  { %v2014_v32 = vpop.permute.xlu1 %2013 }
0x2624   :  { %v2016_v34 = vmul.f32 %v2014_v32, %v1993_v27  ;;  %2004 = vrot.lane.b32.xlu0 %v2002_v30, %s3300_s3 }
0x2626   :  { %2018 = vrot.lane.b32.xlu1 %v2016_v34, %s3300_s3 }
0x2696   :  { %v2005_v41 = vpop.permute.xlu0 %2004 }
0x2697   :  { %v2007_v56 = vadd.f32 %v2005_v41, %v1997_v40 }
0x2698   :  { %v2019_v28 = vpop.permute.xlu1 %2018 }
0x2699   :  { %3230 = vtanh.f32 %v2007_v56  ;;  %v2021_v44 = vadd.f32 %v2019_v28, %v2011_v42  ;;  %v2117_v3 = vrot.slane %v2007_v56, 6 }
0x269b   :  { %3232 = vtanh.f32 %v2021_v44  ;;  %v2131_v14 = vrot.slane %v2021_v44, 6 }
0x26a6   :  { %v3231_v35 = vpop.eup %3230 }
0x26a7   :  { %2024 = vrot.lane.b32.xlu0 %v3231_v35, %s3298_s2 }
0x26a8   :  { %v3233_v9 = vpop.eup %3232 }
0x26a9   :  { %2030 = vrot.lane.b32.xlu1 %v3233_v9, %s3298_s2 }
0x2719   :  { %v2025_v20 = vpop.permute.xlu0 %2024 }
0x271a   :  { %v2027_v45 = vmul.f32 %v2025_v20, %v1992_v25 }
0x271b   :  { %v2031_v47 = vpop.permute.xlu1 %2030 }
0x271c   :  { %v2033_v36 = vmul.f32 %v2031_v47, %v1993_v27  ;;  %2035 = vrot.lane.b32.xlu0 %v2027_v45, %s3300_s3 }
0x271e   :  { %2039 = vrot.lane.b32.xlu1 %v2033_v36, %s3298_s2 }
0x278e   :  { %v2036_v50 = vpop.permute.xlu0 %2035 }
0x278f   :  { %2043 = vst.msk [vmem:[#allocation3 + $0x8] sm:$0xc] %vm489_vm12, %v2036_v50 }
0x2790   :  { %v2040_v37 = vpop.permute.xlu1 %2039 }
0x2791   :  { %v2042_v24 = vsel %vm66_vm0, %v2036_v50, %v2040_v37  ;;  %2044 = vst.msk [vmem:[#allocation3 + $0x2] sm:$0xc] %vm491_vm13, %v2040_v37 }
0x2792   :  { %v2045_v51 = vpack.c.bf16 %v2042_v24, %v2042_v24 }
0x2794   :  { %v2047_v52 = vrot.slane %v2045_v51, 1 }
0x2796   :  { %2847 = vmatmul.mubr.msk.bf16.vlgmr.msra.gmra.mxu1 %vm367_vm11, %v2047_v52 }
0x2856   :  { %v2085_v54 = vpop.f32.mrf.mxu1 }
0x2857   :  { %v2094_v60 = vrot.slane %v2085_v54, 4 }
0x2858   :  { %v2087_v22 = vpop.f32.mrf.mxu1 }
0x2859   :  { %v2098_v59 = vadd.f32 %v2094_v60, %v3790_v49  ;;  %v2095_v61 = vrot.slane %v2087_v22, 4 }
0x285a   :  { %v2089_v53 = vpop.f32.mrf.mxu1 }
0x285b   :  { %v2848_v55 = vmul.f32 -1.442695, %v2098_v59  ;;  %v2099_v33 = vadd.f32 %v2095_v61, %v1805_v23 }
0x285c   :  { %v2090_v7 = vpop.f32.mrf.mxu1 }
0x285d   :  { %3234 = vpow2.f32 %v2848_v55  ;;  %v2849_v62 = vmul.f32 -1.442695, %v2099_v33 }
0x285f   :  { %3236 = vpow2.f32 %v2849_v62 }
0x2860   :  { %3238 = vtanh.f32 %v2098_v59 }
0x286a   :  { %v3235_v13 = vpop.eup %3234 }
0x286b   :  { %v2106_v5 = vadd.f32 1.0, %v3235_v13 }
0x286c   :  { %v3237_v31 = vpop.eup %3236 }
0x286d   :  { %3240 = vrcp.f32 %v2106_v5  ;;  %v2107_v57 = vadd.f32 1.0, %v3237_v31  ;;  %v3239_v8 = vpop.eup %3238 }
0x286e   :  { %3242 = vtanh.f32 %v2099_v33 }
0x286f   :  { %3244 = vrcp.f32 %v2107_v57 }
0x287a   :  { %v3241_v2 = vpop.eup %3240 }
0x287b   :  { %v3243_v4 = vpop.eup %3242  ;;  %v2114_v18 = vsel %vm3446_vm5, %v3239_v8, %v3241_v2  ;;  %v2297_v8 = vld [vmem:[%s4222_s8 + $0x38] sm:$0xff]  ;;  %v2296_v2 = vld [vmem:[%s4222_s8 + $0x30] sm:$0xff] }
0x287c   :  { %v3245_v58 = vpop.eup %3244  ;;  %2121 = vrot.lane.b32.xlu0 %v2114_v18, %s3298_s2  ;;  %v2119_v15 = vmul.f32 %v2117_v3, %v2114_v18  ;;  %2907 = vmatprep.subr.mxu1 %v2297_v8 }
0x287d   :  { %v2115_v23 = vsel %vm3453_vm8, %v3243_v4, %v3245_v58  ;;  %2908 = vmatpush3.msra.mxu1 %v2297_v8  ;;  %v2295_v4 = vld [vmem:[%s4222_s8 + $0x28] sm:$0xff] }
0x287e   :  { %2135 = vrot.lane.b32.xlu1 %v2115_v23, %s3298_s2  ;;  %v2133_v19 = vmul.f32 %v2131_v14, %v2115_v23  ;;  %2909 = vmatprep.subr.mxu1 %v2296_v2 }
0x287f   :  { %2910 = vmatpush3.msra.mxu1 %v2296_v2 }
0x2880   :  { %2911 = vmatprep.subr.mxu1 %v2295_v4 }
0x2881   :  { %2912 = vmatpush3.msra.mxu1 %v2295_v4 }
0x28ee   :  { %v2122_v63 = vpop.permute.xlu0 %2121 }
0x28ef   :  { %v2124_v0 = vmul.f32 %v2122_v63, %v2114_v18  ;;  %v2293_v63 = vld [vmem:[%s4222_s8 + $0x18] sm:$0xff] }
0x28f0   :  { %v2136_v1 = vpop.permute.xlu1 %2135 }
0x28f1   :  { %v2138_v16 = vmul.f32 %v2136_v1, %v2115_v23  ;;  %2126 = vrot.lane.b32.xlu0 %v2124_v0, %s3300_s3  ;;  %v2292_v0 = vld [vmem:[%s4222_s8 + $0x10] sm:$0xff]  ;;  %v2291_v1 = vld [vmem:[%s4222_s8 + $0x8] sm:$0xff] }
0x28f3   :  { %2140 = vrot.lane.b32.xlu1 %v2138_v16, %s3300_s3  ;;  %v2290_v16 = vld [vmem:[%s4222_s8] sm:$0xff] }
0x2963   :  { %v2127_v6 = vpop.permute.xlu0 %2126 }
0x2964   :  { %v2129_v17 = vadd.f32 %v2127_v6, %v2119_v15 }
0x2965   :  { %v2141_v25 = vpop.permute.xlu1 %2140 }
0x2966   :  { %3246 = vtanh.f32 %v2129_v17  ;;  %v2143_v26 = vadd.f32 %v2141_v25, %v2133_v19  ;;  %v2239_v7 = vrot.slane %v2129_v17, 6 }
0x2968   :  { %3248 = vtanh.f32 %v2143_v26  ;;  %v2253_v62 = vrot.slane %v2143_v26, 6 }
0x2973   :  { %v3247_v27 = vpop.eup %3246 }
0x2974   :  { %2146 = vrot.lane.b32.xlu0 %v3247_v27, %s3298_s2 }
0x2975   :  { %v3249_v29 = vpop.eup %3248 }
0x2976   :  { %2152 = vrot.lane.b32.xlu1 %v3249_v29, %s3298_s2 }
0x29e6   :  { %v2147_v30 = vpop.permute.xlu0 %2146 }
0x29e7   :  { %v2149_v32 = vmul.f32 %v2147_v30, %v2114_v18  ;;  %v2381_v30 = vadd.s32 8, %v3417_v21 }
0x29e8   :  { %v2153_v34 = vpop.permute.xlu1 %2152 }
0x29e9   :  { %v2155_v38 = vmul.f32 %v2153_v34, %v2115_v23  ;;  %2157 = vrot.lane.b32.xlu0 %v2149_v32, %s3300_s3  ;;  %v2294_v23 = vld [vmem:[%s4222_s8 + $0x20] sm:$0xff]  ;;  %v2393_v32 = vand.u32 1, %v2381_v30  ;;  %v2386_v34 = vand.u32 1, %v3417_v21  ;;  %v2583_v30 = vld [vmem:[%s4223_s9 + $0x8] sm:$0xff] }
0x29ea   :  { %2913 = vmatprep.subr.mxu1 %v2294_v23 }
0x29eb   :  { %2161 = vrot.lane.b32.xlu1 %v2155_v38, %s3298_s2  ;;  %2914 = vmatpush3.msra.mxu1 %v2294_v23  ;;  %vm2407_vm3 = vcmp.eq.s32.totalorder %v2393_v32, %v3400_v10  ;;  %vm2406_vm4 = vcmp.eq.s32.totalorder %v2386_v34, %v3400_v10  ;;  %v2485_v32 = vand.u32 1, %v3400_v10  ;;  %v2582_v10 = vld [vmem:[%s4223_s9] sm:$0xff] }
0x29ec   :  { %2915 = vmatprep.subr.mxu1 %v2293_v63 }
0x29ed   :  { %2916 = vmatpush3.msra.mxu1 %v2293_v63  ;;  %vm2493_vm7 = vcmp.eq.s32.totalorder %v2485_v32, %v3417_v21  ;;  %v2676_v21 = vld [vmem:[%s4225_s11 + $0x18] sm:$0xff] }
0x29ee   :  { %2917 = vmatprep.subr.mxu1 %v2292_v0 }
0x29ef   :  { %2918 = vmatpush3.msra.mxu1 %v2292_v0 }
0x29f0   :  { %2919 = vmatprep.subr.mxu1 %v2291_v1 }
0x29f1   :  { %2920 = vmatpush3.msra.mxu1 %v2291_v1 }
0x29f2   :  { %2921 = vmatprep.subr.mxu1 %v2290_v16 }
0x29f3   :  { %2922 = vmatpush3.msra.mxu1 %v2290_v16 }
0x29f4   :  { %2926 = vmatprep.subr.mxu1 %v3297_v12 }
0x2a5b   :  { %v2158_v39 = vpop.permute.xlu0 %2157 }
0x2a5c   :  { %2165 = vst.msk [vmem:[#allocation3 + $0x8] sm:$0x30] %vm613_vm14, %v2158_v39 }
0x2a5d   :  { %v2162_v40 = vpop.permute.xlu1 %2161 }
0x2a5e   :  { %v2164_v41 = vsel %vm66_vm0, %v2158_v39, %v2162_v40  ;;  %2166 = vst.msk [vmem:[#allocation3 - $0x2] sm:$0x30] %vm615_vm15, %v2162_v40 }
0x2a5f   :  { %v2167_v56 = vpack.c.bf16 %v2164_v41, %v2164_v41 }
0x2a61   :  { %v2169_v42 = vrot.slane %v2167_v56, 2 }
0x2a63   :  { %2850 = vmatmul.mubr.msk.bf16.vlgmr.msra.gmra.mxu0 %vm367_vm11, %v2169_v42 }
0x2a64   :  { %2949 = vmatprep.mubr.msk.f32.mxu0 %vm3301_vm6, %v3297_v12 }
0x2b23   :  { %v2207_v28 = vpop.f32.mrf.mxu0 }
0x2b24   :  { %v2216_v44 = vrot.slane %v2207_v28, 2 }
0x2b25   :  { %v2209_v35 = vpop.f32.mrf.mxu0 }
0x2b26   :  { %v2220_v9 = vadd.f32 %v2216_v44, %v3790_v49  ;;  %v2217_v20 = vrot.slane %v2209_v35, 2 }
0x2b27   :  { %v2211_v45 = vpop.f32.mrf.mxu0 }
0x2b28   :  { %v2851_v47 = vmul.f32 -1.442695, %v2220_v9  ;;  %v2221_v36 = vadd.f32 %v2217_v20, %v1923_v11 }
0x2b29   :  { %v2212_v50 = vpop.f32.mrf.mxu0 }
0x2b2a   :  { %3250 = vpow2.f32 %v2851_v47  ;;  %v2852_v37 = vmul.f32 -1.442695, %v2221_v36  ;;  %v2856_v47 = vsel %vm2407_vm3, 1.0, %v3297_v12 }
0x2b2c   :  { %3252 = vpow2.f32 %v2852_v37 }
0x2b2d   :  { %3254 = vtanh.f32 %v2220_v9 }
0x2b37   :  { %v3251_v24 = vpop.eup %3250 }
0x2b38   :  { %v2228_v51 = vadd.f32 1.0, %v3251_v24 }
0x2b39   :  { %v3253_v52 = vpop.eup %3252 }
0x2b3a   :  { %3256 = vrcp.f32 %v2228_v51  ;;  %v2229_v54 = vadd.f32 1.0, %v3253_v52  ;;  %v3255_v60 = vpop.eup %3254 }
0x2b3b   :  { %3258 = vtanh.f32 %v2221_v36  ;;  %v2855_v36 = vsel %vm2406_vm4, 1.0, %v3297_v12 }
0x2b3c   :  { %3260 = vrcp.f32 %v2229_v54 }
0x2b47   :  { %v3257_v49 = vpop.eup %3256 }
0x2b48   :  { %v3259_v22 = vpop.eup %3258  ;;  %v2236_v59 = vsel %vm3446_vm5, %v3255_v60, %v3257_v49  ;;  %vm2424_vm5 = vcmask 15360  }
0x2b49   :  { %v3261_v46 = vpop.eup %3260  ;;  %2243 = vrot.lane.b32.xlu1 %v2236_v59, %s3298_s2  ;;  %v2241_v43 = vmul.f32 %v2239_v7, %v2236_v59 }
0x2b4a   :  { %v2237_v11 = vsel %vm3453_vm8, %v3259_v22, %v3261_v46  ;;  %vm2508_vm8 = vcmask 130048  }
0x2b4b   :  { %2257 = vrot.lane.b32.xlu0 %v2237_v11, %s3298_s2  ;;  %v2255_v31 = vmul.f32 %v2253_v62, %v2237_v11 }
0x2bbb   :  { %v2244_v61 = vpop.permute.xlu1 %2243 }
0x2bbc   :  { %v2246_v53 = vmul.f32 %v2244_v61, %v2236_v59 }
0x2bbd   :  { %v2258_v55 = vpop.permute.xlu0 %2257 }
0x2bbe   :  { %v2260_v33 = vmul.f32 %v2258_v55, %v2237_v11  ;;  %2248 = vrot.lane.b32.xlu1 %v2246_v53, %s3300_s3 }
0x2bc0   :  { %2262 = vrot.lane.b32.xlu0 %v2260_v33, %s3300_s3 }
0x2c30   :  { %v2249_v13 = vpop.permute.xlu1 %2248 }
0x2c31   :  { %v2251_v5 = vadd.f32 %v2249_v13, %v2241_v43 }
0x2c32   :  { %v2263_v57 = vpop.permute.xlu0 %2262 }
0x2c33   :  { %3262 = vtanh.f32 %v2251_v5  ;;  %v2265_v48 = vadd.f32 %v2263_v57, %v2255_v31 }
0x2c35   :  { %3264 = vtanh.f32 %v2265_v48 }
0x2c40   :  { %v3263_v18 = vpop.eup %3262 }
0x2c41   :  { %2268 = vrot.lane.b32.xlu1 %v3263_v18, %s3298_s2 }
0x2c42   :  { %v3265_v58 = vpop.eup %3264 }
0x2c43   :  { %2274 = vrot.lane.b32.xlu0 %v3265_v58, %s3298_s2 }
0x2cb3   :  { %v2269_v3 = vpop.permute.xlu1 %2268 }
0x2cb4   :  { %v2271_v14 = vmul.f32 %v2269_v3, %v2236_v59 }
0x2cb5   :  { %v2275_v15 = vpop.permute.xlu0 %2274 }
0x2cb6   :  { %v2277_v6 = vmul.f32 %v2275_v15, %v2237_v11  ;;  %2279 = vrot.lane.b32.xlu1 %v2271_v14, %s3300_s3  ;;  %v2589_v15 = vld [vmem:[%s4223_s9 + $0x38] sm:$0xff] }
0x2cb7   :  { %2934 = vmatpush3.msra.mxu0 %v2589_v15 }
0x2cb8   :  { %2284 = vrot.lane.b32.xlu0 %v2277_v6, %s3298_s2  ;;  %v2588_v6 = vld [vmem:[%s4223_s9 + $0x30] sm:$0xff]  ;;  %2935 = vmatprep.subr.mxu0 %v3297_v12  ;;  %s3302_s2 = smov [#allocation4]  }
0x2cb9   :  { %2936 = vmatpush3.msra.mxu0 %v2588_v6  ;;  %s2765_s3 = sshll.u32 %s3302_s2, 4  ;;  %s2766_s3 = int_to_ptr.vmem [resolvable:$true] %s2765_s3 }
0x2cba   :  { %2937 = vmatprep.subr.mxu0 %v3297_v12  ;;  %p3279_p1 = scmp.lt.s32.totalorder %s2766_s3, %s2766_s3 }
0x2d28   :  { %v2280_v17 = vpop.permute.xlu1 %2279 }
0x2d29   :  { %2282 = vst.msk [vmem:[#allocation3 + $0x8] sm:$0xc0] %vm737_vm1, %v2280_v17  ;;  %v2587_v17 = vld [vmem:[%s4223_s9 + $0x28] sm:$0xff] }
0x2d2a   :  { %v2285_v19 = vpop.permute.xlu0 %2284  ;;  %2938 = vmatpush3.msra.mxu0 %v2587_v17 }
0x2d2b   :  { %2287 = vst.msk [vmem:[#allocation3 - $0x6] sm:$0xc0] %vm739_vm2, %v2285_v19  ;;  %v2586_v19 = vld [vmem:[%s4223_s9 + $0x20] sm:$0xff]  ;;  %2939 = vmatprep.subr.mxu0 %v3297_v12 }
0x2d2c   :  { %2940 = vmatpush3.msra.mxu0 %v2586_v19 }
0x2d2d   :  { %2941 = vmatprep.subr.mxu0 %v3297_v12 }
0x2d30   :  { %v4126_v26 = vld [vmem:[#allocation3 + $0x8] sm:$0xff] }
0x2d32   :  { %v4122_v25 = vld [vmem:[#allocation3] sm:$0xff] }
0x2d33   :  { %2923 = vmatprep.mubr.msk.f32.mxu1 %vm367_vm11, %v4122_v25 }
0x2d34   :  { %2924 = vmatmul.mubr.msk.f32.vlgmr.msra.gmra.mxu1 %vm367_vm11, %v4126_v26 }
0x2d35   :  { %2930 = vmatprep.mubr.msk.f32.mxu1 %vm3301_vm6, %v3297_v12 }
0x2df4   :  { %v2925_v27 = vpop.f32.mrf.mxu1 }
0x2df5   :  { %2419 = vperm.xlu1 %2971, %v2925_v27  }
0x2df6   :  { %v2370_v29 = vpop.f32.mrf.mxu1 }
0x2df7   :  { %2414 = vperm.xlu0 %2970, %v2370_v29  }
0x2e70   :  { %v2420_v38 = vpop.permute.xlu1 %2419 }
0x2e71   :  { %v2423_v39 = vsel %vm2407_vm3, %v2420_v38, -inf }
0x2e72   :  { %v2415_v40 = vpop.permute.xlu0 %2414  ;;  %v2426_v56 = vsel %vm2424_vm5, %v2423_v39, -inf }
0x2e73   :  { %v2422_v41 = vsel %vm2406_vm4, %v2415_v40, -inf }
0x2e74   :  { %v2425_v42 = vsel %vm2424_vm5, %v2422_v41, -inf  ;;  %v2857_v41 = vsel %vm2493_vm7, 1.0, %v3297_v12 }
0x2e75   :  { %v2427_v28 = vmax.f32 %v2425_v42, %v2426_v56  ;;  %v2675_v56 = vld [vmem:[%s4225_s11 + $0x10] sm:$0xff]  ;;  %v2674_v42 = vld [vmem:[%s4225_s11 + $0x8] sm:$0xff] }
0x2e77   :  { %v2428_v44 = vrot.slane %v2427_v28, 4 }
0x2e79   :  { %v2429_v35 = vmax.f32 %v2427_v28, %v2428_v44  ;;  %v2673_v28 = vld [vmem:[%s4225_s11] sm:$0xff] }
0x2e7a   :  { %v2859_v44 = vld [vmem:[%s4224_s10] ss:$0 sm:$0xff]  ;;  %s3274_s10 = scalar_lea.vmem %s2766_s3, 32 }
0x2e7b   :  { %v2430_v9 = vrot.slane %v2429_v35, 2  ;;  %p3275_p0 = scmp.ne.s32.totalorder %s2766_s3, %s3274_s10  ;;  %p3280_p2 = scmp.lt.s32.totalorder %s3274_s10, %s3274_s10 }
0x2e7d   :  { %v2431_v20 = vmax.f32 %v2429_v35, %v2430_v9  ;;  %p3281_p3 = por %p3280_p2, %p3279_p1 }
0x2e7f   :  { %v2432_v45 = vrot.slane %v2431_v20, 1  ;;  %p3282_p4 = pnand %p3281_p3, %p3275_p0 }
0x2e81   :  { %v2433_v50 = vmax.f32 %v2431_v20, %v2432_v45 }
0x2e83   :  { %v2435_v37 = vmul.f32 %v2856_v47, %v2433_v50  ;;  %v2434_v24 = vmul.f32 %v2855_v36, %v2433_v50 }
0x2e85   :  { %v2439_v51 = vsel %vm2424_vm5, %v2435_v37, 0.0  ;;  %v2436_v52 = vsel %vm2424_vm5, %v2434_v24, 0.0 }
0x2e86   :  { %2440 = vadd.xlane.f32.xlu1 %v2439_v51  ;;  %2437 = vadd.xlane.f32.xlu0 %v2436_v52 }
0x2f0f   :  { %v2441_v54 = vpop.xlane.xlu1 %2440  ;;  %v2438_v60 = vpop.xlane.xlu0 %2437 }
0x2f10   :  { %v2443_v49 = vsub.f32 %v2925_v27, %v2441_v54  ;;  %v2442_v22 = vsub.f32 %v2370_v29, %v2438_v60  ;;  %v2585_v27 = vld [vmem:[%s4223_s9 + $0x18] sm:$0xff]  ;;  %v2584_v29 = vld [vmem:[%s4223_s9 + $0x10] sm:$0xff] }
0x2f11   :  { %2942 = vmatpush3.msra.mxu0 %v2585_v27 }
0x2f12   :  { %v2446_v59 = vmul.f32 1.442695, %v2443_v49  ;;  %v2444_v46 = vmul.f32 1.442695, %v2442_v22  ;;  %2943 = vmatprep.subr.mxu0 %v3297_v12 }
0x2f13   :  { %2944 = vmatpush3.msra.mxu0 %v2584_v29 }
0x2f14   :  { %3266 = vpow2.f32 %v2446_v59  ;;  %2945 = vmatprep.subr.mxu0 %v3297_v12 }
0x2f15   :  { %3268 = vpow2.f32 %v2444_v46  ;;  %2946 = vmatpush3.msra.mxu0 %v2583_v30 }
0x2f16   :  { %2947 = vmatprep.subr.mxu0 %v3297_v12 }
0x2f17   :  { %2948 = vmatpush3.msra.mxu0 %v2582_v10 }
0x2f21   :  { %v3267_v11 = vpop.eup %3266 }
0x2f22   :  { %v3269_v61 = vpop.eup %3268  ;;  %2455 = vperm.xlu1 %2971, %v3267_v11  }
0x2f23   :  { %2450 = vperm.xlu0 %2970, %v3269_v61  }
0x2f9d   :  { %v2456_v53 = vpop.permute.xlu1 %2455 }
0x2f9e   :  { %v2459_v55 = vmul.f32 %v2856_v47, %v2456_v53  ;;  %v2451_v33 = vpop.permute.xlu0 %2450 }
0x2f9f   :  { %v2458_v7 = vmul.f32 %v2855_v36, %v2451_v33 }
0x2fa0   :  { %v2461_v62 = vsel %vm2424_vm5, %v2459_v55, 0.0 }
0x2fa1   :  { %v2460_v43 = vsel %vm2424_vm5, %v2458_v7, 0.0 }
0x2fa2   :  { %v2462_v13 = vadd.f32 %v2461_v62, %v2460_v43 }
0x2fa4   :  { %v2463_v5 = vrot.slane %v2462_v13, 4 }
0x2fa6   :  { %v2464_v31 = vadd.f32 %v2463_v5, %v2462_v13 }
0x2fa8   :  { %v2465_v57 = vrot.slane %v2464_v31, 2 }
0x2faa   :  { %v2466_v48 = vadd.f32 %v2465_v57, %v2464_v31 }
0x2fac   :  { %v2467_v8 = vrot.slane %v2466_v48, 1 }
0x2fae   :  { %v2468_v2 = vadd.f32 %v2467_v8, %v2466_v48 }
0x2fb0   :  { %v2470_v4 = vmul.f32 %v2856_v47, %v2468_v2  ;;  %v2469_v18 = vmul.f32 %v2855_v36, %v2468_v2 }
0x2fb2   :  { %v2474_v58 = vsel %vm2424_vm5, %v2470_v4, 0.0  ;;  %v2471_v23 = vsel %vm2424_vm5, %v2469_v18, 0.0 }
0x2fb3   :  { %2475 = vadd.xlane.f32.xlu0 %v2474_v58  ;;  %2472 = vadd.xlane.f32.xlu1 %v2471_v23 }
0x303c   :  { %v2476_v63 = vpop.xlane.xlu0 %2475  ;;  %v2473_v0 = vpop.xlane.xlu1 %2472 }
0x303d   :  { %3270 = vrcp.f32 %v2476_v63 }
0x303e   :  { %3272 = vrcp.f32 %v2473_v0 }
0x304a   :  { %v3271_v1 = vpop.eup %3270 }
0x304b   :  { %v3273_v16 = vpop.eup %3272  ;;  %v2480_v3 = vmul.f32 %v3271_v1, %v3267_v11 }
0x304c   :  { %v2479_v14 = vmul.f32 %v3273_v16, %v3269_v61 }
0x304d   :  { %2503 = vperm.xlu0 %2970, %v2480_v3  }
0x304e   :  { %2498 = vperm.xlu1 %2971, %v2479_v14  }
0x30c8   :  { %v2504_v34 = vpop.permute.xlu0 %2503 }
0x30c9   :  { %v2507_v38 = vmul.f32 %v2504_v34, %v4126_v26  ;;  %v2499_v39 = vpop.permute.xlu1 %2498 }
0x30ca   :  { %v2506_v40 = vmul.f32 %v2499_v39, %v4122_v25 }
0x30cb   :  { %2927 = vmatpush3.msra.mxu1 %v2507_v38 }
0x30cc   :  { %2928 = vmatprep.subr.mxu1 %v3297_v12 }
0x30cd   :  { %2929 = vmatpush3.msra.mxu1 %v2506_v40 }
0x30ce   :  { %2931 = vmatmul.mubr.msk.f32.vlgmr.msra.gmra.mxu1 %vm2508_vm8, %v2857_v41  ;;  %2952 = vmatprep.subr.mxu1 %v3297_v12 }
0x30cf   :  { %2960 = vmatprep.mubr.msk.f32.mxu1 %vm3301_vm6, %v3297_v12  ;;  %2953 = vmatpush3.msra.mxu1 %v2676_v21 }
0x30d0   :  { %2954 = vmatprep.subr.mxu1 %v3297_v12 }
0x30d1   :  { %2955 = vmatpush3.msra.mxu1 %v2675_v56 }
0x30d2   :  { %2956 = vmatprep.subr.mxu1 %v3297_v12 }
0x30d3   :  { %2957 = vmatpush3.msra.mxu1 %v2674_v42 }
0x30d4   :  { %2958 = vmatprep.subr.mxu1 %v3297_v12  ;;  %v2861_v12 = vld [vmem:[%s4226_s12] ss:$0 sm:$0xff] }
0x30d5   :  { %2959 = vmatpush3.msra.mxu1 %v2673_v28 }
0x318e   :  { %v2578_v25 = vpop.f32.mrf.mxu1 }
0x318f   :  { %2950 = vmatmul.mubr.msk.f32.vlgmr.msra.gmra.mxu0 %vm367_vm11, %v2578_v25 }
0x3190   :  { %v2932_v26 = vpop.f32.mrf.mxu1 }
0x324f   :  { %v2666_v35 = vpop.f32.mrf.mxu0 }
0x3250   :  { %v2667_v9 = vadd.f32 %v2859_v44, %v2666_v35 }
0x3251   :  { %v2951_v20 = vpop.f32.mrf.mxu0 }
0x3252   :  { %vm2670_vm9 = vcmp.gt.f32.partialorder %v2667_v9, 0.0  ;;  %v2671_v45 = vmul.f32 0.01, %v2667_v9 }
0x3254   :  { %v2672_v47 = vsel %vm2670_vm9, %v2667_v9, %v2671_v45 }
0x3255   :  { %2961 = vmatmul.mubr.msk.f32.vlgmr.msra.gmra.mxu1 %vm66_vm0, %v2672_v47 }
0x3315   :  { %v2753_v36 = vpop.f32.mrf.mxu1 }
0x3316   :  { %v2754_v50 = vadd.f32 %v2861_v12, %v2753_v36 }
0x3317   :  { %v2962_v37 = vpop.f32.mrf.mxu1 }
0x3318   :  { %2758 = vst.msk [vmem:[#allocation4] sm:$0x3] %vm2757_vm10, %v2754_v50 }
0x3319   :  { %3285 = shalt.err (!%p3282_p4)
}
0x331a   :  { %2768 = dma.vmem_to_hbm [thread:$0]  %s2766_s3, 32, %s4227_s13, [#allocation5]  }
0x331b   :  { %3294 = dma.done.wait [#allocation5], 32  }
0x331c   :  { %3295 = vsyncadd [#allocation5], 4294967264 }
0x331d   :  { %2772 = vsyncpa [#allocation5], 1 }

</bundles_post_ra>
